<compile_context>
chip_gen: v7x
topology: tpu7x:2x2x1
jax: 0.10.0
libtpu: 0.0.40
codegen_flags: <defaults>
</compile_context>

<pallas_src>
import functools

import jax
import jax.numpy as jnp
import numpy as np
from jax.experimental import pallas as pl
from jax.experimental.pallas import tpu as pltpu


# --------------------------------- kernel ----------------------------------
def siamese_kernel(xpf_ref, xpb_ref, diffb_ref, whh_ref, bhn_ref,
                   wlin_ref, blin_ref, out_ref, *, T, S2, H, HP):
    # Hoisted loads / broadcasts (JAX does not CSE broadcast_in_dim in loops).
    whh_f = whh_ref[0]                                        # (H, 3HP) bf16
    whh_b = whh_ref[1]
    bhn_f = jnp.broadcast_to(bhn_ref[0], (S2, HP))            # (S2, HP) f32
    bhn_b = jnp.broadcast_to(bhn_ref[1], (S2, HP))

    def cell(h, xp, whh, bhn):
        # PyTorch gate order [r, z, n]; xp already carries emb @ W_i* plus the
        # input biases and the r/z hidden biases; bhn is the n-gate hidden
        # bias that lives inside r * ( . ).  Gate blocks are 128-lane aligned.
        g = jnp.dot(h[:, 0:H].astype(jnp.bfloat16), whh,
                    preferred_element_type=jnp.float32)       # (S2, 3HP) f32
        r = jax.nn.sigmoid(xp[:, 0:HP] + g[:, 0:HP])
        z = jax.nn.sigmoid(xp[:, HP:2 * HP] + g[:, HP:2 * HP])
        n = jnp.tanh(xp[:, 2 * HP:3 * HP] + r * (g[:, 2 * HP:3 * HP] + bhn))
        return (1.0 - z) * n + z * h                          # (S2, HP)

    h_f = jnp.zeros((S2, HP), jnp.float32)
    h_b = jnp.zeros((S2, HP), jnp.float32)
    hid_f, hid_b = [], []

    # Fully-unrolled recurrence over T (= data batch B, small & static).  The
    # forward and backward directions run in the same step so their
    # MXU / EUP / VPU work interleaves.
    # TODO(synk): switch to lax.fori_loop(..., unroll=2) carrying (h_f, h_b,
    # hid) if T grows beyond ~32, to bound code size and vreg live ranges.
    for t in range(T):
        tb = T - 1 - t
        h_f = cell(h_f, xpf_ref[t * S2:(t + 1) * S2, :], whh_f, bhn_f)
        h_b = cell(h_b, xpb_ref[tb * S2:(tb + 1) * S2, :], whh_b, bhn_b)
        # Mix: hid[t] = sum_k diff[t, k] * h[k, :]  done as a VPU multiply +
        # sublane reduce (keeps the MXU issue slot free for the next hidden
        # dot).  Results accumulate in registers; no masked row stores.
        d_f = diffb_ref[t * S2:(t + 1) * S2, :]               # (S2, HP)
        d_b = diffb_ref[tb * S2:(tb + 1) * S2, :]
        hid_f.append(jnp.sum(d_f * h_f, axis=0, keepdims=True))   # (1, HP)
        hid_b.append(jnp.sum(d_b * h_b, axis=0, keepdims=True))

    hid = jnp.concatenate([jnp.concatenate(hid_f, axis=0),
                           jnp.concatenate(hid_b[::-1], axis=0)],
                          axis=-1)                            # (T, 2HP)
    logits = (jnp.dot(hid, wlin_ref[...], preferred_element_type=jnp.float32)
              + blin_ref[...])                                # (T, 3)
    e = jnp.exp(logits - jnp.max(logits, axis=-1, keepdims=True))
    out_ref[...] = e / jnp.sum(e, axis=-1, keepdims=True)


# --------------------------------- wrapper ---------------------------------
def _fold_direction(params, d, emb, HP):
    """Fold embedding + input projection + biases into one gate-padded table."""
    wih = params[f"wih_{d}"]      # (3, E, H)
    whh = params[f"whh_{d}"]      # (3, H, H)
    bih = params[f"bih_{d}"]      # (3, 1, H)
    bhh = params[f"bhh_{d}"]      # (3, 1, H)

    def lanepad(w):               # zero-pad last dim to HP (128-lane aligned)
        return jnp.pad(w, ((0, 0), (0, HP - w.shape[-1])))

    wih_cat = jnp.concatenate([lanepad(wih[i]) for i in range(3)], axis=-1)  # (E, 3HP)
    bias = jnp.concatenate([lanepad(bih[0] + bhh[0]),
                            lanepad(bih[1] + bhh[1]),
                            lanepad(bih[2])], axis=-1)                       # (1, 3HP)
    table = jnp.dot(emb, wih_cat) + bias                                     # (V, 3HP)
    whh_cat = jnp.concatenate([lanepad(whh[i]) for i in range(3)], axis=-1)  # (H, 3HP)
    bhn = lanepad(bhh[2])                                                    # (1, HP)
    return table, whh_cat, bhn


@functools.partial(jax.jit, static_argnames=("alpha",))
def siamese_forward(params, x1_tok, x2_tok, x1_e, x2_e, *, alpha):
    emb = params["embedding"]                     # (V, E)
    H = params["whh_f"].shape[-1]
    B, S = x1_tok.shape
    if S < 6:
        raise ValueError("SiameseNetwork hard-codes out[:, 5, :]; need S >= 6")
    HP = ((H + 127) // 128) * 128                 # gate blocks padded to lane groups
    S2, T = 2 * S, B

    # ---- offline-foldable weight prep (constant-folded under jit; in a real
    # deployment these tables would be precomputed once, not per call) -------
    table_f, whh_f, bhn_f = _fold_direction(params, "f", emb, HP)
    table_b, whh_b, bhn_b = _fold_direction(params, "b", emb, HP)
    whh = jnp.stack([whh_f, whh_b]).astype(jnp.bfloat16)      # (2, H, 3HP)
    bhn = jnp.stack([bhn_f, bhn_b])                           # (2, 1, HP)
    wlin = jnp.zeros((2 * HP, 3), jnp.float32)
    wlin = wlin.at[0:H, :].set(params["wlin_T"][0:H])
    wlin = wlin.at[HP:HP + H, :].set(params["wlin_T"][H:2 * H])
    blin = params["blin"]                                     # (1, 3)

    # ---- token side: embedding is folded into the projection table, so the
    # input side of the GRU becomes a pure row gather (done here in XLA) -----
    tok = jnp.concatenate([x1_tok, x2_tok], axis=1).astype(jnp.int32).reshape(-1)
    xp_f = jnp.take(table_f, tok, axis=0)                     # (T*2S, 3HP)
    xp_b = jnp.take(table_b, tok, axis=0)

    # ---- fold index-5 select + bmm(x_e, out) + alpha blend + branch
    # subtraction into one mixing row per timestep, pre-broadcast over the
    # (padded) hidden dim so the kernel never transposes / lane-broadcasts ---
    xe1 = jnp.squeeze(x1_e, axis=1).astype(jnp.float32)       # (B, S)
    xe2 = jnp.squeeze(x2_e, axis=1).astype(jnp.float32)
    onehot5 = jnp.zeros((S,), jnp.float32).at[5].set(1.0)     # hard-coded idx 5
    d1 = (1.0 - alpha) * onehot5[None, :] + alpha * xe1
    d2 = (1.0 - alpha) * onehot5[None, :] + alpha * xe2
    diff = jnp.concatenate([d1, -d2], axis=1)                 # (B, 2S)
    diffb = jnp.broadcast_to(diff.reshape(T * S2, 1), (T * S2, HP))

    kernel = functools.partial(siamese_kernel, T=T, S2=S2, H=H, HP=HP)
    return pl.pallas_call(
        kernel,
        out_shape=jax.ShapeDtypeStruct((B, 3), jnp.float32),
        in_specs=[pl.BlockSpec(memory_space=pltpu.MemorySpace.VMEM)] * 7,
        out_specs=pl.BlockSpec(memory_space=pltpu.MemorySpace.VMEM),
    )(xp_f, xp_b, diffb, whh, bhn, wlin, blin)
    # TODO(synk): on v7x (2 TensorCores) the fwd/bwd directions could be split
    # across cores via grid=(2,) + dimension_semantics=("parallel",); on 1-TC
    # chips (v5e/v6e) this interleaved single-program layout is the right one.


# --------------------------------- params ----------------------------------
def init_params(key, word_nums, E, H):
    ks = jax.random.split(key, 11)
    scale = 0.1

    def nrm(k, shape):
        return (scale * jax.random.normal(k, shape)).astype(jnp.float32)

    return {
        "embedding": nrm(ks[0], (word_nums, E)),   # stands in for pretrained_embedding
        "wih_f": nrm(ks[1], (3, E, H)), "whh_f": nrm(ks[2], (3, H, H)),
        "bih_f": nrm(ks[3], (3, 1, H)), "bhh_f": nrm(ks[4], (3, 1, H)),
        "wih_b": nrm(ks[5], (3, E, H)), "whh_b": nrm(ks[6], (3, H, H)),
        "bih_b": nrm(ks[7], (3, 1, H)), "bhh_b": nrm(ks[8], (3, 1, H)),
        "wlin_T": nrm(ks[9], (2 * H, 3)),
        "blin": nrm(ks[10], (1, 3)),
    }


# ----------------------- pure-JAX reference (for checking) -----------------
def _gru_dir_ref(x, wih, whh, bih, bhh, reverse):
    S, H = x.shape[1], whh.shape[-1]

    def cell(h, x_t):
        r = jax.nn.sigmoid(x_t @ wih[0] + bih[0] + h @ whh[0] + bhh[0])
        z = jax.nn.sigmoid(x_t @ wih[1] + bih[1] + h @ whh[1] + bhh[1])
        n = jnp.tanh(x_t @ wih[2] + bih[2] + r * (h @ whh[2] + bhh[2]))
        h_new = (1.0 - z) * n + z * h
        return h_new, h_new

    xs = x[::-1] if reverse else x
    _, outs = jax.lax.scan(cell, jnp.zeros((S, H), jnp.float32), xs)
    return outs[::-1] if reverse else outs


def siamese_forward_ref(params, x1_tok, x2_tok, x1_e, x2_e, *, alpha):
    emb = params["embedding"]

    def forward_once(x, xe3):
        out_f = _gru_dir_ref(x, params["wih_f"], params["whh_f"],
                             params["bih_f"], params["bhh_f"], False)
        out_b = _gru_dir_ref(x, params["wih_b"], params["whh_b"],
                             params["bih_b"], params["bhh_b"], True)
        out = jnp.concatenate([out_f, out_b], axis=-1)               # (B, S, 2H)
        out1 = out[:, 5, :]
        out2 = jnp.squeeze(jnp.matmul(xe3.astype(jnp.float32), out), axis=1)
        return (1.0 - alpha) * out1 + alpha * out2

    x1 = jnp.take(emb, x1_tok.astype(jnp.int32), axis=0)
    x2 = jnp.take(emb, x2_tok.astype(jnp.int32), axis=0)
    hidden = forward_once(x1, x1_e) - forward_once(x2, x2_e)
    logits = hidden @ params["wlin_T"] + params["blin"]
    return jax.nn.softmax(logits, axis=-1)


if __name__ == "__main__":
    # batch, seq (>= 6 for the hard-coded index 5), vocab, emb, hidden
    B, S, V, E, H = 8, 8, 50, 32, 32
    alpha = 0.5
    key = jax.random.PRNGKey(0)
    k1, k2, k3, k4, kp = jax.random.split(key, 5)

    x1_tok = jax.random.randint(k1, (B, S), 0, V, dtype=jnp.int32)
    x2_tok = jax.random.randint(k2, (B, S), 0, V, dtype=jnp.int32)
    x1_e = jax.random.uniform(k3, (B, 1, S), dtype=jnp.float32)
    x2_e = jax.random.uniform(k4, (B, 1, S), dtype=jnp.float32)
    params = init_params(kp, V, E, H)

    out = siamese_forward(params, x1_tok, x2_tok, x1_e, x2_e, alpha=alpha)
    out = jax.block_until_ready(out)

    ref = siamese_forward_ref(params, x1_tok, x2_tok, x1_e, x2_e, alpha=alpha)
    # bf16 MXU operands in the recurrence -> slightly loosened tolerance vs f32 ref.
    np.testing.assert_allclose(np.asarray(out), np.asarray(ref), rtol=2e-2, atol=2e-2)
    assert out.shape == (B, 3)
    print("KERNEL_OK")
</pallas_src>

<mosaic_0001>
module attributes {stable_mosaic.version = 11 : i64} {
  func.func @siamese_kernel(%arg0: memref<128x384xf32, #tpu.memory_space<vmem>>, %arg1: memref<128x384xf32, #tpu.memory_space<vmem>>, %arg2: memref<128x128xf32, #tpu.memory_space<vmem>>, %arg3: memref<2x32x384xbf16, #tpu.memory_space<vmem>>, %arg4: memref<2x1x128xf32, #tpu.memory_space<vmem>>, %arg5: memref<256x3xf32, #tpu.memory_space<vmem>>, %arg6: memref<1x3xf32, #tpu.memory_space<vmem>>, %arg7: memref<8x3xf32, #tpu.memory_space<vmem>>) attributes {dimension_semantics = [], scalar_prefetch = 0 : i64, scratch_operands = 0 : i64, tpu.core_type = #tpu.core_type<tc>} {
    %c0 = arith.constant 0 : index
    %c0_0 = arith.constant 0 : index
    %c0_1 = arith.constant 0 : index
    %0 = vector.load %arg3[%c0, %c0_0, %c0_1] : memref<2x32x384xbf16, #tpu.memory_space<vmem>>, vector<1x32x384xbf16>
    %1 = vector.shape_cast %0 : vector<1x32x384xbf16> to vector<32x384xbf16>
    %c1 = arith.constant 1 : index
    %c0_2 = arith.constant 0 : index
    %c0_3 = arith.constant 0 : index
    %2 = vector.load %arg3[%c1, %c0_2, %c0_3] : memref<2x32x384xbf16, #tpu.memory_space<vmem>>, vector<1x32x384xbf16>
    %3 = vector.shape_cast %2 : vector<1x32x384xbf16> to vector<32x384xbf16>
    %c0_4 = arith.constant 0 : index
    %c0_5 = arith.constant 0 : index
    %c0_6 = arith.constant 0 : index
    %4 = vector.load %arg4[%c0_4, %c0_5, %c0_6] : memref<2x1x128xf32, #tpu.memory_space<vmem>>, vector<1x1x128xf32>
    %5 = vector.shape_cast %4 : vector<1x1x128xf32> to vector<1x128xf32>
    %6 = vector.shape_cast %5 : vector<1x128xf32> to vector<1x128xf32>
    %7 = vector.broadcast %6 : vector<1x128xf32> to vector<16x128xf32>
    %c1_7 = arith.constant 1 : index
    %c0_8 = arith.constant 0 : index
    %c0_9 = arith.constant 0 : index
    %8 = vector.load %arg4[%c1_7, %c0_8, %c0_9] : memref<2x1x128xf32, #tpu.memory_space<vmem>>, vector<1x1x128xf32>
    %9 = vector.shape_cast %8 : vector<1x1x128xf32> to vector<1x128xf32>
    %10 = vector.shape_cast %9 : vector<1x128xf32> to vector<1x128xf32>
    %11 = vector.broadcast %10 : vector<1x128xf32> to vector<16x128xf32>
    %cst = arith.constant 0.000000e+00 : f32
    %12 = vector.broadcast %cst : f32 to vector<16x128xf32>
    %cst_10 = arith.constant 0.000000e+00 : f32
    %13 = vector.broadcast %cst_10 : f32 to vector<16x128xf32>
    %c0_11 = arith.constant 0 : index
    %c0_12 = arith.constant 0 : index
    %14 = vector.load %arg0[%c0_11, %c0_12] : memref<128x384xf32, #tpu.memory_space<vmem>>, vector<16x384xf32>
    %15 = vector.extract_strided_slice %12 {offsets = [0, 0], sizes = [16, 32], strides = [1, 1]} : vector<16x128xf32> to vector<16x32xf32>
    %16 = arith.truncf %15 : vector<16x32xf32> to vector<16x32xbf16>
    %cst_13 = arith.constant dense<0.000000e+00> : vector<16x384xf32>
    %17 = tpu.matmul %16, %1, %cst_13 {dimension_numbers = #tpu.dot_dimension_numbers<[1], [0], [0], [1], [0, 0, 1, 1], [], []>} : vector<16x32xbf16>, vector<32x384xbf16>, vector<16x384xf32> -> vector<16x384xf32>
    %18 = vector.extract_strided_slice %14 {offsets = [0, 0], sizes = [16, 128], strides = [1, 1]} : vector<16x384xf32> to vector<16x128xf32>
    %19 = vector.extract_strided_slice %17 {offsets = [0, 0], sizes = [16, 128], strides = [1, 1]} : vector<16x384xf32> to vector<16x128xf32>
    %20 = arith.addf %18, %19 : vector<16x128xf32>
    %21 = arith.negf %20 : vector<16x128xf32>
    %22 = math.exp %21 : vector<16x128xf32>
    %cst_14 = arith.constant 1.000000e+00 : f32
    %23 = vector.broadcast %cst_14 : f32 to vector<16x128xf32>
    %24 = arith.addf %23, %22 : vector<16x128xf32>
    %25 = arith.divf %23, %24 : vector<16x128xf32>
    %26 = vector.extract_strided_slice %14 {offsets = [0, 128], sizes = [16, 128], strides = [1, 1]} : vector<16x384xf32> to vector<16x128xf32>
    %27 = vector.extract_strided_slice %17 {offsets = [0, 128], sizes = [16, 128], strides = [1, 1]} : vector<16x384xf32> to vector<16x128xf32>
    %28 = arith.addf %26, %27 : vector<16x128xf32>
    %29 = arith.negf %28 : vector<16x128xf32>
    %30 = math.exp %29 : vector<16x128xf32>
    %cst_15 = arith.constant 1.000000e+00 : f32
    %31 = vector.broadcast %cst_15 : f32 to vector<16x128xf32>
    %32 = arith.addf %31, %30 : vector<16x128xf32>
    %33 = arith.divf %31, %32 : vector<16x128xf32>
    %34 = vector.extract_strided_slice %14 {offsets = [0, 256], sizes = [16, 128], strides = [1, 1]} : vector<16x384xf32> to vector<16x128xf32>
    %35 = vector.extract_strided_slice %17 {offsets = [0, 256], sizes = [16, 128], strides = [1, 1]} : vector<16x384xf32> to vector<16x128xf32>
    %36 = arith.addf %35, %7 : vector<16x128xf32>
    %37 = arith.mulf %25, %36 : vector<16x128xf32>
    %38 = arith.addf %34, %37 : vector<16x128xf32>
    %39 = math.tanh %38 : vector<16x128xf32>
    %cst_16 = arith.constant 1.000000e+00 : f32
    %40 = vector.broadcast %cst_16 : f32 to vector<16x128xf32>
    %41 = arith.subf %40, %33 : vector<16x128xf32>
    %42 = arith.mulf %41, %39 : vector<16x128xf32>
    %43 = arith.mulf %33, %12 : vector<16x128xf32>
    %44 = arith.addf %42, %43 : vector<16x128xf32>
    %c112 = arith.constant 112 : index
    %c0_17 = arith.constant 0 : index
    %45 = vector.load %arg1[%c112, %c0_17] : memref<128x384xf32, #tpu.memory_space<vmem>>, vector<16x384xf32>
    %46 = vector.extract_strided_slice %13 {offsets = [0, 0], sizes = [16, 32], strides = [1, 1]} : vector<16x128xf32> to vector<16x32xf32>
    %47 = arith.truncf %46 : vector<16x32xf32> to vector<16x32xbf16>
    %cst_18 = arith.constant dense<0.000000e+00> : vector<16x384xf32>
    %48 = tpu.matmul %47, %3, %cst_18 {dimension_numbers = #tpu.dot_dimension_numbers<[1], [0], [0], [1], [0, 0, 1, 1], [], []>} : vector<16x32xbf16>, vector<32x384xbf16>, vector<16x384xf32> -> vector<16x384xf32>
    %49 = vector.extract_strided_slice %45 {offsets = [0, 0], sizes = [16, 128], strides = [1, 1]} : vector<16x384xf32> to vector<16x128xf32>
    %50 = vector.extract_strided_slice %48 {offsets = [0, 0], sizes = [16, 128], strides = [1, 1]} : vector<16x384xf32> to vector<16x128xf32>
    %51 = arith.addf %49, %50 : vector<16x128xf32>
    %52 = arith.negf %51 : vector<16x128xf32>
    %53 = math.exp %52 : vector<16x128xf32>
    %cst_19 = arith.constant 1.000000e+00 : f32
    %54 = vector.broadcast %cst_19 : f32 to vector<16x128xf32>
    %55 = arith.addf %54, %53 : vector<16x128xf32>
    %56 = arith.divf %54, %55 : vector<16x128xf32>
    %57 = vector.extract_strided_slice %45 {offsets = [0, 128], sizes = [16, 128], strides = [1, 1]} : vector<16x384xf32> to vector<16x128xf32>
    %58 = vector.extract_strided_slice %48 {offsets = [0, 128], sizes = [16, 128], strides = [1, 1]} : vector<16x384xf32> to vector<16x128xf32>
    %59 = arith.addf %57, %58 : vector<16x128xf32>
    %60 = arith.negf %59 : vector<16x128xf32>
    %61 = math.exp %60 : vector<16x128xf32>
    %cst_20 = arith.constant 1.000000e+00 : f32
    %62 = vector.broadcast %cst_20 : f32 to vector<16x128xf32>
    %63 = arith.addf %62, %61 : vector<16x128xf32>
    %64 = arith.divf %62, %63 : vector<16x128xf32>
    %65 = vector.extract_strided_slice %45 {offsets = [0, 256], sizes = [16, 128], strides = [1, 1]} : vector<16x384xf32> to vector<16x128xf32>
    %66 = vector.extract_strided_slice %48 {offsets = [0, 256], sizes = [16, 128], strides = [1, 1]} : vector<16x384xf32> to vector<16x128xf32>
    %67 = arith.addf %66, %11 : vector<16x128xf32>
    %68 = arith.mulf %56, %67 : vector<16x128xf32>
    %69 = arith.addf %65, %68 : vector<16x128xf32>
    %70 = math.tanh %69 : vector<16x128xf32>
    %cst_21 = arith.constant 1.000000e+00 : f32
    %71 = vector.broadcast %cst_21 : f32 to vector<16x128xf32>
    %72 = arith.subf %71, %64 : vector<16x128xf32>
    %73 = arith.mulf %72, %70 : vector<16x128xf32>
    %74 = arith.mulf %64, %13 : vector<16x128xf32>
    %75 = arith.addf %73, %74 : vector<16x128xf32>
    %c0_22 = arith.constant 0 : index
    %c0_23 = arith.constant 0 : index
    %76 = vector.load %arg2[%c0_22, %c0_23] : memref<128x128xf32, #tpu.memory_space<vmem>>, vector<16x128xf32>
    %c112_24 = arith.constant 112 : index
    %c0_25 = arith.constant 0 : index
    %77 = vector.load %arg2[%c112_24, %c0_25] : memref<128x128xf32, #tpu.memory_space<vmem>>, vector<16x128xf32>
    %78 = arith.mulf %76, %44 : vector<16x128xf32>
    %cst_26 = arith.constant dense<0.000000e+00> : vector<128xf32>
    %79 = vector.multi_reduction <add>, %78, %cst_26 [0] : vector<16x128xf32> to vector<128xf32>
    %80 = vector.shape_cast %79 : vector<128xf32> to vector<1x128xf32>
    %81 = arith.mulf %77, %75 : vector<16x128xf32>
    %cst_27 = arith.constant dense<0.000000e+00> : vector<128xf32>
    %82 = vector.multi_reduction <add>, %81, %cst_27 [0] : vector<16x128xf32> to vector<128xf32>
    %83 = vector.shape_cast %82 : vector<128xf32> to vector<1x128xf32>
    %c16 = arith.constant 16 : index
    %c0_28 = arith.constant 0 : index
    %84 = vector.load %arg0[%c16, %c0_28] : memref<128x384xf32, #tpu.memory_space<vmem>>, vector<16x384xf32>
    %85 = vector.extract_strided_slice %44 {offsets = [0, 0], sizes = [16, 32], strides = [1, 1]} : vector<16x128xf32> to vector<16x32xf32>
    %86 = arith.truncf %85 : vector<16x32xf32> to vector<16x32xbf16>
    %cst_29 = arith.constant dense<0.000000e+00> : vector<16x384xf32>
    %87 = tpu.matmul %86, %1, %cst_29 {dimension_numbers = #tpu.dot_dimension_numbers<[1], [0], [0], [1], [0, 0, 1, 1], [], []>} : vector<16x32xbf16>, vector<32x384xbf16>, vector<16x384xf32> -> vector<16x384xf32>
    %88 = vector.extract_strided_slice %84 {offsets = [0, 0], sizes = [16, 128], strides = [1, 1]} : vector<16x384xf32> to vector<16x128xf32>
    %89 = vector.extract_strided_slice %87 {offsets = [0, 0], sizes = [16, 128], strides = [1, 1]} : vector<16x384xf32> to vector<16x128xf32>
    %90 = arith.addf %88, %89 : vector<16x128xf32>
    %91 = arith.negf %90 : vector<16x128xf32>
    %92 = math.exp %91 : vector<16x128xf32>
    %cst_30 = arith.constant 1.000000e+00 : f32
    %93 = vector.broadcast %cst_30 : f32 to vector<16x128xf32>
    %94 = arith.addf %93, %92 : vector<16x128xf32>
    %95 = arith.divf %93, %94 : vector<16x128xf32>
    %96 = vector.extract_strided_slice %84 {offsets = [0, 128], sizes = [16, 128], strides = [1, 1]} : vector<16x384xf32> to vector<16x128xf32>
    %97 = vector.extract_strided_slice %87 {offsets = [0, 128], sizes = [16, 128], strides = [1, 1]} : vector<16x384xf32> to vector<16x128xf32>
    %98 = arith.addf %96, %97 : vector<16x128xf32>
    %99 = arith.negf %98 : vector<16x128xf32>
    %100 = math.exp %99 : vector<16x128xf32>
    %cst_31 = arith.constant 1.000000e+00 : f32
    %101 = vector.broadcast %cst_31 : f32 to vector<16x128xf32>
    %102 = arith.addf %101, %100 : vector<16x128xf32>
    %103 = arith.divf %101, %102 : vector<16x128xf32>
    %104 = vector.extract_strided_slice %84 {offsets = [0, 256], sizes = [16, 128], strides = [1, 1]} : vector<16x384xf32> to vector<16x128xf32>
    %105 = vector.extract_strided_slice %87 {offsets = [0, 256], sizes = [16, 128], strides = [1, 1]} : vector<16x384xf32> to vector<16x128xf32>
    %106 = arith.addf %105, %7 : vector<16x128xf32>
    %107 = arith.mulf %95, %106 : vector<16x128xf32>
    %108 = arith.addf %104, %107 : vector<16x128xf32>
    %109 = math.tanh %108 : vector<16x128xf32>
    %cst_32 = arith.constant 1.000000e+00 : f32
    %110 = vector.broadcast %cst_32 : f32 to vector<16x128xf32>
    %111 = arith.subf %110, %103 : vector<16x128xf32>
    %112 = arith.mulf %111, %109 : vector<16x128xf32>
    %113 = arith.mulf %103, %44 : vector<16x128xf32>
    %114 = arith.addf %112, %113 : vector<16x128xf32>
    %c96 = arith.constant 96 : index
    %c0_33 = arith.constant 0 : index
    %115 = vector.load %arg1[%c96, %c0_33] : memref<128x384xf32, #tpu.memory_space<vmem>>, vector<16x384xf32>
    %116 = vector.extract_strided_slice %75 {offsets = [0, 0], sizes = [16, 32], strides = [1, 1]} : vector<16x128xf32> to vector<16x32xf32>
    %117 = arith.truncf %116 : vector<16x32xf32> to vector<16x32xbf16>
    %cst_34 = arith.constant dense<0.000000e+00> : vector<16x384xf32>
    %118 = tpu.matmul %117, %3, %cst_34 {dimension_numbers = #tpu.dot_dimension_numbers<[1], [0], [0], [1], [0, 0, 1, 1], [], []>} : vector<16x32xbf16>, vector<32x384xbf16>, vector<16x384xf32> -> vector<16x384xf32>
    %119 = vector.extract_strided_slice %115 {offsets = [0, 0], sizes = [16, 128], strides = [1, 1]} : vector<16x384xf32> to vector<16x128xf32>
    %120 = vector.extract_strided_slice %118 {offsets = [0, 0], sizes = [16, 128], strides = [1, 1]} : vector<16x384xf32> to vector<16x128xf32>
    %121 = arith.addf %119, %120 : vector<16x128xf32>
    %122 = arith.negf %121 : vector<16x128xf32>
    %123 = math.exp %122 : vector<16x128xf32>
    %cst_35 = arith.constant 1.000000e+00 : f32
    %124 = vector.broadcast %cst_35 : f32 to vector<16x128xf32>
    %125 = arith.addf %124, %123 : vector<16x128xf32>
    %126 = arith.divf %124, %125 : vector<16x128xf32>
    %127 = vector.extract_strided_slice %115 {offsets = [0, 128], sizes = [16, 128], strides = [1, 1]} : vector<16x384xf32> to vector<16x128xf32>
    %128 = vector.extract_strided_slice %118 {offsets = [0, 128], sizes = [16, 128], strides = [1, 1]} : vector<16x384xf32> to vector<16x128xf32>
    %129 = arith.addf %127, %128 : vector<16x128xf32>
    %130 = arith.negf %129 : vector<16x128xf32>
    %131 = math.exp %130 : vector<16x128xf32>
    %cst_36 = arith.constant 1.000000e+00 : f32
    %132 = vector.broadcast %cst_36 : f32 to vector<16x128xf32>
    %133 = arith.addf %132, %131 : vector<16x128xf32>
    %134 = arith.divf %132, %133 : vector<16x128xf32>
    %135 = vector.extract_strided_slice %115 {offsets = [0, 256], sizes = [16, 128], strides = [1, 1]} : vector<16x384xf32> to vector<16x128xf32>
    %136 = vector.extract_strided_slice %118 {offsets = [0, 256], sizes = [16, 128], strides = [1, 1]} : vector<16x384xf32> to vector<16x128xf32>
    %137 = arith.addf %136, %11 : vector<16x128xf32>
    %138 = arith.mulf %126, %137 : vector<16x128xf32>
    %139 = arith.addf %135, %138 : vector<16x128xf32>
    %140 = math.tanh %139 : vector<16x128xf32>
    %cst_37 = arith.constant 1.000000e+00 : f32
    %141 = vector.broadcast %cst_37 : f32 to vector<16x128xf32>
    %142 = arith.subf %141, %134 : vector<16x128xf32>
    %143 = arith.mulf %142, %140 : vector<16x128xf32>
    %144 = arith.mulf %134, %75 : vector<16x128xf32>
    %145 = arith.addf %143, %144 : vector<16x128xf32>
    %c16_38 = arith.constant 16 : index
    %c0_39 = arith.constant 0 : index
    %146 = vector.load %arg2[%c16_38, %c0_39] : memref<128x128xf32, #tpu.memory_space<vmem>>, vector<16x128xf32>
    %c96_40 = arith.constant 96 : index
    %c0_41 = arith.constant 0 : index
    %147 = vector.load %arg2[%c96_40, %c0_41] : memref<128x128xf32, #tpu.memory_space<vmem>>, vector<16x128xf32>
    %148 = arith.mulf %146, %114 : vector<16x128xf32>
    %cst_42 = arith.constant dense<0.000000e+00> : vector<128xf32>
    %149 = vector.multi_reduction <add>, %148, %cst_42 [0] : vector<16x128xf32> to vector<128xf32>
    %150 = vector.shape_cast %149 : vector<128xf32> to vector<1x128xf32>
    %151 = arith.mulf %147, %145 : vector<16x128xf32>
    %cst_43 = arith.constant dense<0.000000e+00> : vector<128xf32>
    %152 = vector.multi_reduction <add>, %151, %cst_43 [0] : vector<16x128xf32> to vector<128xf32>
    %153 = vector.shape_cast %152 : vector<128xf32> to vector<1x128xf32>
    %c32 = arith.constant 32 : index
    %c0_44 = arith.constant 0 : index
    %154 = vector.load %arg0[%c32, %c0_44] : memref<128x384xf32, #tpu.memory_space<vmem>>, vector<16x384xf32>
    %155 = vector.extract_strided_slice %114 {offsets = [0, 0], sizes = [16, 32], strides = [1, 1]} : vector<16x128xf32> to vector<16x32xf32>
    %156 = arith.truncf %155 : vector<16x32xf32> to vector<16x32xbf16>
    %cst_45 = arith.constant dense<0.000000e+00> : vector<16x384xf32>
    %157 = tpu.matmul %156, %1, %cst_45 {dimension_numbers = #tpu.dot_dimension_numbers<[1], [0], [0], [1], [0, 0, 1, 1], [], []>} : vector<16x32xbf16>, vector<32x384xbf16>, vector<16x384xf32> -> vector<16x384xf32>
    %158 = vector.extract_strided_slice %154 {offsets = [0, 0], sizes = [16, 128], strides = [1, 1]} : vector<16x384xf32> to vector<16x128xf32>
    %159 = vector.extract_strided_slice %157 {offsets = [0, 0], sizes = [16, 128], strides = [1, 1]} : vector<16x384xf32> to vector<16x128xf32>
    %160 = arith.addf %158, %159 : vector<16x128xf32>
    %161 = arith.negf %160 : vector<16x128xf32>
    %162 = math.exp %161 : vector<16x128xf32>
    %cst_46 = arith.constant 1.000000e+00 : f32
    %163 = vector.broadcast %cst_46 : f32 to vector<16x128xf32>
    %164 = arith.addf %163, %162 : vector<16x128xf32>
    %165 = arith.divf %163, %164 : vector<16x128xf32>
    %166 = vector.extract_strided_slice %154 {offsets = [0, 128], sizes = [16, 128], strides = [1, 1]} : vector<16x384xf32> to vector<16x128xf32>
    %167 = vector.extract_strided_slice %157 {offsets = [0, 128], sizes = [16, 128], strides = [1, 1]} : vector<16x384xf32> to vector<16x128xf32>
    %168 = arith.addf %166, %167 : vector<16x128xf32>
    %169 = arith.negf %168 : vector<16x128xf32>
    %170 = math.exp %169 : vector<16x128xf32>
    %cst_47 = arith.constant 1.000000e+00 : f32
    %171 = vector.broadcast %cst_47 : f32 to vector<16x128xf32>
    %172 = arith.addf %171, %170 : vector<16x128xf32>
    %173 = arith.divf %171, %172 : vector<16x128xf32>
    %174 = vector.extract_strided_slice %154 {offsets = [0, 256], sizes = [16, 128], strides = [1, 1]} : vector<16x384xf32> to vector<16x128xf32>
    %175 = vector.extract_strided_slice %157 {offsets = [0, 256], sizes = [16, 128], strides = [1, 1]} : vector<16x384xf32> to vector<16x128xf32>
    %176 = arith.addf %175, %7 : vector<16x128xf32>
    %177 = arith.mulf %165, %176 : vector<16x128xf32>
    %178 = arith.addf %174, %177 : vector<16x128xf32>
    %179 = math.tanh %178 : vector<16x128xf32>
    %cst_48 = arith.constant 1.000000e+00 : f32
    %180 = vector.broadcast %cst_48 : f32 to vector<16x128xf32>
    %181 = arith.subf %180, %173 : vector<16x128xf32>
    %182 = arith.mulf %181, %179 : vector<16x128xf32>
    %183 = arith.mulf %173, %114 : vector<16x128xf32>
    %184 = arith.addf %182, %183 : vector<16x128xf32>
    %c80 = arith.constant 80 : index
    %c0_49 = arith.constant 0 : index
    %185 = vector.load %arg1[%c80, %c0_49] : memref<128x384xf32, #tpu.memory_space<vmem>>, vector<16x384xf32>
    %186 = vector.extract_strided_slice %145 {offsets = [0, 0], sizes = [16, 32], strides = [1, 1]} : vector<16x128xf32> to vector<16x32xf32>
    %187 = arith.truncf %186 : vector<16x32xf32> to vector<16x32xbf16>
    %cst_50 = arith.constant dense<0.000000e+00> : vector<16x384xf32>
    %188 = tpu.matmul %187, %3, %cst_50 {dimension_numbers = #tpu.dot_dimension_numbers<[1], [0], [0], [1], [0, 0, 1, 1], [], []>} : vector<16x32xbf16>, vector<32x384xbf16>, vector<16x384xf32> -> vector<16x384xf32>
    %189 = vector.extract_strided_slice %185 {offsets = [0, 0], sizes = [16, 128], strides = [1, 1]} : vector<16x384xf32> to vector<16x128xf32>
    %190 = vector.extract_strided_slice %188 {offsets = [0, 0], sizes = [16, 128], strides = [1, 1]} : vector<16x384xf32> to vector<16x128xf32>
    %191 = arith.addf %189, %190 : vector<16x128xf32>
    %192 = arith.negf %191 : vector<16x128xf32>
    %193 = math.exp %192 : vector<16x128xf32>
    %cst_51 = arith.constant 1.000000e+00 : f32
    %194 = vector.broadcast %cst_51 : f32 to vector<16x128xf32>
    %195 = arith.addf %194, %193 : vector<16x128xf32>
    %196 = arith.divf %194, %195 : vector<16x128xf32>
    %197 = vector.extract_strided_slice %185 {offsets = [0, 128], sizes = [16, 128], strides = [1, 1]} : vector<16x384xf32> to vector<16x128xf32>
    %198 = vector.extract_strided_slice %188 {offsets = [0, 128], sizes = [16, 128], strides = [1, 1]} : vector<16x384xf32> to vector<16x128xf32>
    %199 = arith.addf %197, %198 : vector<16x128xf32>
    %200 = arith.negf %199 : vector<16x128xf32>
    %201 = math.exp %200 : vector<16x128xf32>
    %cst_52 = arith.constant 1.000000e+00 : f32
    %202 = vector.broadcast %cst_52 : f32 to vector<16x128xf32>
    %203 = arith.addf %202, %201 : vector<16x128xf32>
    %204 = arith.divf %202, %203 : vector<16x128xf32>
    %205 = vector.extract_strided_slice %185 {offsets = [0, 256], sizes = [16, 128], strides = [1, 1]} : vector<16x384xf32> to vector<16x128xf32>
    %206 = vector.extract_strided_slice %188 {offsets = [0, 256], sizes = [16, 128], strides = [1, 1]} : vector<16x384xf32> to vector<16x128xf32>
    %207 = arith.addf %206, %11 : vector<16x128xf32>
    %208 = arith.mulf %196, %207 : vector<16x128xf32>
    %209 = arith.addf %205, %208 : vector<16x128xf32>
    %210 = math.tanh %209 : vector<16x128xf32>
    %cst_53 = arith.constant 1.000000e+00 : f32
    %211 = vector.broadcast %cst_53 : f32 to vector<16x128xf32>
    %212 = arith.subf %211, %204 : vector<16x128xf32>
    %213 = arith.mulf %212, %210 : vector<16x128xf32>
    %214 = arith.mulf %204, %145 : vector<16x128xf32>
    %215 = arith.addf %213, %214 : vector<16x128xf32>
    %c32_54 = arith.constant 32 : index
    %c0_55 = arith.constant 0 : index
    %216 = vector.load %arg2[%c32_54, %c0_55] : memref<128x128xf32, #tpu.memory_space<vmem>>, vector<16x128xf32>
    %c80_56 = arith.constant 80 : index
    %c0_57 = arith.constant 0 : index
    %217 = vector.load %arg2[%c80_56, %c0_57] : memref<128x128xf32, #tpu.memory_space<vmem>>, vector<16x128xf32>
    %218 = arith.mulf %216, %184 : vector<16x128xf32>
    %cst_58 = arith.constant dense<0.000000e+00> : vector<128xf32>
    %219 = vector.multi_reduction <add>, %218, %cst_58 [0] : vector<16x128xf32> to vector<128xf32>
    %220 = vector.shape_cast %219 : vector<128xf32> to vector<1x128xf32>
    %221 = arith.mulf %217, %215 : vector<16x128xf32>
    %cst_59 = arith.constant dense<0.000000e+00> : vector<128xf32>
    %222 = vector.multi_reduction <add>, %221, %cst_59 [0] : vector<16x128xf32> to vector<128xf32>
    %223 = vector.shape_cast %222 : vector<128xf32> to vector<1x128xf32>
    %c48 = arith.constant 48 : index
    %c0_60 = arith.constant 0 : index
    %224 = vector.load %arg0[%c48, %c0_60] : memref<128x384xf32, #tpu.memory_space<vmem>>, vector<16x384xf32>
    %225 = vector.extract_strided_slice %184 {offsets = [0, 0], sizes = [16, 32], strides = [1, 1]} : vector<16x128xf32> to vector<16x32xf32>
    %226 = arith.truncf %225 : vector<16x32xf32> to vector<16x32xbf16>
    %cst_61 = arith.constant dense<0.000000e+00> : vector<16x384xf32>
    %227 = tpu.matmul %226, %1, %cst_61 {dimension_numbers = #tpu.dot_dimension_numbers<[1], [0], [0], [1], [0, 0, 1, 1], [], []>} : vector<16x32xbf16>, vector<32x384xbf16>, vector<16x384xf32> -> vector<16x384xf32>
    %228 = vector.extract_strided_slice %224 {offsets = [0, 0], sizes = [16, 128], strides = [1, 1]} : vector<16x384xf32> to vector<16x128xf32>
    %229 = vector.extract_strided_slice %227 {offsets = [0, 0], sizes = [16, 128], strides = [1, 1]} : vector<16x384xf32> to vector<16x128xf32>
    %230 = arith.addf %228, %229 : vector<16x128xf32>
    %231 = arith.negf %230 : vector<16x128xf32>
    %232 = math.exp %231 : vector<16x128xf32>
    %cst_62 = arith.constant 1.000000e+00 : f32
    %233 = vector.broadcast %cst_62 : f32 to vector<16x128xf32>
    %234 = arith.addf %233, %232 : vector<16x128xf32>
    %235 = arith.divf %233, %234 : vector<16x128xf32>
    %236 = vector.extract_strided_slice %224 {offsets = [0, 128], sizes = [16, 128], strides = [1, 1]} : vector<16x384xf32> to vector<16x128xf32>
    %237 = vector.extract_strided_slice %227 {offsets = [0, 128], sizes = [16, 128], strides = [1, 1]} : vector<16x384xf32> to vector<16x128xf32>
    %238 = arith.addf %236, %237 : vector<16x128xf32>
    %239 = arith.negf %238 : vector<16x128xf32>
    %240 = math.exp %239 : vector<16x128xf32>
    %cst_63 = arith.constant 1.000000e+00 : f32
    %241 = vector.broadcast %cst_63 : f32 to vector<16x128xf32>
    %242 = arith.addf %241, %240 : vector<16x128xf32>
    %243 = arith.divf %241, %242 : vector<16x128xf32>
    %244 = vector.extract_strided_slice %224 {offsets = [0, 256], sizes = [16, 128], strides = [1, 1]} : vector<16x384xf32> to vector<16x128xf32>
    %245 = vector.extract_strided_slice %227 {offsets = [0, 256], sizes = [16, 128], strides = [1, 1]} : vector<16x384xf32> to vector<16x128xf32>
    %246 = arith.addf %245, %7 : vector<16x128xf32>
    %247 = arith.mulf %235, %246 : vector<16x128xf32>
    %248 = arith.addf %244, %247 : vector<16x128xf32>
    %249 = math.tanh %248 : vector<16x128xf32>
    %cst_64 = arith.constant 1.000000e+00 : f32
    %250 = vector.broadcast %cst_64 : f32 to vector<16x128xf32>
    %251 = arith.subf %250, %243 : vector<16x128xf32>
    %252 = arith.mulf %251, %249 : vector<16x128xf32>
    %253 = arith.mulf %243, %184 : vector<16x128xf32>
    %254 = arith.addf %252, %253 : vector<16x128xf32>
    %c64 = arith.constant 64 : index
    %c0_65 = arith.constant 0 : index
    %255 = vector.load %arg1[%c64, %c0_65] : memref<128x384xf32, #tpu.memory_space<vmem>>, vector<16x384xf32>
    %256 = vector.extract_strided_slice %215 {offsets = [0, 0], sizes = [16, 32], strides = [1, 1]} : vector<16x128xf32> to vector<16x32xf32>
    %257 = arith.truncf %256 : vector<16x32xf32> to vector<16x32xbf16>
    %cst_66 = arith.constant dense<0.000000e+00> : vector<16x384xf32>
    %258 = tpu.matmul %257, %3, %cst_66 {dimension_numbers = #tpu.dot_dimension_numbers<[1], [0], [0], [1], [0, 0, 1, 1], [], []>} : vector<16x32xbf16>, vector<32x384xbf16>, vector<16x384xf32> -> vector<16x384xf32>
    %259 = vector.extract_strided_slice %255 {offsets = [0, 0], sizes = [16, 128], strides = [1, 1]} : vector<16x384xf32> to vector<16x128xf32>
    %260 = vector.extract_strided_slice %258 {offsets = [0, 0], sizes = [16, 128], strides = [1, 1]} : vector<16x384xf32> to vector<16x128xf32>
    %261 = arith.addf %259, %260 : vector<16x128xf32>
    %262 = arith.negf %261 : vector<16x128xf32>
    %263 = math.exp %262 : vector<16x128xf32>
    %cst_67 = arith.constant 1.000000e+00 : f32
    %264 = vector.broadcast %cst_67 : f32 to vector<16x128xf32>
    %265 = arith.addf %264, %263 : vector<16x128xf32>
    %266 = arith.divf %264, %265 : vector<16x128xf32>
    %267 = vector.extract_strided_slice %255 {offsets = [0, 128], sizes = [16, 128], strides = [1, 1]} : vector<16x384xf32> to vector<16x128xf32>
    %268 = vector.extract_strided_slice %258 {offsets = [0, 128], sizes = [16, 128], strides = [1, 1]} : vector<16x384xf32> to vector<16x128xf32>
    %269 = arith.addf %267, %268 : vector<16x128xf32>
    %270 = arith.negf %269 : vector<16x128xf32>
    %271 = math.exp %270 : vector<16x128xf32>
    %cst_68 = arith.constant 1.000000e+00 : f32
    %272 = vector.broadcast %cst_68 : f32 to vector<16x128xf32>
    %273 = arith.addf %272, %271 : vector<16x128xf32>
    %274 = arith.divf %272, %273 : vector<16x128xf32>
    %275 = vector.extract_strided_slice %255 {offsets = [0, 256], sizes = [16, 128], strides = [1, 1]} : vector<16x384xf32> to vector<16x128xf32>
    %276 = vector.extract_strided_slice %258 {offsets = [0, 256], sizes = [16, 128], strides = [1, 1]} : vector<16x384xf32> to vector<16x128xf32>
    %277 = arith.addf %276, %11 : vector<16x128xf32>
    %278 = arith.mulf %266, %277 : vector<16x128xf32>
    %279 = arith.addf %275, %278 : vector<16x128xf32>
    %280 = math.tanh %279 : vector<16x128xf32>
    %cst_69 = arith.constant 1.000000e+00 : f32
    %281 = vector.broadcast %cst_69 : f32 to vector<16x128xf32>
    %282 = arith.subf %281, %274 : vector<16x128xf32>
    %283 = arith.mulf %282, %280 : vector<16x128xf32>
    %284 = arith.mulf %274, %215 : vector<16x128xf32>
    %285 = arith.addf %283, %284 : vector<16x128xf32>
    %c48_70 = arith.constant 48 : index
    %c0_71 = arith.constant 0 : index
    %286 = vector.load %arg2[%c48_70, %c0_71] : memref<128x128xf32, #tpu.memory_space<vmem>>, vector<16x128xf32>
    %c64_72 = arith.constant 64 : index
    %c0_73 = arith.constant 0 : index
    %287 = vector.load %arg2[%c64_72, %c0_73] : memref<128x128xf32, #tpu.memory_space<vmem>>, vector<16x128xf32>
    %288 = arith.mulf %286, %254 : vector<16x128xf32>
    %cst_74 = arith.constant dense<0.000000e+00> : vector<128xf32>
    %289 = vector.multi_reduction <add>, %288, %cst_74 [0] : vector<16x128xf32> to vector<128xf32>
    %290 = vector.shape_cast %289 : vector<128xf32> to vector<1x128xf32>
    %291 = arith.mulf %287, %285 : vector<16x128xf32>
    %cst_75 = arith.constant dense<0.000000e+00> : vector<128xf32>
    %292 = vector.multi_reduction <add>, %291, %cst_75 [0] : vector<16x128xf32> to vector<128xf32>
    %293 = vector.shape_cast %292 : vector<128xf32> to vector<1x128xf32>
    %c64_76 = arith.constant 64 : index
    %c0_77 = arith.constant 0 : index
    %294 = vector.load %arg0[%c64_76, %c0_77] : memref<128x384xf32, #tpu.memory_space<vmem>>, vector<16x384xf32>
    %295 = vector.extract_strided_slice %254 {offsets = [0, 0], sizes = [16, 32], strides = [1, 1]} : vector<16x128xf32> to vector<16x32xf32>
    %296 = arith.truncf %295 : vector<16x32xf32> to vector<16x32xbf16>
    %cst_78 = arith.constant dense<0.000000e+00> : vector<16x384xf32>
    %297 = tpu.matmul %296, %1, %cst_78 {dimension_numbers = #tpu.dot_dimension_numbers<[1], [0], [0], [1], [0, 0, 1, 1], [], []>} : vector<16x32xbf16>, vector<32x384xbf16>, vector<16x384xf32> -> vector<16x384xf32>
    %298 = vector.extract_strided_slice %294 {offsets = [0, 0], sizes = [16, 128], strides = [1, 1]} : vector<16x384xf32> to vector<16x128xf32>
    %299 = vector.extract_strided_slice %297 {offsets = [0, 0], sizes = [16, 128], strides = [1, 1]} : vector<16x384xf32> to vector<16x128xf32>
    %300 = arith.addf %298, %299 : vector<16x128xf32>
    %301 = arith.negf %300 : vector<16x128xf32>
    %302 = math.exp %301 : vector<16x128xf32>
    %cst_79 = arith.constant 1.000000e+00 : f32
    %303 = vector.broadcast %cst_79 : f32 to vector<16x128xf32>
    %304 = arith.addf %303, %302 : vector<16x128xf32>
    %305 = arith.divf %303, %304 : vector<16x128xf32>
    %306 = vector.extract_strided_slice %294 {offsets = [0, 128], sizes = [16, 128], strides = [1, 1]} : vector<16x384xf32> to vector<16x128xf32>
    %307 = vector.extract_strided_slice %297 {offsets = [0, 128], sizes = [16, 128], strides = [1, 1]} : vector<16x384xf32> to vector<16x128xf32>
    %308 = arith.addf %306, %307 : vector<16x128xf32>
    %309 = arith.negf %308 : vector<16x128xf32>
    %310 = math.exp %309 : vector<16x128xf32>
    %cst_80 = arith.constant 1.000000e+00 : f32
    %311 = vector.broadcast %cst_80 : f32 to vector<16x128xf32>
    %312 = arith.addf %311, %310 : vector<16x128xf32>
    %313 = arith.divf %311, %312 : vector<16x128xf32>
    %314 = vector.extract_strided_slice %294 {offsets = [0, 256], sizes = [16, 128], strides = [1, 1]} : vector<16x384xf32> to vector<16x128xf32>
    %315 = vector.extract_strided_slice %297 {offsets = [0, 256], sizes = [16, 128], strides = [1, 1]} : vector<16x384xf32> to vector<16x128xf32>
    %316 = arith.addf %315, %7 : vector<16x128xf32>
    %317 = arith.mulf %305, %316 : vector<16x128xf32>
    %318 = arith.addf %314, %317 : vector<16x128xf32>
    %319 = math.tanh %318 : vector<16x128xf32>
    %cst_81 = arith.constant 1.000000e+00 : f32
    %320 = vector.broadcast %cst_81 : f32 to vector<16x128xf32>
    %321 = arith.subf %320, %313 : vector<16x128xf32>
    %322 = arith.mulf %321, %319 : vector<16x128xf32>
    %323 = arith.mulf %313, %254 : vector<16x128xf32>
    %324 = arith.addf %322, %323 : vector<16x128xf32>
    %c48_82 = arith.constant 48 : index
    %c0_83 = arith.constant 0 : index
    %325 = vector.load %arg1[%c48_82, %c0_83] : memref<128x384xf32, #tpu.memory_space<vmem>>, vector<16x384xf32>
    %326 = vector.extract_strided_slice %285 {offsets = [0, 0], sizes = [16, 32], strides = [1, 1]} : vector<16x128xf32> to vector<16x32xf32>
    %327 = arith.truncf %326 : vector<16x32xf32> to vector<16x32xbf16>
    %cst_84 = arith.constant dense<0.000000e+00> : vector<16x384xf32>
    %328 = tpu.matmul %327, %3, %cst_84 {dimension_numbers = #tpu.dot_dimension_numbers<[1], [0], [0], [1], [0, 0, 1, 1], [], []>} : vector<16x32xbf16>, vector<32x384xbf16>, vector<16x384xf32> -> vector<16x384xf32>
    %329 = vector.extract_strided_slice %325 {offsets = [0, 0], sizes = [16, 128], strides = [1, 1]} : vector<16x384xf32> to vector<16x128xf32>
    %330 = vector.extract_strided_slice %328 {offsets = [0, 0], sizes = [16, 128], strides = [1, 1]} : vector<16x384xf32> to vector<16x128xf32>
    %331 = arith.addf %329, %330 : vector<16x128xf32>
    %332 = arith.negf %331 : vector<16x128xf32>
    %333 = math.exp %332 : vector<16x128xf32>
    %cst_85 = arith.constant 1.000000e+00 : f32
    %334 = vector.broadcast %cst_85 : f32 to vector<16x128xf32>
    %335 = arith.addf %334, %333 : vector<16x128xf32>
    %336 = arith.divf %334, %335 : vector<16x128xf32>
    %337 = vector.extract_strided_slice %325 {offsets = [0, 128], sizes = [16, 128], strides = [1, 1]} : vector<16x384xf32> to vector<16x128xf32>
    %338 = vector.extract_strided_slice %328 {offsets = [0, 128], sizes = [16, 128], strides = [1, 1]} : vector<16x384xf32> to vector<16x128xf32>
    %339 = arith.addf %337, %338 : vector<16x128xf32>
    %340 = arith.negf %339 : vector<16x128xf32>
    %341 = math.exp %340 : vector<16x128xf32>
    %cst_86 = arith.constant 1.000000e+00 : f32
    %342 = vector.broadcast %cst_86 : f32 to vector<16x128xf32>
    %343 = arith.addf %342, %341 : vector<16x128xf32>
    %344 = arith.divf %342, %343 : vector<16x128xf32>
    %345 = vector.extract_strided_slice %325 {offsets = [0, 256], sizes = [16, 128], strides = [1, 1]} : vector<16x384xf32> to vector<16x128xf32>
    %346 = vector.extract_strided_slice %328 {offsets = [0, 256], sizes = [16, 128], strides = [1, 1]} : vector<16x384xf32> to vector<16x128xf32>
    %347 = arith.addf %346, %11 : vector<16x128xf32>
    %348 = arith.mulf %336, %347 : vector<16x128xf32>
    %349 = arith.addf %345, %348 : vector<16x128xf32>
    %350 = math.tanh %349 : vector<16x128xf32>
    %cst_87 = arith.constant 1.000000e+00 : f32
    %351 = vector.broadcast %cst_87 : f32 to vector<16x128xf32>
    %352 = arith.subf %351, %344 : vector<16x128xf32>
    %353 = arith.mulf %352, %350 : vector<16x128xf32>
    %354 = arith.mulf %344, %285 : vector<16x128xf32>
    %355 = arith.addf %353, %354 : vector<16x128xf32>
    %c64_88 = arith.constant 64 : index
    %c0_89 = arith.constant 0 : index
    %356 = vector.load %arg2[%c64_88, %c0_89] : memref<128x128xf32, #tpu.memory_space<vmem>>, vector<16x128xf32>
    %c48_90 = arith.constant 48 : index
    %c0_91 = arith.constant 0 : index
    %357 = vector.load %arg2[%c48_90, %c0_91] : memref<128x128xf32, #tpu.memory_space<vmem>>, vector<16x128xf32>
    %358 = arith.mulf %356, %324 : vector<16x128xf32>
    %cst_92 = arith.constant dense<0.000000e+00> : vector<128xf32>
    %359 = vector.multi_reduction <add>, %358, %cst_92 [0] : vector<16x128xf32> to vector<128xf32>
    %360 = vector.shape_cast %359 : vector<128xf32> to vector<1x128xf32>
    %361 = arith.mulf %357, %355 : vector<16x128xf32>
    %cst_93 = arith.constant dense<0.000000e+00> : vector<128xf32>
    %362 = vector.multi_reduction <add>, %361, %cst_93 [0] : vector<16x128xf32> to vector<128xf32>
    %363 = vector.shape_cast %362 : vector<128xf32> to vector<1x128xf32>
    %c80_94 = arith.constant 80 : index
    %c0_95 = arith.constant 0 : index
    %364 = vector.load %arg0[%c80_94, %c0_95] : memref<128x384xf32, #tpu.memory_space<vmem>>, vector<16x384xf32>
    %365 = vector.extract_strided_slice %324 {offsets = [0, 0], sizes = [16, 32], strides = [1, 1]} : vector<16x128xf32> to vector<16x32xf32>
    %366 = arith.truncf %365 : vector<16x32xf32> to vector<16x32xbf16>
    %cst_96 = arith.constant dense<0.000000e+00> : vector<16x384xf32>
    %367 = tpu.matmul %366, %1, %cst_96 {dimension_numbers = #tpu.dot_dimension_numbers<[1], [0], [0], [1], [0, 0, 1, 1], [], []>} : vector<16x32xbf16>, vector<32x384xbf16>, vector<16x384xf32> -> vector<16x384xf32>
    %368 = vector.extract_strided_slice %364 {offsets = [0, 0], sizes = [16, 128], strides = [1, 1]} : vector<16x384xf32> to vector<16x128xf32>
    %369 = vector.extract_strided_slice %367 {offsets = [0, 0], sizes = [16, 128], strides = [1, 1]} : vector<16x384xf32> to vector<16x128xf32>
    %370 = arith.addf %368, %369 : vector<16x128xf32>
    %371 = arith.negf %370 : vector<16x128xf32>
    %372 = math.exp %371 : vector<16x128xf32>
    %cst_97 = arith.constant 1.000000e+00 : f32
    %373 = vector.broadcast %cst_97 : f32 to vector<16x128xf32>
    %374 = arith.addf %373, %372 : vector<16x128xf32>
    %375 = arith.divf %373, %374 : vector<16x128xf32>
    %376 = vector.extract_strided_slice %364 {offsets = [0, 128], sizes = [16, 128], strides = [1, 1]} : vector<16x384xf32> to vector<16x128xf32>
    %377 = vector.extract_strided_slice %367 {offsets = [0, 128], sizes = [16, 128], strides = [1, 1]} : vector<16x384xf32> to vector<16x128xf32>
    %378 = arith.addf %376, %377 : vector<16x128xf32>
    %379 = arith.negf %378 : vector<16x128xf32>
    %380 = math.exp %379 : vector<16x128xf32>
    %cst_98 = arith.constant 1.000000e+00 : f32
    %381 = vector.broadcast %cst_98 : f32 to vector<16x128xf32>
    %382 = arith.addf %381, %380 : vector<16x128xf32>
    %383 = arith.divf %381, %382 : vector<16x128xf32>
    %384 = vector.extract_strided_slice %364 {offsets = [0, 256], sizes = [16, 128], strides = [1, 1]} : vector<16x384xf32> to vector<16x128xf32>
    %385 = vector.extract_strided_slice %367 {offsets = [0, 256], sizes = [16, 128], strides = [1, 1]} : vector<16x384xf32> to vector<16x128xf32>
    %386 = arith.addf %385, %7 : vector<16x128xf32>
    %387 = arith.mulf %375, %386 : vector<16x128xf32>
    %388 = arith.addf %384, %387 : vector<16x128xf32>
    %389 = math.tanh %388 : vector<16x128xf32>
    %cst_99 = arith.constant 1.000000e+00 : f32
    %390 = vector.broadcast %cst_99 : f32 to vector<16x128xf32>
    %391 = arith.subf %390, %383 : vector<16x128xf32>
    %392 = arith.mulf %391, %389 : vector<16x128xf32>
    %393 = arith.mulf %383, %324 : vector<16x128xf32>
    %394 = arith.addf %392, %393 : vector<16x128xf32>
    %c32_100 = arith.constant 32 : index
    %c0_101 = arith.constant 0 : index
    %395 = vector.load %arg1[%c32_100, %c0_101] : memref<128x384xf32, #tpu.memory_space<vmem>>, vector<16x384xf32>
    %396 = vector.extract_strided_slice %355 {offsets = [0, 0], sizes = [16, 32], strides = [1, 1]} : vector<16x128xf32> to vector<16x32xf32>
    %397 = arith.truncf %396 : vector<16x32xf32> to vector<16x32xbf16>
    %cst_102 = arith.constant dense<0.000000e+00> : vector<16x384xf32>
    %398 = tpu.matmul %397, %3, %cst_102 {dimension_numbers = #tpu.dot_dimension_numbers<[1], [0], [0], [1], [0, 0, 1, 1], [], []>} : vector<16x32xbf16>, vector<32x384xbf16>, vector<16x384xf32> -> vector<16x384xf32>
    %399 = vector.extract_strided_slice %395 {offsets = [0, 0], sizes = [16, 128], strides = [1, 1]} : vector<16x384xf32> to vector<16x128xf32>
    %400 = vector.extract_strided_slice %398 {offsets = [0, 0], sizes = [16, 128], strides = [1, 1]} : vector<16x384xf32> to vector<16x128xf32>
    %401 = arith.addf %399, %400 : vector<16x128xf32>
    %402 = arith.negf %401 : vector<16x128xf32>
    %403 = math.exp %402 : vector<16x128xf32>
    %cst_103 = arith.constant 1.000000e+00 : f32
    %404 = vector.broadcast %cst_103 : f32 to vector<16x128xf32>
    %405 = arith.addf %404, %403 : vector<16x128xf32>
    %406 = arith.divf %404, %405 : vector<16x128xf32>
    %407 = vector.extract_strided_slice %395 {offsets = [0, 128], sizes = [16, 128], strides = [1, 1]} : vector<16x384xf32> to vector<16x128xf32>
    %408 = vector.extract_strided_slice %398 {offsets = [0, 128], sizes = [16, 128], strides = [1, 1]} : vector<16x384xf32> to vector<16x128xf32>
    %409 = arith.addf %407, %408 : vector<16x128xf32>
    %410 = arith.negf %409 : vector<16x128xf32>
    %411 = math.exp %410 : vector<16x128xf32>
    %cst_104 = arith.constant 1.000000e+00 : f32
    %412 = vector.broadcast %cst_104 : f32 to vector<16x128xf32>
    %413 = arith.addf %412, %411 : vector<16x128xf32>
    %414 = arith.divf %412, %413 : vector<16x128xf32>
    %415 = vector.extract_strided_slice %395 {offsets = [0, 256], sizes = [16, 128], strides = [1, 1]} : vector<16x384xf32> to vector<16x128xf32>
    %416 = vector.extract_strided_slice %398 {offsets = [0, 256], sizes = [16, 128], strides = [1, 1]} : vector<16x384xf32> to vector<16x128xf32>
    %417 = arith.addf %416, %11 : vector<16x128xf32>
    %418 = arith.mulf %406, %417 : vector<16x128xf32>
    %419 = arith.addf %415, %418 : vector<16x128xf32>
    %420 = math.tanh %419 : vector<16x128xf32>
    %cst_105 = arith.constant 1.000000e+00 : f32
    %421 = vector.broadcast %cst_105 : f32 to vector<16x128xf32>
    %422 = arith.subf %421, %414 : vector<16x128xf32>
    %423 = arith.mulf %422, %420 : vector<16x128xf32>
    %424 = arith.mulf %414, %355 : vector<16x128xf32>
    %425 = arith.addf %423, %424 : vector<16x128xf32>
    %c80_106 = arith.constant 80 : index
    %c0_107 = arith.constant 0 : index
    %426 = vector.load %arg2[%c80_106, %c0_107] : memref<128x128xf32, #tpu.memory_space<vmem>>, vector<16x128xf32>
    %c32_108 = arith.constant 32 : index
    %c0_109 = arith.constant 0 : index
    %427 = vector.load %arg2[%c32_108, %c0_109] : memref<128x128xf32, #tpu.memory_space<vmem>>, vector<16x128xf32>
    %428 = arith.mulf %426, %394 : vector<16x128xf32>
    %cst_110 = arith.constant dense<0.000000e+00> : vector<128xf32>
    %429 = vector.multi_reduction <add>, %428, %cst_110 [0] : vector<16x128xf32> to vector<128xf32>
    %430 = vector.shape_cast %429 : vector<128xf32> to vector<1x128xf32>
    %431 = arith.mulf %427, %425 : vector<16x128xf32>
    %cst_111 = arith.constant dense<0.000000e+00> : vector<128xf32>
    %432 = vector.multi_reduction <add>, %431, %cst_111 [0] : vector<16x128xf32> to vector<128xf32>
    %433 = vector.shape_cast %432 : vector<128xf32> to vector<1x128xf32>
    %c96_112 = arith.constant 96 : index
    %c0_113 = arith.constant 0 : index
    %434 = vector.load %arg0[%c96_112, %c0_113] : memref<128x384xf32, #tpu.memory_space<vmem>>, vector<16x384xf32>
    %435 = vector.extract_strided_slice %394 {offsets = [0, 0], sizes = [16, 32], strides = [1, 1]} : vector<16x128xf32> to vector<16x32xf32>
    %436 = arith.truncf %435 : vector<16x32xf32> to vector<16x32xbf16>
    %cst_114 = arith.constant dense<0.000000e+00> : vector<16x384xf32>
    %437 = tpu.matmul %436, %1, %cst_114 {dimension_numbers = #tpu.dot_dimension_numbers<[1], [0], [0], [1], [0, 0, 1, 1], [], []>} : vector<16x32xbf16>, vector<32x384xbf16>, vector<16x384xf32> -> vector<16x384xf32>
    %438 = vector.extract_strided_slice %434 {offsets = [0, 0], sizes = [16, 128], strides = [1, 1]} : vector<16x384xf32> to vector<16x128xf32>
    %439 = vector.extract_strided_slice %437 {offsets = [0, 0], sizes = [16, 128], strides = [1, 1]} : vector<16x384xf32> to vector<16x128xf32>
    %440 = arith.addf %438, %439 : vector<16x128xf32>
    %441 = arith.negf %440 : vector<16x128xf32>
    %442 = math.exp %441 : vector<16x128xf32>
    %cst_115 = arith.constant 1.000000e+00 : f32
    %443 = vector.broadcast %cst_115 : f32 to vector<16x128xf32>
    %444 = arith.addf %443, %442 : vector<16x128xf32>
    %445 = arith.divf %443, %444 : vector<16x128xf32>
    %446 = vector.extract_strided_slice %434 {offsets = [0, 128], sizes = [16, 128], strides = [1, 1]} : vector<16x384xf32> to vector<16x128xf32>
    %447 = vector.extract_strided_slice %437 {offsets = [0, 128], sizes = [16, 128], strides = [1, 1]} : vector<16x384xf32> to vector<16x128xf32>
    %448 = arith.addf %446, %447 : vector<16x128xf32>
    %449 = arith.negf %448 : vector<16x128xf32>
    %450 = math.exp %449 : vector<16x128xf32>
    %cst_116 = arith.constant 1.000000e+00 : f32
    %451 = vector.broadcast %cst_116 : f32 to vector<16x128xf32>
    %452 = arith.addf %451, %450 : vector<16x128xf32>
    %453 = arith.divf %451, %452 : vector<16x128xf32>
    %454 = vector.extract_strided_slice %434 {offsets = [0, 256], sizes = [16, 128], strides = [1, 1]} : vector<16x384xf32> to vector<16x128xf32>
    %455 = vector.extract_strided_slice %437 {offsets = [0, 256], sizes = [16, 128], strides = [1, 1]} : vector<16x384xf32> to vector<16x128xf32>
    %456 = arith.addf %455, %7 : vector<16x128xf32>
    %457 = arith.mulf %445, %456 : vector<16x128xf32>
    %458 = arith.addf %454, %457 : vector<16x128xf32>
    %459 = math.tanh %458 : vector<16x128xf32>
    %cst_117 = arith.constant 1.000000e+00 : f32
    %460 = vector.broadcast %cst_117 : f32 to vector<16x128xf32>
    %461 = arith.subf %460, %453 : vector<16x128xf32>
    %462 = arith.mulf %461, %459 : vector<16x128xf32>
    %463 = arith.mulf %453, %394 : vector<16x128xf32>
    %464 = arith.addf %462, %463 : vector<16x128xf32>
    %c16_118 = arith.constant 16 : index
    %c0_119 = arith.constant 0 : index
    %465 = vector.load %arg1[%c16_118, %c0_119] : memref<128x384xf32, #tpu.memory_space<vmem>>, vector<16x384xf32>
    %466 = vector.extract_strided_slice %425 {offsets = [0, 0], sizes = [16, 32], strides = [1, 1]} : vector<16x128xf32> to vector<16x32xf32>
    %467 = arith.truncf %466 : vector<16x32xf32> to vector<16x32xbf16>
    %cst_120 = arith.constant dense<0.000000e+00> : vector<16x384xf32>
    %468 = tpu.matmul %467, %3, %cst_120 {dimension_numbers = #tpu.dot_dimension_numbers<[1], [0], [0], [1], [0, 0, 1, 1], [], []>} : vector<16x32xbf16>, vector<32x384xbf16>, vector<16x384xf32> -> vector<16x384xf32>
    %469 = vector.extract_strided_slice %465 {offsets = [0, 0], sizes = [16, 128], strides = [1, 1]} : vector<16x384xf32> to vector<16x128xf32>
    %470 = vector.extract_strided_slice %468 {offsets = [0, 0], sizes = [16, 128], strides = [1, 1]} : vector<16x384xf32> to vector<16x128xf32>
    %471 = arith.addf %469, %470 : vector<16x128xf32>
    %472 = arith.negf %471 : vector<16x128xf32>
    %473 = math.exp %472 : vector<16x128xf32>
    %cst_121 = arith.constant 1.000000e+00 : f32
    %474 = vector.broadcast %cst_121 : f32 to vector<16x128xf32>
    %475 = arith.addf %474, %473 : vector<16x128xf32>
    %476 = arith.divf %474, %475 : vector<16x128xf32>
    %477 = vector.extract_strided_slice %465 {offsets = [0, 128], sizes = [16, 128], strides = [1, 1]} : vector<16x384xf32> to vector<16x128xf32>
    %478 = vector.extract_strided_slice %468 {offsets = [0, 128], sizes = [16, 128], strides = [1, 1]} : vector<16x384xf32> to vector<16x128xf32>
    %479 = arith.addf %477, %478 : vector<16x128xf32>
    %480 = arith.negf %479 : vector<16x128xf32>
    %481 = math.exp %480 : vector<16x128xf32>
    %cst_122 = arith.constant 1.000000e+00 : f32
    %482 = vector.broadcast %cst_122 : f32 to vector<16x128xf32>
    %483 = arith.addf %482, %481 : vector<16x128xf32>
    %484 = arith.divf %482, %483 : vector<16x128xf32>
    %485 = vector.extract_strided_slice %465 {offsets = [0, 256], sizes = [16, 128], strides = [1, 1]} : vector<16x384xf32> to vector<16x128xf32>
    %486 = vector.extract_strided_slice %468 {offsets = [0, 256], sizes = [16, 128], strides = [1, 1]} : vector<16x384xf32> to vector<16x128xf32>
    %487 = arith.addf %486, %11 : vector<16x128xf32>
    %488 = arith.mulf %476, %487 : vector<16x128xf32>
    %489 = arith.addf %485, %488 : vector<16x128xf32>
    %490 = math.tanh %489 : vector<16x128xf32>
    %cst_123 = arith.constant 1.000000e+00 : f32
    %491 = vector.broadcast %cst_123 : f32 to vector<16x128xf32>
    %492 = arith.subf %491, %484 : vector<16x128xf32>
    %493 = arith.mulf %492, %490 : vector<16x128xf32>
    %494 = arith.mulf %484, %425 : vector<16x128xf32>
    %495 = arith.addf %493, %494 : vector<16x128xf32>
    %c96_124 = arith.constant 96 : index
    %c0_125 = arith.constant 0 : index
    %496 = vector.load %arg2[%c96_124, %c0_125] : memref<128x128xf32, #tpu.memory_space<vmem>>, vector<16x128xf32>
    %c16_126 = arith.constant 16 : index
    %c0_127 = arith.constant 0 : index
    %497 = vector.load %arg2[%c16_126, %c0_127] : memref<128x128xf32, #tpu.memory_space<vmem>>, vector<16x128xf32>
    %498 = arith.mulf %496, %464 : vector<16x128xf32>
    %cst_128 = arith.constant dense<0.000000e+00> : vector<128xf32>
    %499 = vector.multi_reduction <add>, %498, %cst_128 [0] : vector<16x128xf32> to vector<128xf32>
    %500 = vector.shape_cast %499 : vector<128xf32> to vector<1x128xf32>
    %501 = arith.mulf %497, %495 : vector<16x128xf32>
    %cst_129 = arith.constant dense<0.000000e+00> : vector<128xf32>
    %502 = vector.multi_reduction <add>, %501, %cst_129 [0] : vector<16x128xf32> to vector<128xf32>
    %503 = vector.shape_cast %502 : vector<128xf32> to vector<1x128xf32>
    %c112_130 = arith.constant 112 : index
    %c0_131 = arith.constant 0 : index
    %504 = vector.load %arg0[%c112_130, %c0_131] : memref<128x384xf32, #tpu.memory_space<vmem>>, vector<16x384xf32>
    %505 = vector.extract_strided_slice %464 {offsets = [0, 0], sizes = [16, 32], strides = [1, 1]} : vector<16x128xf32> to vector<16x32xf32>
    %506 = arith.truncf %505 : vector<16x32xf32> to vector<16x32xbf16>
    %cst_132 = arith.constant dense<0.000000e+00> : vector<16x384xf32>
    %507 = tpu.matmul %506, %1, %cst_132 {dimension_numbers = #tpu.dot_dimension_numbers<[1], [0], [0], [1], [0, 0, 1, 1], [], []>} : vector<16x32xbf16>, vector<32x384xbf16>, vector<16x384xf32> -> vector<16x384xf32>
    %508 = vector.extract_strided_slice %504 {offsets = [0, 0], sizes = [16, 128], strides = [1, 1]} : vector<16x384xf32> to vector<16x128xf32>
    %509 = vector.extract_strided_slice %507 {offsets = [0, 0], sizes = [16, 128], strides = [1, 1]} : vector<16x384xf32> to vector<16x128xf32>
    %510 = arith.addf %508, %509 : vector<16x128xf32>
    %511 = arith.negf %510 : vector<16x128xf32>
    %512 = math.exp %511 : vector<16x128xf32>
    %cst_133 = arith.constant 1.000000e+00 : f32
    %513 = vector.broadcast %cst_133 : f32 to vector<16x128xf32>
    %514 = arith.addf %513, %512 : vector<16x128xf32>
    %515 = arith.divf %513, %514 : vector<16x128xf32>
    %516 = vector.extract_strided_slice %504 {offsets = [0, 128], sizes = [16, 128], strides = [1, 1]} : vector<16x384xf32> to vector<16x128xf32>
    %517 = vector.extract_strided_slice %507 {offsets = [0, 128], sizes = [16, 128], strides = [1, 1]} : vector<16x384xf32> to vector<16x128xf32>
    %518 = arith.addf %516, %517 : vector<16x128xf32>
    %519 = arith.negf %518 : vector<16x128xf32>
    %520 = math.exp %519 : vector<16x128xf32>
    %cst_134 = arith.constant 1.000000e+00 : f32
    %521 = vector.broadcast %cst_134 : f32 to vector<16x128xf32>
    %522 = arith.addf %521, %520 : vector<16x128xf32>
    %523 = arith.divf %521, %522 : vector<16x128xf32>
    %524 = vector.extract_strided_slice %504 {offsets = [0, 256], sizes = [16, 128], strides = [1, 1]} : vector<16x384xf32> to vector<16x128xf32>
    %525 = vector.extract_strided_slice %507 {offsets = [0, 256], sizes = [16, 128], strides = [1, 1]} : vector<16x384xf32> to vector<16x128xf32>
    %526 = arith.addf %525, %7 : vector<16x128xf32>
    %527 = arith.mulf %515, %526 : vector<16x128xf32>
    %528 = arith.addf %524, %527 : vector<16x128xf32>
    %529 = math.tanh %528 : vector<16x128xf32>
    %cst_135 = arith.constant 1.000000e+00 : f32
    %530 = vector.broadcast %cst_135 : f32 to vector<16x128xf32>
    %531 = arith.subf %530, %523 : vector<16x128xf32>
    %532 = arith.mulf %531, %529 : vector<16x128xf32>
    %533 = arith.mulf %523, %464 : vector<16x128xf32>
    %534 = arith.addf %532, %533 : vector<16x128xf32>
    %c0_136 = arith.constant 0 : index
    %c0_137 = arith.constant 0 : index
    %535 = vector.load %arg1[%c0_136, %c0_137] : memref<128x384xf32, #tpu.memory_space<vmem>>, vector<16x384xf32>
    %536 = vector.extract_strided_slice %495 {offsets = [0, 0], sizes = [16, 32], strides = [1, 1]} : vector<16x128xf32> to vector<16x32xf32>
    %537 = arith.truncf %536 : vector<16x32xf32> to vector<16x32xbf16>
    %cst_138 = arith.constant dense<0.000000e+00> : vector<16x384xf32>
    %538 = tpu.matmul %537, %3, %cst_138 {dimension_numbers = #tpu.dot_dimension_numbers<[1], [0], [0], [1], [0, 0, 1, 1], [], []>} : vector<16x32xbf16>, vector<32x384xbf16>, vector<16x384xf32> -> vector<16x384xf32>
    %539 = vector.extract_strided_slice %535 {offsets = [0, 0], sizes = [16, 128], strides = [1, 1]} : vector<16x384xf32> to vector<16x128xf32>
    %540 = vector.extract_strided_slice %538 {offsets = [0, 0], sizes = [16, 128], strides = [1, 1]} : vector<16x384xf32> to vector<16x128xf32>
    %541 = arith.addf %539, %540 : vector<16x128xf32>
    %542 = arith.negf %541 : vector<16x128xf32>
    %543 = math.exp %542 : vector<16x128xf32>
    %cst_139 = arith.constant 1.000000e+00 : f32
    %544 = vector.broadcast %cst_139 : f32 to vector<16x128xf32>
    %545 = arith.addf %544, %543 : vector<16x128xf32>
    %546 = arith.divf %544, %545 : vector<16x128xf32>
    %547 = vector.extract_strided_slice %535 {offsets = [0, 128], sizes = [16, 128], strides = [1, 1]} : vector<16x384xf32> to vector<16x128xf32>
    %548 = vector.extract_strided_slice %538 {offsets = [0, 128], sizes = [16, 128], strides = [1, 1]} : vector<16x384xf32> to vector<16x128xf32>
    %549 = arith.addf %547, %548 : vector<16x128xf32>
    %550 = arith.negf %549 : vector<16x128xf32>
    %551 = math.exp %550 : vector<16x128xf32>
    %cst_140 = arith.constant 1.000000e+00 : f32
    %552 = vector.broadcast %cst_140 : f32 to vector<16x128xf32>
    %553 = arith.addf %552, %551 : vector<16x128xf32>
    %554 = arith.divf %552, %553 : vector<16x128xf32>
    %555 = vector.extract_strided_slice %535 {offsets = [0, 256], sizes = [16, 128], strides = [1, 1]} : vector<16x384xf32> to vector<16x128xf32>
    %556 = vector.extract_strided_slice %538 {offsets = [0, 256], sizes = [16, 128], strides = [1, 1]} : vector<16x384xf32> to vector<16x128xf32>
    %557 = arith.addf %556, %11 : vector<16x128xf32>
    %558 = arith.mulf %546, %557 : vector<16x128xf32>
    %559 = arith.addf %555, %558 : vector<16x128xf32>
    %560 = math.tanh %559 : vector<16x128xf32>
    %cst_141 = arith.constant 1.000000e+00 : f32
    %561 = vector.broadcast %cst_141 : f32 to vector<16x128xf32>
    %562 = arith.subf %561, %554 : vector<16x128xf32>
    %563 = arith.mulf %562, %560 : vector<16x128xf32>
    %564 = arith.mulf %554, %495 : vector<16x128xf32>
    %565 = arith.addf %563, %564 : vector<16x128xf32>
    %c112_142 = arith.constant 112 : index
    %c0_143 = arith.constant 0 : index
    %566 = vector.load %arg2[%c112_142, %c0_143] : memref<128x128xf32, #tpu.memory_space<vmem>>, vector<16x128xf32>
    %c0_144 = arith.constant 0 : index
    %c0_145 = arith.constant 0 : index
    %567 = vector.load %arg2[%c0_144, %c0_145] : memref<128x128xf32, #tpu.memory_space<vmem>>, vector<16x128xf32>
    %568 = arith.mulf %566, %534 : vector<16x128xf32>
    %cst_146 = arith.constant dense<0.000000e+00> : vector<128xf32>
    %569 = vector.multi_reduction <add>, %568, %cst_146 [0] : vector<16x128xf32> to vector<128xf32>
    %570 = vector.shape_cast %569 : vector<128xf32> to vector<1x128xf32>
    %571 = arith.mulf %567, %565 : vector<16x128xf32>
    %cst_147 = arith.constant dense<0.000000e+00> : vector<128xf32>
    %572 = vector.multi_reduction <add>, %571, %cst_147 [0] : vector<16x128xf32> to vector<128xf32>
    %573 = vector.shape_cast %572 : vector<128xf32> to vector<1x128xf32>
    %574 = tpu.concatenate %80, %150, %220, %290, %360, %430, %500, %570 in 0 : vector<1x128xf32>, vector<1x128xf32>, vector<1x128xf32>, vector<1x128xf32>, vector<1x128xf32>, vector<1x128xf32>, vector<1x128xf32>, vector<1x128xf32> -> vector<8x128xf32>
    %575 = tpu.concatenate %573, %503, %433, %363, %293, %223, %153, %83 in 0 : vector<1x128xf32>, vector<1x128xf32>, vector<1x128xf32>, vector<1x128xf32>, vector<1x128xf32>, vector<1x128xf32>, vector<1x128xf32>, vector<1x128xf32> -> vector<8x128xf32>
    %576 = tpu.concatenate %574, %575 in 1 : vector<8x128xf32>, vector<8x128xf32> -> vector<8x256xf32>
    %c0_148 = arith.constant 0 : index
    %c0_149 = arith.constant 0 : index
    %577 = vector.load %arg5[%c0_148, %c0_149] : memref<256x3xf32, #tpu.memory_space<vmem>>, vector<256x3xf32>
    %cst_150 = arith.constant dense<0.000000e+00> : vector<8x3xf32>
    %578 = tpu.matmul %576, %577, %cst_150 {dimension_numbers = #tpu.dot_dimension_numbers<[1], [0], [0], [1], [0, 0, 1, 1], [], []>} : vector<8x256xf32>, vector<256x3xf32>, vector<8x3xf32> -> vector<8x3xf32>
    %c0_151 = arith.constant 0 : index
    %c0_152 = arith.constant 0 : index
    %579 = vector.load %arg6[%c0_151, %c0_152] : memref<1x3xf32, #tpu.memory_space<vmem>>, vector<1x3xf32>
    %580 = vector.broadcast %579 : vector<1x3xf32> to vector<8x3xf32>
    %581 = arith.addf %578, %580 : vector<8x3xf32>
    %cst_153 = arith.constant dense<0xFF800000> : vector<8xf32>
    %582 = vector.multi_reduction <maximumf>, %581, %cst_153 [1] : vector<8x3xf32> to vector<8xf32>
    %583 = vector.shape_cast %582 : vector<8xf32> to vector<8x1xf32>
    %584 = vector.broadcast %583 : vector<8x1xf32> to vector<8x3xf32>
    %585 = arith.subf %581, %584 : vector<8x3xf32>
    %586 = math.exp %585 : vector<8x3xf32>
    %cst_154 = arith.constant dense<0.000000e+00> : vector<8xf32>
    %587 = vector.multi_reduction <add>, %586, %cst_154 [1] : vector<8x3xf32> to vector<8xf32>
    %588 = vector.shape_cast %587 : vector<8xf32> to vector<8x1xf32>
    %589 = vector.broadcast %588 : vector<8x1xf32> to vector<8x3xf32>
    %590 = arith.divf %586, %589 : vector<8x3xf32>
    %c0_155 = arith.constant 0 : index
    %c0_156 = arith.constant 0 : index
    %591 = vector.load %arg7[%c0_155, %c0_156] : memref<8x3xf32, #tpu.memory_space<vmem>>, vector<8x3xf32>
    tpu.vector_store %arg7[%c0_155, %c0_156], %590 {strides = array<i32>} : memref<8x3xf32, #tpu.memory_space<vmem>>, vector<8x3xf32>,
    return
  }
}

</mosaic_0001>

<bundles_post_ra>
// kernel: siamese_forward.1
= control target key start
LH: loop header
LB: loop body
LE: loop exit
PB: predicated region body
PF: predicated region fallthrough
CT: control target
= control target key end

     0   :  { %v3351_v1 = vmov 0   ;;  %v3352_v7 = vmov 0.0   ;;  %vm3353_vm0 = vmmov 0   ;;  %vm97_vm1 = vcmask 261120   ;;  %s4391_s3 = inlined_call_operand.vmem [shape: bf16[2,32,384], index: 3, kind: input, shape index: {}]   ;;  %s4392_s0 = inlined_call_operand.vmem [shape: f32[128,384], index: 0, kind: input, shape index: {}]   ;;  %s4393_s1 = inlined_call_operand.vmem [shape: f32[128,384], index: 1, kind: input, shape index: {}]   ;;  %s4394_s4 = inlined_call_operand.vmem [shape: f32[2,1,128], index: 4, kind: input, shape index: {}]   ;;  %s4395_s5 = inlined_call_operand.vmem [shape: f32[256,3], index: 5, kind: input, shape index: {}]   ;;  %s4396_s2 = inlined_call_operand.vmem [shape: f32[128,128], index: 2, kind: input, shape index: {}]   ;;  %s4397_s6 = inlined_call_operand.vmem [shape: f32[1,3], index: 6, kind: input, shape index: {}]   ;;  %s4398_s7 = inlined_call_operand.vmem [shape: f32[8,3], index: 7, kind: output, shape index: {}]  }
   0x1   :  { %v3397_v0 = vld [vmem:[%s4391_s3 + $0x4] ss:$12 sps:$4 sm:$0xff]   ;;  %133 = vmatprep.mubr.bf16.mxu1 %v3351_v1  ;;  %459 = vmatprep.mubr.bf16.mxu0 %v3351_v1  ;;  %v3404_v2 = vld [vmem:[%s4391_s3] ss:$12 sps:$4 sm:$0xff]   ;;  %v3410_v3 = vld [vmem:[%s4391_s3 + $0x1c] ss:$12 sps:$4 sm:$0xff]  }
   0x2   :  { %101 = vmatprep.subr.bf16.mxu1 %v3397_v0  ;;  %427 = vmatprep.subr.bf16.mxu0 %v3397_v0  ;;  %v3417_v4 = vld [vmem:[%s4391_s3 + $0x18] ss:$12 sps:$4 sm:$0xff]   ;;  %v3425_v5 = vld [vmem:[%s4391_s3 + $0x34] ss:$12 sps:$4 sm:$0xff]   ;;  %v3450_v9 = vld [vmem:[%s4391_s3 + $0x30] ss:$12 sps:$4 sm:$0xff]  }
   0x3   :  { %102 = vmatpush1.bf16.msra.mxu1 %v3404_v2  ;;  %428 = vmatpush1.bf16.msra.mxu0 %v3404_v2  ;;  %v3431_v6 = vld [vmem:[%s4391_s3 + $0x8] ss:$12 sps:$4 sm:$0xff]   ;;  %v3441_v8 = vld [vmem:[%s4391_s3 + $0x20] ss:$12 sps:$4 sm:$0xff]   ;;  %v3471_v12 = vld [vmem:[%s4391_s3 + $0x38] ss:$12 sps:$4 sm:$0xff]  }
   0x4   :  { %103 = vmatprep.subr.bf16.mxu1 %v3410_v3  ;;  %429 = vmatprep.subr.bf16.mxu0 %v3410_v3  ;;  %v3456_v10 = vld [vmem:[%s4391_s3 + $0x4c] ss:$12 sps:$4 sm:$0xff]   ;;  %v3463_v11 = vld [vmem:[%s4391_s3 + $0x48] ss:$12 sps:$4 sm:$0xff]   ;;  %v3479_v13 = vld [vmem:[%s4391_s3 + $0x50] ss:$12 sps:$4 sm:$0xff]  }
   0x5   :  { %v59_v14 = vld [vmem:[%s4392_s0] sm:$0xff]  ;;  %v62_v16 = vld [vmem:[%s4392_s0 + $0x18] sm:$0xff]  ;;  %v60_v18 = vld [vmem:[%s4392_s0 + $0x8] sm:$0xff]  ;;  %vm2487_vm2 = vcmask 1040384   ;;  %vm2489_vm3 = vcmask 1041408   ;;  %vm2491_vm4 = vcmask 1042432  }
   0x6   :  { %v63_v23 = vld [vmem:[%s4392_s0 + $0x20] sm:$0xff]  ;;  %v229_v34 = vld [vmem:[%s4393_s1 + $0x150] sm:$0xff]  ;;  %v232_v38 = vld [vmem:[%s4393_s1 + $0x168] sm:$0xff]  ;;  %vm2493_vm5 = vcmask 1043456   ;;  %vm2495_vm6 = vcmask 1044480   ;;  %vm2497_vm7 = vcmask 1045504  }
   0x7   :  { %104 = vmatpush1.bf16.msra.mxu1 %v3417_v4  ;;  %430 = vmatpush1.bf16.msra.mxu0 %v3417_v4  ;;  %v230_v45 = vld [vmem:[%s4393_s1 + $0x158] sm:$0xff]  ;;  %v233_v49 = vld [vmem:[%s4393_s1 + $0x170] sm:$0xff]  ;;  %v3520_v53 = vld [vmem:[%s4394_s4] ss:$0 sm:$0xff]  ;;  %vm2499_vm8 = vcmask 1046528   ;;  %vm2617_vm9 = vcmask 23552  }
   0x8   :  { %2833 = vmatprep.subr.bf16.mxu1 %v3352_v7  ;;  %565 = vmatprep.subr.bf16.mxu0 %v3425_v5 }
   0xa   :  { %134 = vmatmul.mubr.bf16.vlgmr.msra.gmra.mrb[0].mxu1 %v3351_v1 }
   0xb   :  { %2834 = vmatpush3.bf16.msra.mxu1 %v3431_v6  ;;  %2837 = vmatprep.mubr.msk.bf16.mxu1 %vm3353_vm0, %v3352_v7 }
   0xc   :  { %2835 = vmatprep.subr.bf16.mxu1 %v3352_v7 }
   0xf   :  { %2836 = vmatpush3.bf16.msra.mxu1 %v3441_v8 }
  0x10   :  { %267 = vmatprep.subr.bf16.mxu1 %v3425_v5 }
  0x12   :  { %2838 = vmatmul.mubr.bf16.vlgmr.msra.gmra.mrb[4].mxu1 %v3351_v1 }
  0x13   :  { %268 = vmatpush1.bf16.msra.mxu1 %v3450_v9  ;;  %299 = vmatprep.mubr.bf16.mxu1 %v3351_v1 }
  0x14   :  { %269 = vmatprep.subr.bf16.mxu1 %v3456_v10 }
  0x17   :  { %270 = vmatpush1.bf16.msra.mxu1 %v3463_v11 }
  0x18   :  { %2841 = vmatprep.subr.bf16.mxu1 %v3352_v7 }
  0x1a   :  { %300 = vmatmul.mubr.bf16.vlgmr.msra.gmra.mrb[8].mxu1 %v3351_v1 }
  0x1b   :  { %2842 = vmatpush3.bf16.msra.mxu1 %v3471_v12  ;;  %2845 = vmatprep.mubr.msk.bf16.mxu1 %vm3353_vm0, %v3352_v7 }
  0x1c   :  { %2843 = vmatprep.subr.bf16.mxu1 %v3352_v7 }
  0x1f   :  { %2844 = vmatpush3.bf16.msra.mxu1 %v3479_v13 }
  0x20   :  { %2849 = vmatprep.subr.bf16.mxu1 %v3352_v7 }
  0x22   :  { %2846 = vmatmul.mubr.bf16.vlgmr.msra.gmra.mrb[12].mxu1 %v3351_v1 }
  0x23   :  { %2850 = vmatpush3.bf16.msra.mxu1 %v3431_v6  ;;  %2853 = vmatprep.mubr.msk.bf16.mxu1 %vm3353_vm0, %v3352_v7 }
  0x24   :  { %2851 = vmatprep.subr.bf16.mxu1 %v3352_v7 }
  0x27   :  { %2852 = vmatpush3.bf16.msra.mxu1 %v3441_v8 }
  0x28   :  { %2857 = vmatprep.subr.bf16.mxu1 %v3352_v7 }
  0xdd   :  { %v135_v15 = vpop.f32.mrb[0].mxu1 }
  0xde   :  { %v185_v17 = vadd.f32 %v135_v15, %v59_v14  ;;  %v137_v19 = vpop.f32.mrb[1].mxu1  ;;  %v61_v14 = vld [vmem:[%s4392_s0 + $0x10] sm:$0xff] }
  0xdf   :  { %v139_v20 = vpop.f32.mrb[2].mxu1  ;;  %v199_v25 = vadd.f32 %v137_v19, %v60_v18  ;;  %v64_v19 = vld [vmem:[%s4392_s0 + $0x28] sm:$0xff] }
  0xe0   :  { %v2651_v21 = vmul.f32 -1.442695, %v185_v17  ;;  %v186_v22 = vadd.f32 %v139_v20, %v62_v16  ;;  %v141_v24 = vpop.f32.mrb[3].mxu1 }
  0xe1   :  { %v200_v27 = vadd.f32 %v141_v24, %v63_v23  ;;  %v2653_v28 = vmul.f32 -1.442695, %v199_v25 }
  0xe2   :  { %3012 = vpow2.f32 %v2651_v21  ;;  %v2652_v26 = vmul.f32 -1.442695, %v186_v22 }
  0xe3   :  { %v2654_v31 = vmul.f32 -1.442695, %v200_v27 }
  0xe4   :  { %3014 = vpow2.f32 %v2652_v26 }
  0xe5   :  { %v178_v29 = vpop.f32.mrb[4].mxu1  ;;  %3016 = vpow2.f32 %v2653_v28 }
  0xe6   :  { %v2839_v30 = vpop.f32.mrb[5].mxu1  ;;  %3018 = vpow2.f32 %v2654_v31  ;;  %v213_v61 = vadd.f32 %v3520_v53, %v178_v29  ;;  %v3533_v29 = vld [vmem:[%s4394_s4 + $0x1] ss:$0 sm:$0xff] }
  0xe7   :  { %v181_v32 = vpop.f32.mrb[6].mxu1 }
  0xe8   :  { %v2840_v33 = vpop.f32.mrb[7].mxu1  ;;  %v214_v17 = vadd.f32 %v3520_v53, %v181_v32 }
  0xec   :  { %v3013_v35 = vpop.eup %3012 }
  0xed   :  { %v193_v36 = vadd.f32 1.0, %v3013_v35  ;;  %v301_v37 = vpop.f32.mrb[8].mxu1 }
  0xee   :  { %v3015_v39 = vpop.eup %3014  ;;  %v351_v40 = vadd.f32 %v301_v37, %v229_v34  ;;  %v303_v41 = vpop.f32.mrb[9].mxu1 }
  0xef   :  { %3020 = vrcp.f32 %v193_v36  ;;  %v194_v42 = vadd.f32 1.0, %v3015_v39  ;;  %v305_v43 = vpop.f32.mrb[10].mxu1  ;;  %v3017_v50 = vpop.eup %3016  ;;  %v365_v51 = vadd.f32 %v303_v41, %v230_v45 }
  0xf0   :  { %v2661_v44 = vmul.f32 -1.442695, %v351_v40  ;;  %v352_v46 = vadd.f32 %v305_v43, %v232_v38  ;;  %v307_v47 = vpop.f32.mrb[11].mxu1  ;;  %v3019_v52 = vpop.eup %3018  ;;  %v207_v56 = vadd.f32 1.0, %v3017_v50 }
  0xf1   :  { %3022 = vrcp.f32 %v194_v42  ;;  %v366_v54 = vadd.f32 %v307_v47, %v233_v49  ;;  %v2663_v58 = vmul.f32 -1.442695, %v365_v51  ;;  %v208_v60 = vadd.f32 1.0, %v3019_v52  ;;  %v231_v42 = vld [vmem:[%s4393_s1 + $0x160] sm:$0xff]  ;;  %v234_v49 = vld [vmem:[%s4393_s1 + $0x178] sm:$0xff] }
  0xf2   :  { %v2662_v48 = vmul.f32 -1.442695, %v352_v46  ;;  %3024 = vpow2.f32 %v2661_v44 }
  0xf3   :  { %v2664_v15 = vmul.f32 -1.442695, %v366_v54 }
  0xf4   :  { %3026 = vpow2.f32 %v2662_v48 }
  0xf5   :  { %v344_v55 = vpop.f32.mrb[12].mxu1  ;;  %3028 = vrcp.f32 %v207_v56 }
  0xf6   :  { %v2847_v57 = vpop.f32.mrb[13].mxu1  ;;  %3030 = vpow2.f32 %v2663_v58  ;;  %v379_v35 = vadd.f32 %v3533_v29, %v344_v55 }
  0xf7   :  { %v347_v59 = vpop.f32.mrb[14].mxu1  ;;  %3032 = vrcp.f32 %v208_v60 }
  0xf8   :  { %v2848_v62 = vpop.f32.mrb[15].mxu1  ;;  %3034 = vpow2.f32 %v2664_v15  ;;  %v380_v47 = vadd.f32 %v3533_v29, %v347_v59 }
  0xf9   :  { %v3021_v63 = vpop.eup %3020 }
  0xfa   :  { %v215_v16 = vmul.f32 %v3021_v63, %v213_v61 }
  0xfb   :  { %v3023_v18 = vpop.eup %3022 }
  0xfc   :  { %v217_v20 = vadd.f32 %v215_v16, %v61_v14  ;;  %v216_v21 = vmul.f32 %v3023_v18, %v214_v17  ;;  %v3025_v22 = vpop.eup %3024 }
  0xfd   :  { %v359_v24 = vadd.f32 1.0, %v3025_v22  ;;  %v420_v22 = vld [vmem:[%s4392_s0 + $0x48] sm:$0xff] }
  0xfe   :  { %3036 = vtanh.f32 %v217_v20  ;;  %v218_v23 = vadd.f32 %v216_v21, %v64_v19  ;;  %v3027_v25 = vpop.eup %3026  ;;  %v417_v19 = vld [vmem:[%s4392_s0 + $0x30] sm:$0xff] }
  0xff   :  { %v360_v26 = vadd.f32 1.0, %v3027_v25  ;;  %v3029_v27 = vpop.eup %3028 }
 0x100   :  { %3038 = vtanh.f32 %v218_v23  ;;  %v3031_v28 = vpop.eup %3030  ;;  %v221_v32 = vsub.f32 1.0, %v3029_v27  ;;  %v225_v38 = vmul.f32 0.0, %v3029_v27 }
 0x101   :  { %3040 = vrcp.f32 %v359_v24  ;;  %v3033_v30 = vpop.eup %3032  ;;  %v373_v34 = vadd.f32 1.0, %v3031_v28  ;;  %v418_v24 = vld [vmem:[%s4392_s0 + $0x38] sm:$0xff] }
 0x102   :  { %3042 = vrcp.f32 %v360_v26  ;;  %v3035_v31 = vpop.eup %3034  ;;  %v222_v36 = vsub.f32 1.0, %v3033_v30  ;;  %v226_v44 = vmul.f32 0.0, %v3033_v30 }
 0x103   :  { %v374_v40 = vadd.f32 1.0, %v3035_v31  ;;  %3044 = vrcp.f32 %v373_v34 }
 0x105   :  { %3046 = vrcp.f32 %v374_v40 }
 0x108   :  { %v3037_v33 = vpop.eup %3036 }
 0x109   :  { %v223_v37 = vmul.f32 %v3037_v33, %v221_v32  ;;  %v421_v32 = vld [vmem:[%s4392_s0 + $0x50] sm:$0xff] }
 0x10a   :  { %v3039_v39 = vpop.eup %3038 }
 0x10b   :  { %v3041_v41 = vpop.eup %3040  ;;  %v224_v43 = vmul.f32 %v3039_v39, %v222_v36  ;;  %v3539_v45 = vadd.f32 %v225_v38, %v223_v37 }
 0x10c   :  { %v381_v46 = vmul.f32 %v3041_v41, %v379_v35  ;;  %v3043_v48 = vpop.eup %3042 }
 0x10d   :  { %v3545_v50 = vadd.f32 %v226_v44, %v224_v43  ;;  %v382_v52 = vmul.f32 %v3043_v48, %v380_v47  ;;  %v3045_v56 = vpop.eup %3044  ;;  %v558_v48 = vld [vmem:[%s4393_s1 + $0x138] sm:$0xff] }
 0x10e   :  { %v383_v51 = vadd.f32 %v381_v46, %v231_v42  ;;  %v387_v58 = vsub.f32 1.0, %v3045_v56  ;;  %v391_v60 = vmul.f32 0.0, %v3045_v56  ;;  %v555_v42 = vld [vmem:[%s4393_s1 + $0x120] sm:$0xff] }
 0x10f   :  { %v423_v54 = vpack.c.bf16 %v3545_v50, %v3539_v45  ;;  %v384_v55 = vadd.f32 %v382_v52, %v234_v49  ;;  %v3047_v57 = vpop.eup %3046 }
 0x110   :  { %3048 = vtanh.f32 %v383_v51  ;;  %v388_v61 = vsub.f32 1.0, %v3047_v57  ;;  %v392_v14 = vmul.f32 0.0, %v3047_v57  ;;  %v556_v51 = vld [vmem:[%s4393_s1 + $0x128] sm:$0xff] }
 0x111   :  { %2665 = vmatmul.mubr.msk.bf16.vlgmr.msra.gmra.mrb[0].mxu0 %vm97_vm1, %v423_v54  ;;  %2854 = vmatmul.mubr.msk.bf16.vlgmr.msra.gmra.mrb[16].mxu1 %vm97_vm1, %v423_v54  ;;  %3050 = vtanh.f32 %v384_v55 }
 0x112   :  { %566 = vmatpush1.bf16.msra.mxu0 %v3450_v9  ;;  %2858 = vmatpush3.bf16.msra.mxu1 %v3471_v12 }
 0x113   :  { %567 = vmatprep.subr.bf16.mxu0 %v3456_v10  ;;  %2859 = vmatprep.subr.bf16.mxu1 %v3352_v7 }
 0x114   :  { %597 = vmatprep.mubr.bf16.mxu0 %v3351_v1  ;;  %2861 = vmatprep.mubr.msk.bf16.mxu1 %vm3353_vm0, %v3352_v7 }
 0x116   :  { %568 = vmatpush1.bf16.msra.mxu0 %v3463_v11  ;;  %2860 = vmatpush3.bf16.msra.mxu1 %v3479_v13 }
 0x117   :  { %725 = vmatprep.subr.bf16.mxu0 %v3397_v0  ;;  %2865 = vmatprep.subr.bf16.mxu1 %v3352_v7 }
 0x11a   :  { %v3049_v59 = vpop.eup %3048 }
 0x11b   :  { %v389_v62 = vmul.f32 %v3049_v59, %v387_v58  ;;  %v3051_v63 = vpop.eup %3050  ;;  %v559_v59 = vld [vmem:[%s4393_s1 + $0x140] sm:$0xff] }
 0x11c   :  { %v390_v15 = vmul.f32 %v3051_v63, %v388_v61 }
 0x11d   :  { %v3562_v16 = vadd.f32 %v391_v60, %v389_v62 }
 0x11e   :  { %v3564_v17 = vadd.f32 %v392_v14, %v390_v15 }
 0x120   :  { %v561_v18 = vpack.c.bf16 %v3564_v17, %v3562_v16 }
 0x122   :  { %2671 = vmatmul.mubr.msk.bf16.vlgmr.msra.gmra.mrb[4].mxu0 %vm97_vm1, %v561_v18  ;;  %2862 = vmatmul.mubr.msk.bf16.vlgmr.msra.gmra.mrb[20].mxu1 %vm97_vm1, %v561_v18 }
 0x123   :  { %726 = vmatpush1.bf16.msra.mxu0 %v3404_v2  ;;  %2866 = vmatpush3.bf16.msra.mxu1 %v3431_v6 }
 0x124   :  { %727 = vmatprep.subr.bf16.mxu0 %v3410_v3  ;;  %2867 = vmatprep.subr.bf16.mxu1 %v3352_v7 }
 0x125   :  { %757 = vmatprep.mubr.bf16.mxu0 %v3351_v1  ;;  %2869 = vmatprep.mubr.msk.bf16.mxu1 %vm3353_vm0, %v3352_v7 }
 0x127   :  { %728 = vmatpush1.bf16.msra.mxu0 %v3417_v4  ;;  %2868 = vmatpush3.bf16.msra.mxu1 %v3441_v8 }
 0x128   :  { %863 = vmatprep.subr.bf16.mxu0 %v3425_v5  ;;  %2873 = vmatprep.subr.bf16.mxu1 %v3352_v7 }
 0x1e4   :  { %v461_v20 = vpop.f32.mrb[0].mxu0  ;;  %v504_v21 = vpop.f32.mrb[16].mxu1 }
 0x1e5   :  { %v511_v23 = vadd.f32 %v461_v20, %v417_v19  ;;  %v463_v25 = vpop.f32.mrb[1].mxu0  ;;  %v2855_v26 = vpop.f32.mrb[17].mxu1 }
 0x1e6   :  { %v465_v27 = vpop.f32.mrb[2].mxu0  ;;  %v507_v28 = vpop.f32.mrb[18].mxu1  ;;  %v525_v35 = vadd.f32 %v463_v25, %v418_v24  ;;  %v419_v25 = vld [vmem:[%s4392_s0 + $0x40] sm:$0xff] }
 0x1e7   :  { %v2667_v30 = vmul.f32 -1.442695, %v511_v23  ;;  %v512_v31 = vadd.f32 %v465_v27, %v420_v22  ;;  %v467_v33 = vpop.f32.mrb[3].mxu0  ;;  %v2856_v34 = vpop.f32.mrb[19].mxu1  ;;  %v539_v22 = vadd.f32 %v3520_v53, %v504_v21 }
 0x1e8   :  { %v526_v37 = vadd.f32 %v467_v33, %v421_v32  ;;  %v2669_v38 = vmul.f32 -1.442695, %v525_v35  ;;  %v422_v32 = vld [vmem:[%s4392_s0 + $0x58] sm:$0xff] }
 0x1e9   :  { %3052 = vpow2.f32 %v2667_v30  ;;  %v2668_v36 = vmul.f32 -1.442695, %v512_v31  ;;  %v540_v30 = vadd.f32 %v3520_v53, %v507_v28 }
 0x1ea   :  { %v2670_v39 = vmul.f32 -1.442695, %v526_v37 }
 0x1eb   :  { %3054 = vpow2.f32 %v2668_v36 }
 0x1ec   :  { %3056 = vpow2.f32 %v2669_v38 }
 0x1ed   :  { %3058 = vpow2.f32 %v2670_v39 }
 0x1f3   :  { %v3053_v40 = vpop.eup %3052 }
 0x1f4   :  { %v519_v41 = vadd.f32 1.0, %v3053_v40 }
 0x1f5   :  { %v3055_v43 = vpop.eup %3054  ;;  %v599_v46 = vpop.f32.mrb[4].mxu0 }
 0x1f6   :  { %3060 = vrcp.f32 %v519_v41  ;;  %v520_v44 = vadd.f32 1.0, %v3055_v43  ;;  %v642_v47 = vpop.f32.mrb[20].mxu1  ;;  %v649_v49 = vadd.f32 %v599_v46, %v555_v42  ;;  %v601_v52 = vpop.f32.mrb[5].mxu0 }
 0x1f7   :  { %v2863_v54 = vpop.f32.mrb[21].mxu1  ;;  %v603_v55 = vpop.f32.mrb[6].mxu0  ;;  %v663_v63 = vadd.f32 %v601_v52, %v556_v51  ;;  %v677_v52 = vadd.f32 %v3533_v29, %v642_v47  ;;  %v560_v47 = vld [vmem:[%s4393_s1 + $0x148] sm:$0xff] }
 0x1f8   :  { %3062 = vrcp.f32 %v520_v44  ;;  %v645_v56 = vpop.f32.mrb[22].mxu1  ;;  %v2673_v57 = vmul.f32 -1.442695, %v649_v49  ;;  %v650_v58 = vadd.f32 %v603_v55, %v558_v48  ;;  %v605_v60 = vpop.f32.mrb[7].mxu0 }
 0x1f9   :  { %v2864_v61 = vpop.f32.mrb[23].mxu1  ;;  %v3057_v62 = vpop.eup %3056  ;;  %v664_v18 = vadd.f32 %v605_v60, %v559_v59  ;;  %v2675_v20 = vmul.f32 -1.442695, %v663_v63  ;;  %v557_v59 = vld [vmem:[%s4393_s1 + $0x130] sm:$0xff] }
 0x1fa   :  { %3064 = vpow2.f32 %v2673_v57  ;;  %v2674_v14 = vmul.f32 -1.442695, %v650_v58  ;;  %v3059_v15 = vpop.eup %3058  ;;  %v533_v19 = vadd.f32 1.0, %v3057_v62  ;;  %v678_v62 = vadd.f32 %v3533_v29, %v645_v56 }
 0x1fb   :  { %v534_v23 = vadd.f32 1.0, %v3059_v15  ;;  %v2676_v26 = vmul.f32 -1.442695, %v664_v18 }
 0x1fc   :  { %3066 = vpow2.f32 %v2674_v14 }
 0x1fd   :  { %3068 = vrcp.f32 %v533_v19 }
 0x1fe   :  { %3070 = vpow2.f32 %v2675_v20 }
 0x1ff   :  { %3072 = vrcp.f32 %v534_v23 }
 0x200   :  { %v3061_v24 = vpop.eup %3060  ;;  %3074 = vpow2.f32 %v2676_v26 }
 0x201   :  { %v541_v27 = vmul.f32 %v3061_v24, %v539_v22 }
 0x202   :  { %v3063_v31 = vpop.eup %3062 }
 0x203   :  { %v543_v33 = vadd.f32 %v541_v27, %v419_v25  ;;  %v542_v34 = vmul.f32 %v3063_v31, %v540_v30 }
 0x204   :  { %v3065_v21 = vpop.eup %3064 }
 0x205   :  { %3076 = vtanh.f32 %v543_v33  ;;  %v544_v35 = vadd.f32 %v542_v34, %v422_v32  ;;  %v657_v36 = vadd.f32 1.0, %v3065_v21 }
 0x206   :  { %v3067_v37 = vpop.eup %3066 }
 0x207   :  { %3078 = vtanh.f32 %v544_v35  ;;  %v658_v38 = vadd.f32 1.0, %v3067_v37  ;;  %v3069_v28 = vpop.eup %3068  ;;  %v715_v35 = vld [vmem:[%s4392_s0 + $0x60] sm:$0xff] }
 0x208   :  { %3080 = vrcp.f32 %v657_v36  ;;  %v3071_v39 = vpop.eup %3070  ;;  %v547_v42 = vsub.f32 1.0, %v3069_v28  ;;  %v551_v48 = vmul.f32 %v3069_v28, %v3539_v45 }
 0x209   :  { %3082 = vrcp.f32 %v658_v38  ;;  %v3073_v40 = vpop.eup %3072  ;;  %v671_v44 = vadd.f32 1.0, %v3071_v39  ;;  %v718_v38 = vld [vmem:[%s4392_s0 + $0x78] sm:$0xff]  ;;  %v716_v39 = vld [vmem:[%s4392_s0 + $0x68] sm:$0xff] }
 0x20a   :  { %v3075_v41 = vpop.eup %3074  ;;  %v548_v49 = vsub.f32 1.0, %v3073_v40  ;;  %v552_v58 = vmul.f32 %v3073_v40, %v3545_v50 }
 0x20b   :  { %v672_v54 = vadd.f32 1.0, %v3075_v41  ;;  %3084 = vrcp.f32 %v671_v44 }
 0x20d   :  { %3086 = vrcp.f32 %v672_v54 }
 0x20f   :  { %v3077_v43 = vpop.eup %3076 }
 0x210   :  { %v549_v46 = vmul.f32 %v3077_v43, %v547_v42 }
 0x211   :  { %v3079_v51 = vpop.eup %3078 }
 0x212   :  { %v3081_v55 = vpop.eup %3080  ;;  %v550_v57 = vmul.f32 %v3079_v51, %v548_v49  ;;  %v3619_v60 = vadd.f32 %v551_v48, %v549_v46  ;;  %v719_v48 = vld [vmem:[%s4392_s0 + $0x80] sm:$0xff] }
 0x213   :  { %v679_v61 = vmul.f32 %v3081_v55, %v677_v52  ;;  %v3083_v63 = vpop.eup %3082 }
 0x214   :  { %v3625_v14 = vadd.f32 %v552_v58, %v550_v57  ;;  %v680_v18 = vmul.f32 %v3083_v63, %v678_v62  ;;  %v853_v62 = vld [vmem:[%s4393_s1 + $0xf0] sm:$0xff] }
 0x215   :  { %v681_v15 = vadd.f32 %v679_v61, %v557_v59  ;;  %v3085_v56 = vpop.eup %3084 }
 0x216   :  { %v721_v19 = vpack.c.bf16 %v3625_v14, %v3619_v60  ;;  %v682_v20 = vadd.f32 %v680_v18, %v560_v47  ;;  %v685_v23 = vsub.f32 1.0, %v3085_v56  ;;  %v689_v26 = vmul.f32 %v3085_v56, %v3562_v16  ;;  %v854_v56 = vld [vmem:[%s4393_s1 + $0xf8] sm:$0xff] }
 0x217   :  { %3088 = vtanh.f32 %v681_v15  ;;  %v3087_v22 = vpop.eup %3086 }
 0x218   :  { %2677 = vmatmul.mubr.msk.bf16.vlgmr.msra.gmra.mrb[8].mxu0 %vm97_vm1, %v721_v19  ;;  %2870 = vmatmul.mubr.msk.bf16.vlgmr.msra.gmra.mrb[24].mxu1 %vm97_vm1, %v721_v19  ;;  %3090 = vtanh.f32 %v682_v20  ;;  %v686_v27 = vsub.f32 1.0, %v3087_v22  ;;  %v690_v32 = vmul.f32 %v3087_v22, %v3564_v17  ;;  %v856_v19 = vld [vmem:[%s4393_s1 + $0x108] sm:$0xff] }
 0x219   :  { %864 = vmatpush1.bf16.msra.mxu0 %v3450_v9  ;;  %2874 = vmatpush3.bf16.msra.mxu1 %v3471_v12 }
 0x21a   :  { %865 = vmatprep.subr.bf16.mxu0 %v3456_v10  ;;  %2875 = vmatprep.subr.bf16.mxu1 %v3352_v7 }
 0x21b   :  { %895 = vmatprep.mubr.bf16.mxu0 %v3351_v1  ;;  %2877 = vmatprep.mubr.msk.bf16.mxu1 %vm3353_vm0, %v3352_v7 }
 0x21d   :  { %866 = vmatpush1.bf16.msra.mxu0 %v3463_v11  ;;  %2876 = vmatpush3.bf16.msra.mxu1 %v3479_v13 }
 0x21e   :  { %1023 = vmatprep.subr.bf16.mxu0 %v3397_v0  ;;  %2881 = vmatprep.subr.bf16.mxu1 %v3352_v7 }
 0x221   :  { %v3089_v24 = vpop.eup %3088 }
 0x222   :  { %v687_v25 = vmul.f32 %v3089_v24, %v685_v23  ;;  %v3091_v30 = vpop.eup %3090 }
 0x223   :  { %v688_v31 = vmul.f32 %v3091_v30, %v686_v27  ;;  %v857_v30 = vld [vmem:[%s4393_s1 + $0x110] sm:$0xff] }
 0x224   :  { %v3644_v33 = vadd.f32 %v689_v26, %v687_v25 }
 0x225   :  { %v3646_v34 = vadd.f32 %v690_v32, %v688_v31 }
 0x227   :  { %v859_v21 = vpack.c.bf16 %v3646_v34, %v3644_v33 }
 0x229   :  { %2683 = vmatmul.mubr.msk.bf16.vlgmr.msra.gmra.mrb[12].mxu0 %vm97_vm1, %v859_v21  ;;  %2878 = vmatmul.mubr.msk.bf16.vlgmr.msra.gmra.mrb[28].mxu1 %vm97_vm1, %v859_v21 }
 0x22a   :  { %1024 = vmatpush1.bf16.msra.mxu0 %v3404_v2  ;;  %2882 = vmatpush3.bf16.msra.mxu1 %v3431_v6 }
 0x22b   :  { %1025 = vmatprep.subr.bf16.mxu0 %v3410_v3  ;;  %2883 = vmatprep.subr.bf16.mxu1 %v3352_v7 }
 0x22c   :  { %1055 = vmatprep.mubr.bf16.mxu0 %v3351_v1  ;;  %2885 = vmatprep.mubr.msk.bf16.mxu1 %vm3353_vm0, %v3352_v7 }
 0x22e   :  { %1026 = vmatpush1.bf16.msra.mxu0 %v3417_v4  ;;  %2884 = vmatpush3.bf16.msra.mxu1 %v3441_v8 }
 0x22f   :  { %1161 = vmatprep.subr.bf16.mxu0 %v3425_v5  ;;  %2889 = vmatprep.subr.bf16.mxu1 %v3352_v7 }
 0x2eb   :  { %v759_v36 = vpop.f32.mrb[8].mxu0  ;;  %v802_v37 = vpop.f32.mrb[24].mxu1 }
 0x2ec   :  { %v809_v28 = vadd.f32 %v759_v36, %v715_v35  ;;  %v761_v40 = vpop.f32.mrb[9].mxu0  ;;  %v2871_v41 = vpop.f32.mrb[25].mxu1 }
 0x2ed   :  { %v763_v42 = vpop.f32.mrb[10].mxu0  ;;  %v805_v43 = vpop.f32.mrb[26].mxu1  ;;  %v823_v52 = vadd.f32 %v761_v40, %v716_v39  ;;  %v837_v41 = vadd.f32 %v3520_v53, %v802_v37 }
 0x2ee   :  { %v2679_v44 = vmul.f32 -1.442695, %v809_v28  ;;  %v810_v46 = vadd.f32 %v763_v42, %v718_v38  ;;  %v765_v49 = vpop.f32.mrb[11].mxu0  ;;  %v2872_v51 = vpop.f32.mrb[27].mxu1 }
 0x2ef   :  { %v824_v55 = vadd.f32 %v765_v49, %v719_v48  ;;  %v2681_v57 = vmul.f32 -1.442695, %v823_v52  ;;  %v838_v51 = vadd.f32 %v3520_v53, %v805_v43 }
 0x2f0   :  { %3092 = vpow2.f32 %v2679_v44  ;;  %v2680_v54 = vmul.f32 -1.442695, %v810_v46  ;;  %v717_v46 = vld [vmem:[%s4392_s0 + $0x70] sm:$0xff] }
 0x2f1   :  { %v2682_v58 = vmul.f32 -1.442695, %v824_v55 }
 0x2f2   :  { %3094 = vpow2.f32 %v2680_v54  ;;  %v720_v54 = vld [vmem:[%s4392_s0 + $0x88] sm:$0xff] }
 0x2f3   :  { %3096 = vpow2.f32 %v2681_v57 }
 0x2f4   :  { %3098 = vpow2.f32 %v2682_v58 }
 0x2fa   :  { %v3093_v59 = vpop.eup %3092 }
 0x2fb   :  { %v817_v61 = vadd.f32 1.0, %v3093_v59 }
 0x2fc   :  { %v3095_v63 = vpop.eup %3094  ;;  %v897_v15 = vpop.f32.mrb[12].mxu0 }
 0x2fd   :  { %3100 = vrcp.f32 %v817_v61  ;;  %v818_v47 = vadd.f32 1.0, %v3095_v63  ;;  %v940_v18 = vpop.f32.mrb[28].mxu1  ;;  %v947_v20 = vadd.f32 %v897_v15, %v853_v62  ;;  %v899_v22 = vpop.f32.mrb[13].mxu0 }
 0x2fe   :  { %v2879_v23 = vpop.f32.mrb[29].mxu1  ;;  %v901_v24 = vpop.f32.mrb[14].mxu0  ;;  %v961_v35 = vadd.f32 %v899_v22, %v854_v56 }
 0x2ff   :  { %3102 = vrcp.f32 %v818_v47  ;;  %v943_v25 = vpop.f32.mrb[30].mxu1  ;;  %v2685_v26 = vmul.f32 -1.442695, %v947_v20  ;;  %v948_v27 = vadd.f32 %v901_v24, %v856_v19  ;;  %v903_v31 = vpop.f32.mrb[15].mxu0 }
 0x300   :  { %v2880_v32 = vpop.f32.mrb[31].mxu1  ;;  %v3097_v21 = vpop.eup %3096  ;;  %v962_v28 = vadd.f32 %v903_v31, %v857_v30  ;;  %v2687_v40 = vmul.f32 -1.442695, %v961_v35  ;;  %v855_v35 = vld [vmem:[%s4393_s1 + $0x100] sm:$0xff] }
 0x301   :  { %3104 = vpow2.f32 %v2685_v26  ;;  %v2686_v36 = vmul.f32 -1.442695, %v948_v27  ;;  %v3099_v38 = vpop.eup %3098  ;;  %v831_v39 = vadd.f32 1.0, %v3097_v21  ;;  %v975_v27 = vadd.f32 %v3533_v29, %v940_v18  ;;  %v858_v18 = vld [vmem:[%s4393_s1 + $0x118] sm:$0xff] }
 0x302   :  { %v832_v42 = vadd.f32 1.0, %v3099_v38  ;;  %v2688_v48 = vmul.f32 -1.442695, %v962_v28  ;;  %v976_v28 = vadd.f32 %v3533_v29, %v943_v25 }
 0x303   :  { %3106 = vpow2.f32 %v2686_v36 }
 0x304   :  { %3108 = vrcp.f32 %v831_v39 }
 0x305   :  { %3110 = vpow2.f32 %v2687_v40 }
 0x306   :  { %3112 = vrcp.f32 %v832_v42 }
 0x307   :  { %v3101_v44 = vpop.eup %3100  ;;  %3114 = vpow2.f32 %v2688_v48 }
 0x308   :  { %v839_v49 = vmul.f32 %v3101_v44, %v837_v41 }
 0x309   :  { %v3103_v52 = vpop.eup %3102 }
 0x30a   :  { %v841_v55 = vadd.f32 %v839_v49, %v717_v46  ;;  %v840_v57 = vmul.f32 %v3103_v52, %v838_v51 }
 0x30b   :  { %v3105_v37 = vpop.eup %3104 }
 0x30c   :  { %3116 = vtanh.f32 %v841_v55  ;;  %v842_v58 = vadd.f32 %v840_v57, %v720_v54  ;;  %v955_v59 = vadd.f32 1.0, %v3105_v37 }
 0x30d   :  { %v3107_v61 = vpop.eup %3106 }
 0x30e   :  { %3118 = vtanh.f32 %v842_v58  ;;  %v956_v62 = vadd.f32 1.0, %v3107_v61  ;;  %v3109_v43 = vpop.eup %3108 }
 0x30f   :  { %3120 = vrcp.f32 %v955_v59  ;;  %v3111_v63 = vpop.eup %3110  ;;  %v845_v19 = vsub.f32 1.0, %v3109_v43  ;;  %v849_v23 = vmul.f32 %v3109_v43, %v3619_v60  ;;  %v1017_v43 = vld [vmem:[%s4392_s0 + $0xb0] sm:$0xff] }
 0x310   :  { %3122 = vrcp.f32 %v956_v62  ;;  %v3113_v47 = vpop.eup %3112  ;;  %v969_v56 = vadd.f32 1.0, %v3111_v63 }
 0x311   :  { %v3115_v15 = vpop.eup %3114  ;;  %v846_v24 = vsub.f32 1.0, %v3113_v47  ;;  %v850_v21 = vmul.f32 %v3113_v47, %v3625_v14 }
 0x312   :  { %v970_v30 = vadd.f32 1.0, %v3115_v15  ;;  %3124 = vrcp.f32 %v969_v56 }
 0x314   :  { %3126 = vrcp.f32 %v970_v30 }
 0x316   :  { %v3117_v20 = vpop.eup %3116 }
 0x317   :  { %v847_v22 = vmul.f32 %v3117_v20, %v845_v19 }
 0x318   :  { %v3119_v26 = vpop.eup %3118 }
 0x319   :  { %v3121_v31 = vpop.eup %3120  ;;  %v848_v32 = vmul.f32 %v3119_v26, %v846_v24  ;;  %v3701_v36 = vadd.f32 %v849_v23, %v847_v22  ;;  %v1151_v26 = vld [vmem:[%s4393_s1 + $0xc0] sm:$0xff] }
 0x31a   :  { %v977_v38 = vmul.f32 %v3121_v31, %v975_v27  ;;  %v3123_v39 = vpop.eup %3122 }
 0x31b   :  { %v3707_v40 = vadd.f32 %v850_v21, %v848_v32  ;;  %v978_v42 = vmul.f32 %v3123_v39, %v976_v28  ;;  %v1154_v21 = vld [vmem:[%s4393_s1 + $0xd8] sm:$0xff] }
 0x31c   :  { %v979_v41 = vadd.f32 %v977_v38, %v855_v35  ;;  %v3125_v25 = vpop.eup %3124  ;;  %v1152_v38 = vld [vmem:[%s4393_s1 + $0xc8] sm:$0xff] }
 0x31d   :  { %v1019_v44 = vpack.c.bf16 %v3707_v40, %v3701_v36  ;;  %v980_v46 = vadd.f32 %v978_v42, %v858_v18  ;;  %v987_v49 = vmul.f32 %v3125_v25, %v3644_v33 }
 0x31e   :  { %3128 = vtanh.f32 %v979_v41 }
 0x31f   :  { %2689 = vmatmul.mubr.msk.bf16.vlgmr.msra.gmra.mrb[16].mxu0 %vm97_vm1, %v1019_v44  ;;  %2886 = vmatmul.mubr.msk.bf16.vlgmr.msra.gmra.mrb[32].mxu1 %vm97_vm1, %v1019_v44  ;;  %3130 = vtanh.f32 %v980_v46  ;;  %v1155_v46 = vld [vmem:[%s4393_s1 + $0xe0] sm:$0xff] }
 0x320   :  { %1162 = vmatpush1.bf16.msra.mxu0 %v3450_v9  ;;  %2890 = vmatpush3.bf16.msra.mxu1 %v3471_v12  ;;  %v3127_v9 = vpop.eup %3126  ;;  %v983_v12 = vsub.f32 1.0, %v3125_v25 }
 0x321   :  { %1163 = vmatprep.subr.bf16.mxu0 %v3456_v10  ;;  %2891 = vmatprep.subr.bf16.mxu1 %v3352_v7  ;;  %v984_v51 = vsub.f32 1.0, %v3127_v9  ;;  %v988_v55 = vmul.f32 %v3127_v9, %v3646_v34 }
 0x322   :  { %1193 = vmatprep.mubr.bf16.mxu0 %v3351_v1  ;;  %2893 = vmatprep.mubr.msk.bf16.mxu1 %vm3353_vm0, %v3352_v7 }
 0x324   :  { %1164 = vmatpush1.bf16.msra.mxu0 %v3463_v11  ;;  %2892 = vmatpush3.bf16.msra.mxu1 %v3479_v13  ;;  %v1016_v13 = vld [vmem:[%s4392_s0 + $0xa8] sm:$0xff] }
 0x325   :  { %1321 = vmatprep.subr.bf16.mxu0 %v3397_v0  ;;  %2897 = vmatprep.subr.bf16.mxu1 %v3352_v7 }
 0x328   :  { %v3129_v48 = vpop.eup %3128 }
 0x329   :  { %v985_v10 = vmul.f32 %v3129_v48, %v983_v12  ;;  %v3131_v52 = vpop.eup %3130 }
 0x32a   :  { %v986_v54 = vmul.f32 %v3131_v52, %v984_v51 }
 0x32b   :  { %v3726_v57 = vadd.f32 %v987_v49, %v985_v10 }
 0x32c   :  { %v3728_v11 = vadd.f32 %v988_v55, %v986_v54 }
 0x32e   :  { %v1157_v0 = vpack.c.bf16 %v3728_v11, %v3726_v57 }
 0x330   :  { %2695 = vmatmul.mubr.msk.bf16.vlgmr.msra.gmra.mrb[20].mxu0 %vm97_vm1, %v1157_v0  ;;  %2894 = vmatmul.mubr.msk.bf16.vlgmr.msra.gmra.mrb[36].mxu1 %vm97_vm1, %v1157_v0 }
 0x331   :  { %1322 = vmatpush1.bf16.msra.mxu0 %v3404_v2  ;;  %2898 = vmatpush3.bf16.msra.mxu1 %v3431_v6  ;;  %v1013_v2 = vld [vmem:[%s4392_s0 + $0x90] sm:$0xff] }
 0x332   :  { %1323 = vmatprep.subr.bf16.mxu0 %v3410_v3  ;;  %2899 = vmatprep.subr.bf16.mxu1 %v3352_v7 }
 0x333   :  { %1353 = vmatprep.mubr.bf16.mxu0 %v3351_v1  ;;  %2901 = vmatprep.mubr.msk.bf16.mxu1 %vm3353_vm0, %v3352_v7 }
 0x335   :  { %1324 = vmatpush1.bf16.msra.mxu0 %v3417_v4  ;;  %2900 = vmatpush3.bf16.msra.mxu1 %v3441_v8  ;;  %v1014_v4 = vld [vmem:[%s4392_s0 + $0x98] sm:$0xff] }
 0x336   :  { %1459 = vmatprep.subr.bf16.mxu0 %v3425_v5  ;;  %2905 = vmatprep.subr.bf16.mxu1 %v3352_v7 }
 0x3f2   :  { %v1057_v3 = vpop.f32.mrb[16].mxu0  ;;  %v1100_v6 = vpop.f32.mrb[32].mxu1 }
 0x3f3   :  { %v1107_v37 = vadd.f32 %v1057_v3, %v1013_v2  ;;  %v1059_v8 = vpop.f32.mrb[17].mxu0  ;;  %v2887_v58 = vpop.f32.mrb[33].mxu1  ;;  %v1135_v55 = vadd.f32 %v3520_v53, %v1100_v6  ;;  %v1015_v3 = vld [vmem:[%s4392_s0 + $0xa0] sm:$0xff] }
 0x3f4   :  { %v1061_v5 = vpop.f32.mrb[18].mxu0  ;;  %v1103_v59 = vpop.f32.mrb[34].mxu1  ;;  %v1121_v15 = vadd.f32 %v1059_v8, %v1014_v4  ;;  %v1018_v58 = vld [vmem:[%s4392_s0 + $0xb8] sm:$0xff] }
 0x3f5   :  { %v2691_v61 = vmul.f32 -1.442695, %v1107_v37  ;;  %v1108_v62 = vadd.f32 %v1061_v5, %v1016_v13  ;;  %v1063_v63 = vpop.f32.mrb[19].mxu0  ;;  %v2888_v47 = vpop.f32.mrb[35].mxu1  ;;  %v1136_v4 = vadd.f32 %v3520_v53, %v1103_v59 }
 0x3f6   :  { %v1122_v20 = vadd.f32 %v1063_v63, %v1017_v43  ;;  %v2693_v56 = vmul.f32 -1.442695, %v1121_v15 }
 0x3f7   :  { %3132 = vpow2.f32 %v2691_v61  ;;  %v2692_v19 = vmul.f32 -1.442695, %v1108_v62 }
 0x3f8   :  { %v2694_v22 = vmul.f32 -1.442695, %v1122_v20 }
 0x3f9   :  { %3134 = vpow2.f32 %v2692_v19 }
 0x3fa   :  { %3136 = vpow2.f32 %v2693_v56 }
 0x3fb   :  { %3138 = vpow2.f32 %v2694_v22 }
 0x401   :  { %v3133_v23 = vpop.eup %3132 }
 0x402   :  { %v1115_v24 = vadd.f32 1.0, %v3133_v23 }
 0x403   :  { %v3135_v27 = vpop.eup %3134  ;;  %v1195_v31 = vpop.f32.mrb[20].mxu0 }
 0x404   :  { %3140 = vrcp.f32 %v1115_v24  ;;  %v1116_v30 = vadd.f32 1.0, %v3135_v27  ;;  %v1238_v32 = vpop.f32.mrb[36].mxu1  ;;  %v1245_v35 = vadd.f32 %v1195_v31, %v1151_v26  ;;  %v1197_v28 = vpop.f32.mrb[21].mxu0 }
 0x405   :  { %v2895_v39 = vpop.f32.mrb[37].mxu1  ;;  %v1199_v18 = vpop.f32.mrb[22].mxu0  ;;  %v1259_v48 = vadd.f32 %v1197_v28, %v1152_v38  ;;  %v1153_v28 = vld [vmem:[%s4393_s1 + $0xd0] sm:$0xff] }
 0x406   :  { %3142 = vrcp.f32 %v1116_v30  ;;  %v1241_v41 = vpop.f32.mrb[38].mxu1  ;;  %v2697_v42 = vmul.f32 -1.442695, %v1245_v35  ;;  %v1246_v44 = vadd.f32 %v1199_v18, %v1154_v21  ;;  %v1201_v25 = vpop.f32.mrb[23].mxu0  ;;  %v1273_v30 = vadd.f32 %v3533_v29, %v1238_v32  ;;  %v1156_v32 = vld [vmem:[%s4393_s1 + $0xe8] sm:$0xff] }
 0x407   :  { %v2896_v9 = vpop.f32.mrb[39].mxu1  ;;  %v3137_v12 = vpop.eup %3136  ;;  %v1260_v51 = vadd.f32 %v1201_v25, %v1155_v46  ;;  %v2699_v54 = vmul.f32 -1.442695, %v1259_v48 }
 0x408   :  { %3144 = vpow2.f32 %v2697_v42  ;;  %v2698_v10 = vmul.f32 -1.442695, %v1246_v44  ;;  %v3139_v49 = vpop.eup %3138  ;;  %v1129_v52 = vadd.f32 1.0, %v3137_v12  ;;  %v1274_v42 = vadd.f32 %v3533_v29, %v1241_v41  ;;  %v3798_v29 = vld [vmem:[%s4391_s3 + $0x30] ss:$12 sps:$4 sm:$0xff]  }
 0x409   :  { %v1130_v0 = vadd.f32 1.0, %v3139_v49  ;;  %v2700_v13 = vmul.f32 -1.442695, %v1260_v51  ;;  %v3804_v41 = vld [vmem:[%s4391_s3 + $0x38] ss:$12 sps:$4 sm:$0xff]  }
 0x40a   :  { %3146 = vpow2.f32 %v2698_v10  ;;  %v3810_v10 = vld [vmem:[%s4391_s3 + $0x4c] ss:$12 sps:$4 sm:$0xff]   ;;  %v3820_v51 = vld [vmem:[%s4391_s3 + $0x48] ss:$12 sps:$4 sm:$0xff]  }
 0x40b   :  { %3148 = vrcp.f32 %v1129_v52  ;;  %v3826_v52 = vld [vmem:[%s4391_s3 + $0x50] ss:$12 sps:$4 sm:$0xff]  }
 0x40c   :  { %3150 = vpow2.f32 %v2699_v54  ;;  %v3832_v54 = vld [vmem:[%s4391_s3 + $0x4] ss:$12 sps:$4 sm:$0xff]  }
 0x40d   :  { %3152 = vrcp.f32 %v1130_v0 }
 0x40e   :  { %v3141_v2 = vpop.eup %3140  ;;  %3154 = vpow2.f32 %v2700_v13 }
 0x40f   :  { %v1137_v37 = vmul.f32 %v3141_v2, %v1135_v55 }
 0x410   :  { %v3143_v8 = vpop.eup %3142 }
 0x411   :  { %v1139_v5 = vadd.f32 %v1137_v37, %v1015_v3  ;;  %v1138_v61 = vmul.f32 %v3143_v8, %v1136_v4 }
 0x412   :  { %v3145_v6 = vpop.eup %3144 }
 0x413   :  { %3156 = vtanh.f32 %v1139_v5  ;;  %v1140_v62 = vadd.f32 %v1138_v61, %v1018_v58  ;;  %v1253_v43 = vadd.f32 1.0, %v3145_v6 }
 0x414   :  { %v3147_v63 = vpop.eup %3146 }
 0x415   :  { %3158 = vtanh.f32 %v1140_v62  ;;  %v1254_v47 = vadd.f32 1.0, %v3147_v63  ;;  %v3149_v53 = vpop.eup %3148  ;;  %v3849_v62 = vld [vmem:[%s4391_s3] ss:$12 sps:$4 sm:$0xff]   ;;  %v3861_v63 = vld [vmem:[%s4391_s3 + $0x1c] ss:$12 sps:$4 sm:$0xff]  }
 0x416   :  { %3160 = vrcp.f32 %v1253_v43  ;;  %v3151_v59 = vpop.eup %3150  ;;  %v1143_v20 = vsub.f32 1.0, %v3149_v53  ;;  %v1147_v24 = vmul.f32 %v3149_v53, %v3701_v36  ;;  %v3855_v43 = vld [vmem:[%s4391_s3 + $0x8] ss:$12 sps:$4 sm:$0xff]   ;;  %v3877_v53 = vld [vmem:[%s4391_s3 + $0x20] ss:$12 sps:$4 sm:$0xff]  }
 0x417   :  { %3162 = vrcp.f32 %v1254_v47  ;;  %v3153_v15 = vpop.eup %3152  ;;  %v1267_v22 = vadd.f32 1.0, %v3151_v59  ;;  %v3871_v47 = vld [vmem:[%s4391_s3 + $0x18] ss:$12 sps:$4 sm:$0xff]   ;;  %v3883_v59 = vld [vmem:[%s4391_s3 + $0x34] ss:$12 sps:$4 sm:$0xff]  }
 0x418   :  { %v3155_v19 = vpop.eup %3154  ;;  %v1144_v26 = vsub.f32 1.0, %v3153_v15  ;;  %v1148_v38 = vmul.f32 %v3153_v15, %v3707_v40  ;;  %v1311_v15 = vld [vmem:[%s4392_s0 + $0xc0] sm:$0xff] }
 0x419   :  { %v1268_v31 = vadd.f32 1.0, %v3155_v19  ;;  %3164 = vrcp.f32 %v1267_v22 }
 0x41b   :  { %3166 = vrcp.f32 %v1268_v31 }
 0x41d   :  { %v3157_v56 = vpop.eup %3156 }
 0x41e   :  { %v1145_v23 = vmul.f32 %v3157_v56, %v1143_v20  ;;  %v1314_v56 = vld [vmem:[%s4392_s0 + $0xd8] sm:$0xff] }
 0x41f   :  { %v3159_v27 = vpop.eup %3158 }
 0x420   :  { %v3161_v21 = vpop.eup %3160  ;;  %v1146_v35 = vmul.f32 %v3159_v27, %v1144_v26  ;;  %v3783_v39 = vadd.f32 %v1147_v24, %v1145_v23  ;;  %v1312_v23 = vld [vmem:[%s4392_s0 + $0xc8] sm:$0xff] }
 0x421   :  { %v1275_v18 = vmul.f32 %v3161_v21, %v1273_v30  ;;  %v3163_v44 = vpop.eup %3162 }
 0x422   :  { %v3789_v46 = vadd.f32 %v1148_v38, %v1146_v35  ;;  %v1276_v9 = vmul.f32 %v3163_v44, %v1274_v42  ;;  %v1315_v35 = vld [vmem:[%s4392_s0 + $0xe0] sm:$0xff] }
 0x423   :  { %v1277_v25 = vadd.f32 %v1275_v18, %v1153_v28  ;;  %v3165_v49 = vpop.eup %3164 }
 0x424   :  { %v1317_v12 = vpack.c.bf16 %v3789_v46, %v3783_v39  ;;  %v1278_v48 = vadd.f32 %v1276_v9, %v1156_v32  ;;  %v1281_v0 = vsub.f32 1.0, %v3165_v49  ;;  %v1285_v13 = vmul.f32 %v3165_v49, %v3726_v57 }
 0x425   :  { %3168 = vtanh.f32 %v1277_v25  ;;  %v3167_v55 = vpop.eup %3166 }
 0x426   :  { %2701 = vmatmul.mubr.msk.bf16.vlgmr.msra.gmra.mrb[24].mxu0 %vm97_vm1, %v1317_v12  ;;  %2902 = vmatmul.mubr.msk.bf16.vlgmr.msra.gmra.mrb[40].mxu1 %vm97_vm1, %v1317_v12  ;;  %3170 = vtanh.f32 %v1278_v48  ;;  %v1282_v37 = vsub.f32 1.0, %v3167_v55  ;;  %v1286_v58 = vmul.f32 %v3167_v55, %v3728_v11  ;;  %v1449_v48 = vld [vmem:[%s4393_s1 + $0x90] sm:$0xff] }
 0x427   :  { %1460 = vmatpush1.bf16.msra.mxu0 %v3798_v29  ;;  %2906 = vmatpush3.bf16.msra.mxu1 %v3804_v41 }
 0x428   :  { %1461 = vmatprep.subr.bf16.mxu0 %v3810_v10  ;;  %2907 = vmatprep.subr.bf16.mxu1 %v3352_v7 }
 0x429   :  { %1491 = vmatprep.mubr.bf16.mxu0 %v3351_v1  ;;  %2909 = vmatprep.mubr.msk.bf16.mxu1 %vm3353_vm0, %v3352_v7 }
 0x42b   :  { %1462 = vmatpush1.bf16.msra.mxu0 %v3820_v51  ;;  %2908 = vmatpush3.bf16.msra.mxu1 %v3826_v52 }
 0x42c   :  { %1615 = vmatprep.subr.bf16.mxu0 %v3832_v54  ;;  %2913 = vmatprep.subr.bf16.mxu1 %v3352_v7 }
 0x42f   :  { %v3169_v2 = vpop.eup %3168 }
 0x430   :  { %v1283_v3 = vmul.f32 %v3169_v2, %v1281_v0  ;;  %v3171_v4 = vpop.eup %3170 }
 0x431   :  { %v1284_v8 = vmul.f32 %v3171_v4, %v1282_v37  ;;  %v1450_v37 = vld [vmem:[%s4393_s1 + $0x98] sm:$0xff] }
 0x432   :  { %v3838_v5 = vadd.f32 %v1285_v13, %v1283_v3  ;;  %v1452_v3 = vld [vmem:[%s4393_s1 + $0xa8] sm:$0xff] }
 0x433   :  { %v3840_v61 = vadd.f32 %v1286_v58, %v1284_v8 }
 0x435   :  { %v1455_v6 = vpack.c.bf16 %v3840_v61, %v3838_v5 }
 0x437   :  { %2707 = vmatmul.mubr.msk.bf16.vlgmr.msra.gmra.mrb[28].mxu0 %vm97_vm1, %v1455_v6  ;;  %2910 = vmatmul.mubr.msk.bf16.vlgmr.msra.gmra.mrb[44].mxu1 %vm97_vm1, %v1455_v6 }
 0x438   :  { %1616 = vmatpush1.bf16.msra.mxu0 %v3849_v62  ;;  %2914 = vmatpush3.bf16.msra.mxu1 %v3855_v43 }
 0x439   :  { %1617 = vmatprep.subr.bf16.mxu0 %v3861_v63  ;;  %2915 = vmatprep.subr.bf16.mxu1 %v3352_v7 }
 0x43a   :  { %1647 = vmatprep.mubr.bf16.mxu0 %v3351_v1  ;;  %2917 = vmatprep.mubr.msk.bf16.mxu1 %vm3353_vm0, %v3352_v7 }
 0x43c   :  { %1618 = vmatpush1.bf16.msra.mxu0 %v3871_v47  ;;  %2916 = vmatpush3.bf16.msra.mxu1 %v3877_v53 }
 0x43d   :  { %1753 = vmatprep.subr.bf16.mxu0 %v3883_v59  ;;  %2921 = vmatprep.subr.bf16.mxu1 %v3352_v7 }
 0x4f9   :  { %v1355_v19 = vpop.f32.mrb[24].mxu0  ;;  %v1398_v20 = vpop.f32.mrb[40].mxu1 }
 0x4fa   :  { %v1405_v22 = vadd.f32 %v1355_v19, %v1311_v15  ;;  %v1357_v24 = vpop.f32.mrb[25].mxu0  ;;  %v2903_v26 = vpop.f32.mrb[41].mxu1 }
 0x4fb   :  { %v1359_v27 = vpop.f32.mrb[26].mxu0  ;;  %v1401_v30 = vpop.f32.mrb[42].mxu1  ;;  %v1419_v18 = vadd.f32 %v1357_v24, %v1312_v23 }
 0x4fc   :  { %v2703_v31 = vmul.f32 -1.442695, %v1405_v22  ;;  %v1406_v21 = vadd.f32 %v1359_v27, %v1314_v56  ;;  %v1361_v38 = vpop.f32.mrb[27].mxu0  ;;  %v2904_v28 = vpop.f32.mrb[43].mxu1  ;;  %v1453_v56 = vld [vmem:[%s4393_s1 + $0xb0] sm:$0xff] }
 0x4fd   :  { %v1420_v44 = vadd.f32 %v1361_v38, %v1315_v35  ;;  %v2705_v32 = vmul.f32 -1.442695, %v1419_v18  ;;  %v3914_v28 = vld [vmem:[%s4394_s4] ss:$0 sm:$0xff] }
 0x4fe   :  { %3172 = vpow2.f32 %v2703_v31  ;;  %v2704_v42 = vmul.f32 -1.442695, %v1406_v21  ;;  %v1433_v18 = vadd.f32 %v3914_v28, %v1398_v20 }
 0x4ff   :  { %v2706_v25 = vmul.f32 -1.442695, %v1420_v44 }
 0x500   :  { %3174 = vpow2.f32 %v2704_v42 }
 0x501   :  { %3176 = vpow2.f32 %v2705_v32  ;;  %v1313_v32 = vld [vmem:[%s4392_s0 + $0xd0] sm:$0xff] }
 0x502   :  { %3178 = vpow2.f32 %v2706_v25 }
 0x508   :  { %v3173_v9 = vpop.eup %3172 }
 0x509   :  { %v1413_v12 = vadd.f32 1.0, %v3173_v9 }
 0x50a   :  { %v3175_v49 = vpop.eup %3174  ;;  %v1493_v0 = vpop.f32.mrb[28].mxu0 }
 0x50b   :  { %3180 = vrcp.f32 %v1413_v12  ;;  %v1414_v55 = vadd.f32 1.0, %v3175_v49  ;;  %v1536_v2 = vpop.f32.mrb[44].mxu1  ;;  %v1543_v13 = vadd.f32 %v1493_v0, %v1449_v48  ;;  %v1495_v4 = vpop.f32.mrb[29].mxu0  ;;  %v1434_v12 = vadd.f32 %v3914_v28, %v1401_v30  ;;  %v1316_v49 = vld [vmem:[%s4392_s0 + $0xe8] sm:$0xff] }
 0x50c   :  { %v2911_v8 = vpop.f32.mrb[45].mxu1  ;;  %v1497_v58 = vpop.f32.mrb[30].mxu0  ;;  %v1557_v26 = vadd.f32 %v1495_v4, %v1450_v37 }
 0x50d   :  { %3182 = vrcp.f32 %v1414_v55  ;;  %v1539_v6 = vpop.f32.mrb[46].mxu1  ;;  %v2709_v15 = vmul.f32 -1.442695, %v1543_v13  ;;  %v1544_v19 = vadd.f32 %v1497_v58, %v1452_v3  ;;  %v1499_v22 = vpop.f32.mrb[31].mxu0 }
 0x50e   :  { %v2912_v23 = vpop.f32.mrb[47].mxu1  ;;  %v3177_v24 = vpop.eup %3176  ;;  %v1558_v21 = vadd.f32 %v1499_v22, %v1453_v56  ;;  %v2711_v38 = vmul.f32 -1.442695, %v1557_v26 }
 0x50f   :  { %3184 = vpow2.f32 %v2709_v15  ;;  %v2710_v27 = vmul.f32 -1.442695, %v1544_v19  ;;  %v3179_v31 = vpop.eup %3178  ;;  %v1427_v35 = vadd.f32 1.0, %v3177_v24 }
 0x510   :  { %v1428_v42 = vadd.f32 1.0, %v3179_v31  ;;  %v2712_v25 = vmul.f32 -1.442695, %v1558_v21  ;;  %v3928_v31 = vld [vmem:[%s4394_s4 + $0x1] ss:$0 sm:$0xff] }
 0x511   :  { %3186 = vpow2.f32 %v2710_v27  ;;  %v1571_v21 = vadd.f32 %v3928_v31, %v1536_v2  ;;  %v1454_v2 = vld [vmem:[%s4393_s1 + $0xb8] sm:$0xff] }
 0x512   :  { %3188 = vrcp.f32 %v1427_v35 }
 0x513   :  { %3190 = vpow2.f32 %v2711_v38 }
 0x514   :  { %3192 = vrcp.f32 %v1428_v42 }
 0x515   :  { %v3181_v44 = vpop.eup %3180  ;;  %3194 = vpow2.f32 %v2712_v25 }
 0x516   :  { %v1435_v9 = vmul.f32 %v3181_v44, %v1433_v18  ;;  %v1451_v44 = vld [vmem:[%s4393_s1 + $0xa0] sm:$0xff] }
 0x517   :  { %v3183_v48 = vpop.eup %3182 }
 0x518   :  { %v1437_v55 = vadd.f32 %v1435_v9, %v1313_v32  ;;  %v1436_v0 = vmul.f32 %v3183_v48, %v1434_v12  ;;  %v1572_v9 = vadd.f32 %v3928_v31, %v1539_v6 }
 0x519   :  { %v3185_v20 = vpop.eup %3184 }
 0x51a   :  { %3196 = vtanh.f32 %v1437_v55  ;;  %v1438_v3 = vadd.f32 %v1436_v0, %v1316_v49  ;;  %v1551_v13 = vadd.f32 1.0, %v3185_v20 }
 0x51b   :  { %v3187_v37 = vpop.eup %3186 }
 0x51c   :  { %3198 = vtanh.f32 %v1438_v3  ;;  %v1552_v4 = vadd.f32 1.0, %v3187_v37  ;;  %v3189_v30 = vpop.eup %3188 }
 0x51d   :  { %3200 = vrcp.f32 %v1551_v13  ;;  %v3191_v8 = vpop.eup %3190  ;;  %v1441_v19 = vsub.f32 1.0, %v3189_v30  ;;  %v1445_v24 = vmul.f32 %v3189_v30, %v3783_v39 }
 0x51e   :  { %3202 = vrcp.f32 %v1552_v4  ;;  %v3193_v58 = vpop.eup %3192  ;;  %v1565_v22 = vadd.f32 1.0, %v3191_v8 }
 0x51f   :  { %v3195_v15 = vpop.eup %3194  ;;  %v1442_v26 = vsub.f32 1.0, %v3193_v58  ;;  %v1446_v42 = vmul.f32 %v3193_v58, %v3789_v46 }
 0x520   :  { %v1566_v35 = vadd.f32 1.0, %v3195_v15  ;;  %3204 = vrcp.f32 %v1565_v22 }
 0x522   :  { %3206 = vrcp.f32 %v1566_v35 }
 0x524   :  { %v3197_v56 = vpop.eup %3196 }
 0x525   :  { %v1443_v23 = vmul.f32 %v3197_v56, %v1441_v19 }
 0x526   :  { %v3199_v27 = vpop.eup %3198 }
 0x527   :  { %v3201_v38 = vpop.eup %3200  ;;  %v1444_v18 = vmul.f32 %v3199_v27, %v1442_v26  ;;  %v3935_v32 = vadd.f32 %v1445_v24, %v1443_v23  ;;  %v1605_v24 = vld [vmem:[%s4392_s0 + $0xf0] sm:$0xff] }
 0x528   :  { %v1573_v25 = vmul.f32 %v3201_v38, %v1571_v21  ;;  %v3203_v12 = vpop.eup %3202  ;;  %v1608_v21 = vld [vmem:[%s4392_s0 + $0x108] sm:$0xff]  ;;  %v1606_v38 = vld [vmem:[%s4392_s0 + $0xf8] sm:$0xff] }
 0x529   :  { %v3941_v48 = vadd.f32 %v1446_v42, %v1444_v18  ;;  %v1574_v55 = vmul.f32 %v3203_v12, %v1572_v9 }
 0x52a   :  { %v1575_v49 = vadd.f32 %v1573_v25, %v1451_v44  ;;  %v3205_v6 = vpop.eup %3204 }
 0x52b   :  { %v1611_v0 = vpack.c.bf16 %v3941_v48, %v3935_v32  ;;  %v1576_v20 = vadd.f32 %v1574_v55, %v1454_v2  ;;  %v1579_v13 = vsub.f32 1.0, %v3205_v6  ;;  %v1583_v30 = vmul.f32 %v3205_v6, %v3838_v5  ;;  %v1609_v2 = vld [vmem:[%s4392_s0 + $0x110] sm:$0xff] }
 0x52c   :  { %3208 = vtanh.f32 %v1575_v49  ;;  %v3207_v3 = vpop.eup %3206 }
 0x52d   :  { %2713 = vmatmul.mubr.msk.bf16.vlgmr.msra.gmra.mrb[32].mxu0 %vm97_vm1, %v1611_v0  ;;  %2918 = vmatmul.mubr.msk.bf16.vlgmr.msra.gmra.mrb[48].mxu1 %vm97_vm1, %v1611_v0  ;;  %3210 = vtanh.f32 %v1576_v20  ;;  %v1580_v8 = vsub.f32 1.0, %v3207_v3  ;;  %v1584_v19 = vmul.f32 %v3207_v3, %v3840_v61 }
 0x52e   :  { %1754 = vmatpush1.bf16.msra.mxu0 %v3798_v29  ;;  %2922 = vmatpush3.bf16.msra.mxu1 %v3804_v41 }
 0x52f   :  { %1755 = vmatprep.subr.bf16.mxu0 %v3810_v10  ;;  %2923 = vmatprep.subr.bf16.mxu1 %v3352_v7 }
 0x530   :  { %1785 = vmatprep.mubr.bf16.mxu0 %v3351_v1  ;;  %2925 = vmatprep.mubr.msk.bf16.mxu1 %vm3353_vm0, %v3352_v7 }
 0x532   :  { %1756 = vmatpush1.bf16.msra.mxu0 %v3820_v51  ;;  %2924 = vmatpush3.bf16.msra.mxu1 %v3826_v52 }
 0x533   :  { %1909 = vmatprep.subr.bf16.mxu0 %v3832_v54  ;;  %2929 = vmatprep.subr.bf16.mxu1 %v3352_v7 }
 0x536   :  { %v3209_v37 = vpop.eup %3208 }
 0x537   :  { %v1581_v4 = vmul.f32 %v3209_v37, %v1579_v13  ;;  %v3211_v58 = vpop.eup %3210 }
 0x538   :  { %v1582_v15 = vmul.f32 %v3211_v58, %v1580_v8 }
 0x539   :  { %v3960_v56 = vadd.f32 %v1583_v30, %v1581_v4  ;;  %v1743_v30 = vld [vmem:[%s4393_s1 + $0x60] sm:$0xff] }
 0x53a   :  { %v3962_v22 = vadd.f32 %v1584_v19, %v1582_v15 }
 0x53c   :  { %v1749_v23 = vpack.c.bf16 %v3962_v22, %v3960_v56 }
 0x53e   :  { %2719 = vmatmul.mubr.msk.bf16.vlgmr.msra.gmra.mrb[36].mxu0 %vm97_vm1, %v1749_v23  ;;  %2926 = vmatmul.mubr.msk.bf16.vlgmr.msra.gmra.mrb[52].mxu1 %vm97_vm1, %v1749_v23  ;;  %v1746_v23 = vld [vmem:[%s4393_s1 + $0x78] sm:$0xff] }
 0x53f   :  { %1910 = vmatpush1.bf16.msra.mxu0 %v3849_v62  ;;  %2930 = vmatpush3.bf16.msra.mxu1 %v3855_v43 }
 0x540   :  { %1911 = vmatprep.subr.bf16.mxu0 %v3861_v63  ;;  %2931 = vmatprep.subr.bf16.mxu1 %v3352_v7 }
 0x541   :  { %1941 = vmatprep.mubr.bf16.mxu0 %v3351_v1  ;;  %2933 = vmatprep.mubr.msk.bf16.mxu1 %vm3353_vm0, %v3352_v7 }
 0x543   :  { %1912 = vmatpush1.bf16.msra.mxu0 %v3871_v47  ;;  %2932 = vmatpush3.bf16.msra.mxu1 %v3877_v53 }
 0x544   :  { %2047 = vmatprep.subr.bf16.mxu0 %v3883_v59  ;;  %2937 = vmatprep.subr.bf16.mxu1 %v3352_v7 }
 0x600   :  { %v1649_v26 = vpop.f32.mrb[32].mxu0  ;;  %v1692_v27 = vpop.f32.mrb[48].mxu1 }
 0x601   :  { %v1699_v35 = vadd.f32 %v1649_v26, %v1605_v24  ;;  %v1651_v18 = vpop.f32.mrb[33].mxu0  ;;  %v2919_v42 = vpop.f32.mrb[49].mxu1  ;;  %v1744_v26 = vld [vmem:[%s4393_s1 + $0x68] sm:$0xff] }
 0x602   :  { %v1653_v44 = vpop.f32.mrb[34].mxu0  ;;  %v1695_v25 = vpop.f32.mrb[50].mxu1  ;;  %v1713_v0 = vadd.f32 %v1651_v18, %v1606_v38 }
 0x603   :  { %v2715_v9 = vmul.f32 -1.442695, %v1699_v35  ;;  %v1700_v12 = vadd.f32 %v1653_v44, %v1608_v21  ;;  %v1655_v49 = vpop.f32.mrb[35].mxu0  ;;  %v2920_v55 = vpop.f32.mrb[51].mxu1 }
 0x604   :  { %v1714_v6 = vadd.f32 %v1655_v49, %v1609_v2  ;;  %v2717_v3 = vmul.f32 -1.442695, %v1713_v0 }
 0x605   :  { %3212 = vpow2.f32 %v2715_v9  ;;  %v2716_v20 = vmul.f32 -1.442695, %v1700_v12  ;;  %v1747_v9 = vld [vmem:[%s4393_s1 + $0x80] sm:$0xff] }
 0x606   :  { %v2718_v13 = vmul.f32 -1.442695, %v1714_v6 }
 0x607   :  { %3214 = vpow2.f32 %v2716_v20 }
 0x608   :  { %3216 = vpow2.f32 %v2717_v3 }
 0x609   :  { %3218 = vpow2.f32 %v2718_v13 }
 0x60f   :  { %v3213_v37 = vpop.eup %3212 }
 0x610   :  { %v1707_v4 = vadd.f32 1.0, %v3213_v37  ;;  %v1727_v37 = vadd.f32 %v3914_v28, %v1692_v27 }
 0x611   :  { %v3215_v8 = vpop.eup %3214  ;;  %v1787_v15 = vpop.f32.mrb[36].mxu0 }
 0x612   :  { %3220 = vrcp.f32 %v1707_v4  ;;  %v1708_v58 = vadd.f32 1.0, %v3215_v8  ;;  %v1830_v19 = vpop.f32.mrb[52].mxu1  ;;  %v1837_v24 = vadd.f32 %v1787_v15, %v1743_v30  ;;  %v1789_v21 = vpop.f32.mrb[37].mxu0  ;;  %v1607_v8 = vld [vmem:[%s4392_s0 + $0x100] sm:$0xff] }
 0x613   :  { %v2927_v35 = vpop.f32.mrb[53].mxu1  ;;  %v1791_v38 = vpop.f32.mrb[38].mxu0  ;;  %v1851_v55 = vadd.f32 %v1789_v21, %v1744_v26  ;;  %v1610_v26 = vld [vmem:[%s4392_s0 + $0x118] sm:$0xff] }
 0x614   :  { %3222 = vrcp.f32 %v1708_v58  ;;  %v1833_v18 = vpop.f32.mrb[54].mxu1  ;;  %v2721_v42 = vmul.f32 -1.442695, %v1837_v24  ;;  %v1838_v44 = vadd.f32 %v1791_v38, %v1746_v23  ;;  %v1793_v12 = vpop.f32.mrb[39].mxu0  ;;  %v1728_v23 = vadd.f32 %v3914_v28, %v1695_v25 }
 0x615   :  { %v2928_v2 = vpop.f32.mrb[55].mxu1  ;;  %v3217_v49 = vpop.eup %3216  ;;  %v1852_v6 = vadd.f32 %v1793_v12, %v1747_v9  ;;  %v2723_v13 = vmul.f32 -1.442695, %v1851_v55 }
 0x616   :  { %3224 = vpow2.f32 %v2721_v42  ;;  %v2722_v0 = vmul.f32 -1.442695, %v1838_v44  ;;  %v3219_v20 = vpop.eup %3218  ;;  %v1721_v3 = vadd.f32 1.0, %v3217_v49 }
 0x617   :  { %v1722_v4 = vadd.f32 1.0, %v3219_v20  ;;  %v2724_v58 = vmul.f32 -1.442695, %v1852_v6 }
 0x618   :  { %3226 = vpow2.f32 %v2722_v0 }
 0x619   :  { %3228 = vrcp.f32 %v1721_v3 }
 0x61a   :  { %3230 = vpow2.f32 %v2723_v13 }
 0x61b   :  { %3232 = vrcp.f32 %v1722_v4  ;;  %v1865_v4 = vadd.f32 %v3928_v31, %v1830_v19  ;;  %v1748_v19 = vld [vmem:[%s4393_s1 + $0x88] sm:$0xff] }
 0x61c   :  { %v3221_v30 = vpop.eup %3220  ;;  %3234 = vpow2.f32 %v2724_v58 }
 0x61d   :  { %v1729_v15 = vmul.f32 %v3221_v30, %v1727_v37 }
 0x61e   :  { %v3223_v24 = vpop.eup %3222 }
 0x61f   :  { %v1731_v21 = vadd.f32 %v1729_v15, %v1607_v8  ;;  %v1730_v35 = vmul.f32 %v3223_v24, %v1728_v23  ;;  %v1745_v23 = vld [vmem:[%s4393_s1 + $0x70] sm:$0xff] }
 0x620   :  { %v3225_v27 = vpop.eup %3224 }
 0x621   :  { %3236 = vtanh.f32 %v1731_v21  ;;  %v1732_v38 = vadd.f32 %v1730_v35, %v1610_v26  ;;  %v1845_v42 = vadd.f32 1.0, %v3225_v27  ;;  %v1866_v21 = vadd.f32 %v3928_v31, %v1833_v18 }
 0x622   :  { %v3227_v44 = vpop.eup %3226 }
 0x623   :  { %3238 = vtanh.f32 %v1732_v38  ;;  %v1846_v9 = vadd.f32 1.0, %v3227_v44  ;;  %v3229_v25 = vpop.eup %3228 }
 0x624   :  { %3240 = vrcp.f32 %v1845_v42  ;;  %v3231_v12 = vpop.eup %3230  ;;  %v1735_v55 = vsub.f32 1.0, %v3229_v25  ;;  %v1739_v3 = vmul.f32 %v3229_v25, %v3935_v32 }
 0x625   :  { %3242 = vrcp.f32 %v1846_v9  ;;  %v3233_v2 = vpop.eup %3232  ;;  %v1859_v20 = vadd.f32 1.0, %v3231_v12 }
 0x626   :  { %v3235_v49 = vpop.eup %3234  ;;  %v1736_v13 = vsub.f32 1.0, %v3233_v2  ;;  %v1740_v15 = vmul.f32 %v3233_v2, %v3941_v48 }
 0x627   :  { %v1860_v30 = vadd.f32 1.0, %v3235_v49  ;;  %3244 = vrcp.f32 %v1859_v20 }
 0x629   :  { %3246 = vrcp.f32 %v1860_v30 }
 0x62b   :  { %v3237_v0 = vpop.eup %3236 }
 0x62c   :  { %v1737_v6 = vmul.f32 %v3237_v0, %v1735_v55 }
 0x62d   :  { %v3239_v37 = vpop.eup %3238 }
 0x62e   :  { %v3241_v8 = vpop.eup %3240  ;;  %v1738_v58 = vmul.f32 %v3239_v37, %v1736_v13  ;;  %v4017_v24 = vadd.f32 %v1739_v3, %v1737_v6 }
 0x62f   :  { %v1867_v26 = vmul.f32 %v3241_v8, %v1865_v4  ;;  %v3243_v35 = vpop.eup %3242  ;;  %v1902_v4 = vld [vmem:[%s4392_s0 + $0x138] sm:$0xff] }
 0x630   :  { %v4023_v27 = vadd.f32 %v1740_v15, %v1738_v58  ;;  %v1868_v42 = vmul.f32 %v3243_v35, %v1866_v21 }
 0x631   :  { %v1869_v38 = vadd.f32 %v1867_v26, %v1745_v23  ;;  %v3245_v18 = vpop.eup %3244  ;;  %v1903_v26 = vld [vmem:[%s4392_s0 + $0x140] sm:$0xff] }
 0x632   :  { %v1905_v44 = vpack.c.bf16 %v4023_v27, %v4017_v24  ;;  %v1870_v9 = vadd.f32 %v1868_v42, %v1748_v19  ;;  %v1873_v12 = vsub.f32 1.0, %v3245_v18  ;;  %v1877_v55 = vmul.f32 %v3245_v18, %v3960_v56 }
 0x633   :  { %3248 = vtanh.f32 %v1869_v38  ;;  %v3247_v25 = vpop.eup %3246 }
 0x634   :  { %2725 = vmatmul.mubr.msk.bf16.vlgmr.msra.gmra.mrb[40].mxu0 %vm97_vm1, %v1905_v44  ;;  %2934 = vmatmul.mubr.msk.bf16.vlgmr.msra.gmra.mrb[56].mxu1 %vm97_vm1, %v1905_v44  ;;  %3250 = vtanh.f32 %v1870_v9  ;;  %v1874_v0 = vsub.f32 1.0, %v3247_v25  ;;  %v1878_v3 = vmul.f32 %v3247_v25, %v3962_v22 }
 0x635   :  { %2048 = vmatpush1.bf16.msra.mxu0 %v3798_v29  ;;  %2938 = vmatpush3.bf16.msra.mxu1 %v3804_v41 }
 0x636   :  { %2049 = vmatprep.subr.bf16.mxu0 %v3810_v10  ;;  %2939 = vmatprep.subr.bf16.mxu1 %v3352_v7 }
 0x637   :  { %2079 = vmatprep.mubr.bf16.mxu0 %v3351_v1  ;;  %2941 = vmatprep.mubr.msk.bf16.mxu1 %vm3353_vm0, %v3352_v7 }
 0x639   :  { %2050 = vmatpush1.bf16.msra.mxu0 %v3820_v51  ;;  %2940 = vmatpush3.bf16.msra.mxu1 %v3826_v52 }
 0x63a   :  { %2203 = vmatprep.subr.bf16.mxu0 %v3832_v54  ;;  %2945 = vmatprep.subr.bf16.mxu1 %v3352_v7 }
 0x63d   :  { %v3249_v2 = vpop.eup %3248 }
 0x63e   :  { %v1875_v49 = vmul.f32 %v3249_v2, %v1873_v12  ;;  %v3251_v20 = vpop.eup %3250  ;;  %v2037_v12 = vld [vmem:[%s4393_s1 + $0x30] sm:$0xff] }
 0x63f   :  { %v1876_v6 = vmul.f32 %v3251_v20, %v1874_v0  ;;  %v2040_v20 = vld [vmem:[%s4393_s1 + $0x48] sm:$0xff] }
 0x640   :  { %v4042_v13 = vadd.f32 %v1877_v55, %v1875_v49 }
 0x641   :  { %v4044_v37 = vadd.f32 %v1878_v3, %v1876_v6  ;;  %v2038_v3 = vld [vmem:[%s4393_s1 + $0x38] sm:$0xff] }
 0x643   :  { %v2043_v54 = vpack.c.bf16 %v4044_v37, %v4042_v13 }
 0x645   :  { %2731 = vmatmul.mubr.msk.bf16.vlgmr.msra.gmra.mrb[44].mxu0 %vm97_vm1, %v2043_v54  ;;  %2942 = vmatmul.mubr.msk.bf16.vlgmr.msra.gmra.mrb[60].mxu1 %vm97_vm1, %v2043_v54 }
 0x646   :  { %2204 = vmatpush1.bf16.msra.mxu0 %v3849_v62  ;;  %2946 = vmatpush3.bf16.msra.mxu1 %v3855_v43  ;;  %v1899_v62 = vld [vmem:[%s4392_s0 + $0x120] sm:$0xff] }
 0x647   :  { %2205 = vmatprep.subr.bf16.mxu0 %v3861_v63  ;;  %2947 = vmatprep.subr.bf16.mxu1 %v3352_v7 }
 0x648   :  { %2235 = vmatprep.mubr.bf16.mxu0 %v3351_v1  ;;  %2949 = vmatprep.mubr.msk.bf16.mxu1 %vm3353_vm0, %v3352_v7 }
 0x64a   :  { %2206 = vmatpush1.bf16.msra.mxu0 %v3871_v47  ;;  %2948 = vmatpush3.bf16.msra.mxu1 %v3877_v53  ;;  %v1900_v47 = vld [vmem:[%s4392_s0 + $0x128] sm:$0xff] }
 0x64b   :  { %2341 = vmatprep.subr.bf16.mxu0 %v3883_v59  ;;  %2953 = vmatprep.subr.bf16.mxu1 %v3352_v7 }
 0x707   :  { %v1943_v43 = vpop.f32.mrb[40].mxu0  ;;  %v1986_v63 = vpop.f32.mrb[56].mxu1 }
 0x708   :  { %v1993_v30 = vadd.f32 %v1943_v43, %v1899_v62  ;;  %v1945_v53 = vpop.f32.mrb[41].mxu0  ;;  %v2935_v8 = vpop.f32.mrb[57].mxu1 }
 0x709   :  { %v1947_v59 = vpop.f32.mrb[42].mxu0  ;;  %v1989_v58 = vpop.f32.mrb[58].mxu1  ;;  %v2007_v19 = vadd.f32 %v1945_v53, %v1900_v47  ;;  %v2041_v53 = vld [vmem:[%s4393_s1 + $0x50] sm:$0xff] }
 0x70a   :  { %v2727_v15 = vmul.f32 -1.442695, %v1993_v30  ;;  %v1994_v23 = vadd.f32 %v1947_v59, %v1902_v4  ;;  %v1949_v21 = vpop.f32.mrb[43].mxu0  ;;  %v2936_v35 = vpop.f32.mrb[59].mxu1 }
 0x70b   :  { %v2008_v42 = vadd.f32 %v1949_v21, %v1903_v26  ;;  %v2729_v44 = vmul.f32 -1.442695, %v2007_v19 }
 0x70c   :  { %3252 = vpow2.f32 %v2727_v15  ;;  %v2728_v38 = vmul.f32 -1.442695, %v1994_v23 }
 0x70d   :  { %v2730_v9 = vmul.f32 -1.442695, %v2008_v42  ;;  %v2021_v42 = vadd.f32 %v3914_v28, %v1986_v63 }
 0x70e   :  { %3254 = vpow2.f32 %v2728_v38 }
 0x70f   :  { %3256 = vpow2.f32 %v2729_v44 }
 0x710   :  { %3258 = vpow2.f32 %v2730_v9 }
 0x716   :  { %v3253_v18 = vpop.eup %3252 }
 0x717   :  { %v2001_v25 = vadd.f32 1.0, %v3253_v18  ;;  %v1901_v18 = vld [vmem:[%s4392_s0 + $0x130] sm:$0xff] }
 0x718   :  { %v3255_v2 = vpop.eup %3254  ;;  %v2081_v55 = vpop.f32.mrb[44].mxu0 }
 0x719   :  { %3260 = vrcp.f32 %v2001_v25  ;;  %v2002_v49 = vadd.f32 1.0, %v3255_v2  ;;  %v2124_v0 = vpop.f32.mrb[60].mxu1  ;;  %v2131_v6 = vadd.f32 %v2081_v55, %v2037_v12  ;;  %v2083_v54 = vpop.f32.mrb[45].mxu0  ;;  %v2022_v2 = vadd.f32 %v3914_v28, %v1989_v58  ;;  %v1904_v55 = vld [vmem:[%s4392_s0 + $0x148] sm:$0xff] }
 0x71a   :  { %v2943_v62 = vpop.f32.mrb[61].mxu1  ;;  %v2085_v43 = vpop.f32.mrb[46].mxu0  ;;  %v2145_v23 = vadd.f32 %v2083_v54, %v2038_v3 }
 0x71b   :  { %3262 = vrcp.f32 %v2002_v49  ;;  %v2127_v4 = vpop.f32.mrb[62].mxu1  ;;  %v2733_v30 = vmul.f32 -1.442695, %v2131_v6  ;;  %v2132_v47 = vadd.f32 %v2085_v43, %v2040_v20  ;;  %v2087_v8 = vpop.f32.mrb[47].mxu0 }
 0x71c   :  { %v2944_v59 = vpop.f32.mrb[63].mxu1  ;;  %v3257_v15 = vpop.eup %3256  ;;  %v2146_v35 = vadd.f32 %v2087_v8, %v2041_v53  ;;  %v2735_v38 = vmul.f32 -1.442695, %v2145_v23 }
 0x71d   :  { %3264 = vpow2.f32 %v2733_v30  ;;  %v2734_v26 = vmul.f32 -1.442695, %v2132_v47  ;;  %v3259_v21 = vpop.eup %3258  ;;  %v2015_v19 = vadd.f32 1.0, %v3257_v15 }
 0x71e   :  { %v2016_v44 = vadd.f32 1.0, %v3259_v21  ;;  %v2736_v25 = vmul.f32 -1.442695, %v2146_v35 }
 0x71f   :  { %3266 = vpow2.f32 %v2734_v26 }
 0x720   :  { %3268 = vrcp.f32 %v2015_v19  ;;  %v2159_v19 = vadd.f32 %v3928_v31, %v2124_v0  ;;  %v2042_v0 = vld [vmem:[%s4393_s1 + $0x58] sm:$0xff] }
 0x721   :  { %3270 = vpow2.f32 %v2735_v38 }
 0x722   :  { %3272 = vrcp.f32 %v2016_v44 }
 0x723   :  { %v3261_v9 = vpop.eup %3260  ;;  %3274 = vpow2.f32 %v2736_v25 }
 0x724   :  { %v2023_v12 = vmul.f32 %v3261_v9, %v2021_v42 }
 0x725   :  { %v3263_v49 = vpop.eup %3262 }
 0x726   :  { %v2025_v20 = vadd.f32 %v2023_v12, %v1901_v18  ;;  %v2024_v6 = vmul.f32 %v3263_v49, %v2022_v2  ;;  %v2039_v18 = vld [vmem:[%s4393_s1 + $0x40] sm:$0xff]  ;;  %v2160_v2 = vadd.f32 %v3928_v31, %v2127_v4 }
 0x727   :  { %v3265_v63 = vpop.eup %3264 }
 0x728   :  { %3276 = vtanh.f32 %v2025_v20  ;;  %v2026_v3 = vadd.f32 %v2024_v6, %v1904_v55  ;;  %v2139_v54 = vadd.f32 1.0, %v3265_v63 }
 0x729   :  { %v3267_v62 = vpop.eup %3266 }
 0x72a   :  { %3278 = vtanh.f32 %v2026_v3  ;;  %v2140_v43 = vadd.f32 1.0, %v3267_v62  ;;  %v3269_v58 = vpop.eup %3268 }
 0x72b   :  { %3280 = vrcp.f32 %v2139_v54  ;;  %v3271_v30 = vpop.eup %3270  ;;  %v2029_v8 = vsub.f32 1.0, %v3269_v58  ;;  %v2033_v26 = vmul.f32 %v3269_v58, %v4017_v24 }
 0x72c   :  { %3282 = vrcp.f32 %v2140_v43  ;;  %v3273_v47 = vpop.eup %3272  ;;  %v2153_v15 = vadd.f32 1.0, %v3271_v30 }
 0x72d   :  { %v3275_v53 = vpop.eup %3274  ;;  %v2030_v21 = vsub.f32 1.0, %v3273_v47  ;;  %v2034_v9 = vmul.f32 %v3273_v47, %v4023_v27 }
 0x72e   :  { %v2154_v38 = vadd.f32 1.0, %v3275_v53  ;;  %3284 = vrcp.f32 %v2153_v15 }
 0x730   :  { %3286 = vrcp.f32 %v2154_v38 }
 0x732   :  { %v3277_v59 = vpop.eup %3276 }
 0x733   :  { %v2031_v23 = vmul.f32 %v3277_v59, %v2029_v8  ;;  %v2508_v8 = vld [vmem:[%s4395_s5] sm:$0xff]  ;;  %v2509_v59 = vld [vmem:[%s4395_s5 + $0x8] sm:$0xff] }
 0x734   :  { %v3279_v35 = vpop.eup %3278  ;;  %v2963_v15 = vpack.c.bf16 %v2509_v59, %v2508_v8  ;;  %v2520_v59 = vld [vmem:[%s4395_s5 + $0x60] sm:$0xff] }
 0x735   :  { %v3281_v42 = vpop.eup %3280  ;;  %v2032_v44 = vmul.f32 %v3279_v35, %v2030_v21  ;;  %v4099_v25 = vadd.f32 %v2033_v26, %v2031_v23  ;;  %v2526_v23 = vld [vmem:[%s4395_s5 + $0x90] sm:$0xff]  ;;  %v2527_v26 = vld [vmem:[%s4395_s5 + $0x98] sm:$0xff] }
 0x736   :  { %v2161_v12 = vmul.f32 %v3281_v42, %v2159_v19  ;;  %v3283_v49 = vpop.eup %3282  ;;  %v2965_v21 = vpack.c.bf16 %v2527_v26, %v2526_v23  ;;  %v2510_v35 = vld [vmem:[%s4395_s5 + $0x10] sm:$0xff]  ;;  %v2511_v19 = vld [vmem:[%s4395_s5 + $0x18] sm:$0xff]  ;;  %v2528_v42 = vld [vmem:[%s4395_s5 + $0xa0] sm:$0xff] }
 0x737   :  { %v4105_v55 = vadd.f32 %v2034_v9, %v2032_v44  ;;  %v2162_v6 = vmul.f32 %v3283_v49, %v2160_v2  ;;  %v2967_v38 = vpack.c.bf16 %v2511_v19, %v2510_v35  ;;  %v2529_v44 = vld [vmem:[%s4395_s5 + $0xa8] sm:$0xff]  ;;  %v2530_v49 = vld [vmem:[%s4395_s5 + $0xb0] sm:$0xff]  ;;  %v2539_v26 = vld [vmem:[%s4395_s5 + $0xf8] sm:$0xff] }
 0x738   :  { %v2163_v20 = vadd.f32 %v2161_v12, %v2039_v18  ;;  %v3285_v31 = vpop.eup %3284  ;;  %v2969_v9 = vpack.c.bf16 %v2529_v44, %v2528_v42  ;;  %v2512_v18 = vld [vmem:[%s4395_s5 + $0x20] sm:$0xff]  ;;  %v2513_v12 = vld [vmem:[%s4395_s5 + $0x28] sm:$0xff]  ;;  %v2538_v23 = vld [vmem:[%s4395_s5 + $0xf0] sm:$0xff] }
 0x739   :  { %v2199_v63 = vpack.c.bf16 %v4105_v55, %v4099_v25  ;;  %v2164_v3 = vadd.f32 %v2162_v6, %v2042_v0  ;;  %v2167_v54 = vsub.f32 1.0, %v3285_v31  ;;  %v2971_v2 = vpack.c.bf16 %v2513_v12, %v2512_v18  ;;  %v2531_v0 = vld [vmem:[%s4395_s5 + $0xb8] sm:$0xff]  ;;  %v2514_v6 = vld [vmem:[%s4395_s5 + $0x30] sm:$0xff]  ;;  %v2196_v12 = vld [vmem:[%s4392_s0 + $0x168] sm:$0xff] }
 0x73a   :  { %3288 = vtanh.f32 %v2163_v20  ;;  %v3287_v4 = vpop.eup %3286  ;;  %v2973_v20 = vpack.c.bf16 %v2531_v0, %v2530_v49  ;;  %v2989_v35 = vpack.c.bf16 %v2539_v26, %v2538_v23  ;;  %v2522_v19 = vld [vmem:[%s4395_s5 + $0x70] sm:$0xff]  ;;  %v2194_v49 = vld [vmem:[%s4392_s0 + $0x158] sm:$0xff]  ;;  %v2332_v26 = vld [vmem:[%s4393_s1 + $0x8] sm:$0xff] }
 0x73b   :  { %2737 = vmatmul.mubr.msk.bf16.vlgmr.msra.gmra.mrb[48].mxu0 %vm97_vm1, %v2199_v63  ;;  %2950 = vmatmul.mubr.msk.bf16.vlgmr.msra.gmra.mrb[64].mxu1 %vm97_vm1, %v2199_v63  ;;  %3290 = vtanh.f32 %v2164_v3  ;;  %v2168_v43 = vsub.f32 1.0, %v3287_v4  ;;  %v2172_v30 = vmul.f32 %v3287_v4, %v4044_v37  ;;  %v2515_v63 = vld [vmem:[%s4395_s5 + $0x38] sm:$0xff]  ;;  %v2533_v4 = vld [vmem:[%s4395_s5 + $0xc8] sm:$0xff]  ;;  %v2193_v44 = vld [vmem:[%s4392_s0 + $0x150] sm:$0xff] }
 0x73c   :  { %2342 = vmatpush1.bf16.msra.mxu0 %v3798_v29  ;;  %2954 = vmatpush3.bf16.msra.mxu1 %v3804_v41  ;;  %v2171_v41 = vmul.f32 %v3285_v31, %v4042_v13  ;;  %v2975_v3 = vpack.c.bf16 %v2515_v63, %v2514_v6  ;;  %v2532_v31 = vld [vmem:[%s4395_s5 + $0xc0] sm:$0xff] }
 0x73d   :  { %2343 = vmatprep.subr.bf16.mxu0 %v3810_v10  ;;  %2955 = vmatprep.subr.bf16.mxu1 %v3352_v7 }
 0x73e   :  { %2373 = vmatprep.mubr.bf16.mxu0 %v3351_v1  ;;  %2957 = vmatprep.mubr.msk.bf16.mxu1 %vm3353_vm0, %v3352_v7 }
 0x740   :  { %2344 = vmatpush1.bf16.msra.mxu0 %v3820_v51  ;;  %2956 = vmatpush3.bf16.msra.mxu1 %v3826_v52  ;;  %v2524_v51 = vld [vmem:[%s4395_s5 + $0x80] sm:$0xff]  ;;  %v2525_v52 = vld [vmem:[%s4395_s5 + $0x88] sm:$0xff] }
 0x741   :  { %v2961_v53 = vpack.c.bf16 %v2525_v52, %v2524_v51  ;;  %v2536_v51 = vld [vmem:[%s4395_s5 + $0xe0] sm:$0xff]  ;;  %v2537_v52 = vld [vmem:[%s4395_s5 + $0xe8] sm:$0xff] }
 0x742   :  { %v2985_v8 = vpack.c.bf16 %v2537_v52, %v2536_v51  ;;  %v2331_v51 = vld [vmem:[%s4393_s1] sm:$0xff] }
 0x743   :  { %2962 = vmatprep.subr.bf16.mxu0 %v2961_v53 }
 0x744   :  { %v3289_v62 = vpop.eup %3288 }
 0x745   :  { %v2169_v29 = vmul.f32 %v3289_v62, %v2167_v54  ;;  %v3291_v10 = vpop.eup %3290  ;;  %v2516_v54 = vld [vmem:[%s4395_s5 + $0x40] sm:$0xff]  ;;  %v2977_v62 = vpack.c.bf16 %v2533_v4, %v2532_v31  ;;  %v2197_v4 = vld [vmem:[%s4392_s0 + $0x170] sm:$0xff] }
 0x746   :  { %v2170_v58 = vmul.f32 %v3291_v10, %v2168_v43  ;;  %v2535_v43 = vld [vmem:[%s4395_s5 + $0xd8] sm:$0xff] }
 0x747   :  { %v4122_v1 = vadd.f32 %v2171_v41, %v2169_v29  ;;  %v2517_v29 = vld [vmem:[%s4395_s5 + $0x48] sm:$0xff]  ;;  %v2534_v41 = vld [vmem:[%s4395_s5 + $0xd0] sm:$0xff] }
 0x748   :  { %v4124_v47 = vadd.f32 %v2172_v30, %v2170_v58  ;;  %v2979_v10 = vpack.c.bf16 %v2517_v29, %v2516_v54  ;;  %v2981_v58 = vpack.c.bf16 %v2535_v43, %v2534_v41  ;;  %v2518_v30 = vld [vmem:[%s4395_s5 + $0x50] sm:$0xff] }
 0x74a   :  { %v2337_v7 = vpack.c.bf16 %v4124_v47, %v4122_v1 }
 0x74c   :  { %2743 = vmatmul.mubr.msk.bf16.vlgmr.msra.gmra.mrb[52].mxu0 %vm97_vm1, %v2337_v7  ;;  %2958 = vmatmul.mubr.msk.bf16.vlgmr.msra.gmra.mrb[68].mxu1 %vm97_vm1, %v2337_v7  ;;  %v2519_v7 = vld [vmem:[%s4395_s5 + $0x58] sm:$0xff] }
 0x74d   :  { %2964 = vmatpush3.bf16.msra.mxu0 %v2963_v15  ;;  %v2983_v53 = vpack.c.bf16 %v2519_v7, %v2518_v30  ;;  %v2521_v15 = vld [vmem:[%s4395_s5 + $0x68] sm:$0xff] }
 0x74e   :  { %2966 = vmatprep.subr.bf16.mxu0 %v2965_v21  ;;  %v2987_v21 = vpack.c.bf16 %v2521_v15, %v2520_v59  ;;  %v2334_v15 = vld [vmem:[%s4393_s1 + $0x18] sm:$0xff] }
 0x751   :  { %2968 = vmatpush3.bf16.msra.mxu0 %v2967_v38  ;;  %v2523_v38 = vld [vmem:[%s4395_s5 + $0x78] sm:$0xff] }
 0x752   :  { %2970 = vmatprep.subr.bf16.mxu0 %v2969_v9  ;;  %v2991_v42 = vpack.c.bf16 %v2523_v38, %v2522_v19  ;;  %v4252_v19 = vld [vmem:[%s4396_s2 + $0x8] sm:$0xff] }
 0x755   :  { %2972 = vmatpush3.bf16.msra.mxu0 %v2971_v2 }
 0x756   :  { %2974 = vmatprep.subr.bf16.mxu0 %v2973_v20 }
 0x759   :  { %2976 = vmatpush3.bf16.msra.mxu0 %v2975_v3 }
 0x75a   :  { %2978 = vmatprep.subr.bf16.mxu0 %v2977_v62 }
 0x75d   :  { %2980 = vmatpush3.bf16.msra.mxu0 %v2979_v10 }
 0x75e   :  { %2982 = vmatprep.subr.bf16.mxu0 %v2981_v58 }
 0x761   :  { %2984 = vmatpush3.bf16.msra.mxu0 %v2983_v53 }
 0x762   :  { %2986 = vmatprep.subr.bf16.mxu0 %v2985_v8 }
 0x765   :  { %2988 = vmatpush3.bf16.msra.mxu0 %v2987_v21 }
 0x766   :  { %2990 = vmatprep.subr.bf16.mxu0 %v2989_v35 }
 0x769   :  { %2992 = vmatpush3.bf16.msra.mxu0 %v2991_v42 }
 0x80e   :  { %v2237_v9 = vpop.f32.mrb[48].mxu0  ;;  %v2280_v18 = vpop.f32.mrb[64].mxu1 }
 0x80f   :  { %v2287_v2 = vadd.f32 %v2237_v9, %v2193_v44  ;;  %v2239_v0 = vpop.f32.mrb[49].mxu0  ;;  %v2951_v20 = vpop.f32.mrb[65].mxu1 }
 0x810   :  { %v2241_v6 = vpop.f32.mrb[50].mxu0  ;;  %v2283_v63 = vpop.f32.mrb[66].mxu1  ;;  %v2301_v29 = vadd.f32 %v2239_v0, %v2194_v49  ;;  %v4262_v20 = vld [vmem:[%s4396_s2] sm:$0xff] }
 0x811   :  { %v2739_v3 = vmul.f32 -1.442695, %v2287_v2  ;;  %v2288_v31 = vadd.f32 %v2241_v6, %v2196_v12  ;;  %v2243_v54 = vpop.f32.mrb[51].mxu0  ;;  %v2952_v62 = vpop.f32.mrb[67].mxu1  ;;  %v2335_v12 = vld [vmem:[%s4393_s1 + $0x20] sm:$0xff] }
 0x812   :  { %v2302_v43 = vadd.f32 %v2243_v54, %v2197_v4  ;;  %v2741_v10 = vmul.f32 -1.442695, %v2301_v29  ;;  %v399_v62 = vmul.f32 %v4262_v20, %v3539_v45  ;;  %v4276_v45 = vld [vmem:[%s4396_s2 + $0x78] sm:$0xff] }
 0x813   :  { %3292 = vpow2.f32 %v2739_v3  ;;  %v2740_v41 = vmul.f32 -1.442695, %v2288_v31  ;;  %v400_v3 = vmul.f32 %v4252_v19, %v3545_v50 }
 0x814   :  { %v2742_v58 = vmul.f32 -1.442695, %v2302_v43 }
 0x815   :  { %3294 = vpow2.f32 %v2740_v41  ;;  %v401_v43 = vadd.f32 %v400_v3, %v399_v62 }
 0x816   :  { %3296 = vpow2.f32 %v2741_v10  ;;  %v2315_v10 = vadd.f32 %v3914_v28, %v2280_v18  ;;  %v2198_v18 = vld [vmem:[%s4392_s0 + $0x178] sm:$0xff] }
 0x817   :  { %3298 = vpow2.f32 %v2742_v58 }
 0x81d   :  { %v3293_v30 = vpop.eup %3292 }
 0x81e   :  { %v2295_v7 = vadd.f32 1.0, %v3293_v30 }
 0x81f   :  { %v3295_v52 = vpop.eup %3294  ;;  %v2375_v8 = vpop.f32.mrb[52].mxu0 }
 0x820   :  { %3300 = vrcp.f32 %v2295_v7  ;;  %v2296_v53 = vadd.f32 1.0, %v3295_v52  ;;  %v4241_v59 = vpop.f32.mrb[68].mxu1  ;;  %v2425_v23 = vadd.f32 %v2375_v8, %v2331_v51  ;;  %v2377_v21 = vpop.f32.mrb[53].mxu0  ;;  %v2195_v7 = vld [vmem:[%s4392_s0 + $0x160] sm:$0xff]  ;;  %v2316_v52 = vadd.f32 %v3914_v28, %v2283_v63 }
 0x821   :  { %v2959_v35 = vpop.f32.mrb[69].mxu1  ;;  %v2379_v38 = vpop.f32.mrb[54].mxu0  ;;  %v2439_v6 = vadd.f32 %v2377_v21, %v2332_v26  ;;  %v402_v8 = vrot.slane %v401_v43, 4  ;;  %v397_v26 = vld [vmem:[%s4396_s2 + $0x70] sm:$0xff]  ;;  %v409_v28 = vmul.f32 %v4276_v45, %v3564_v17  ;;  %v694_v17 = vld [vmem:[%s4396_s2 + $0x18] sm:$0xff] }
 0x822   :  { %3302 = vrcp.f32 %v2296_v53  ;;  %v4254_v42 = vpop.f32.mrb[70].mxu1  ;;  %v2745_v44 = vmul.f32 -1.442695, %v2425_v23  ;;  %v2426_v9 = vadd.f32 %v2379_v38, %v2334_v15  ;;  %v2381_v2 = vpop.f32.mrb[55].mxu0  ;;  %v408_v38 = vmul.f32 %v397_v26, %v3562_v16 }
 0x823   :  { %v2960_v49 = vpop.f32.mrb[71].mxu1  ;;  %v3297_v0 = vpop.eup %3296  ;;  %v2440_v54 = vadd.f32 %v2381_v2, %v2335_v12  ;;  %v2747_v41 = vmul.f32 -1.442695, %v2439_v6 }
 0x824   :  { %3304 = vpow2.f32 %v2745_v44  ;;  %v2746_v31 = vmul.f32 -1.442695, %v2426_v9  ;;  %v3299_v4 = vpop.eup %3298  ;;  %v2309_v29 = vadd.f32 1.0, %v3297_v0  ;;  %v403_v9 = vadd.f32 %v402_v8, %v401_v43  ;;  %v693_v43 = vld [vmem:[%s4396_s2 + $0x10] sm:$0xff] }
 0x825   :  { %v2310_v58 = vadd.f32 1.0, %v3299_v4  ;;  %v2748_v50 = vmul.f32 -1.442695, %v2440_v54  ;;  %v410_v2 = vadd.f32 %v409_v28, %v408_v38 }
 0x826   :  { %3306 = vpow2.f32 %v2746_v31  ;;  %v404_v0 = vrot.slane %v403_v9, 2 }
 0x827   :  { %3308 = vrcp.f32 %v2309_v29  ;;  %v411_v3 = vrot.slane %v410_v2, 4  ;;  %v992_v29 = vld [vmem:[%s4396_s2 + $0x28] sm:$0xff] }
 0x828   :  { %3310 = vpow2.f32 %v2747_v41  ;;  %v405_v16 = vadd.f32 %v404_v0, %v403_v9 }
 0x829   :  { %3312 = vrcp.f32 %v2310_v58 }
 0x82a   :  { %v3301_v30 = vpop.eup %3300  ;;  %3314 = vpow2.f32 %v2748_v50  ;;  %v406_v0 = vrot.slane %v405_v16, 1 }
 0x82b   :  { %v2317_v51 = vmul.f32 %v3301_v30, %v2315_v10 }
 0x82c   :  { %v3303_v53 = vpop.eup %3302 }
 0x82d   :  { %v2319_v15 = vadd.f32 %v2317_v51, %v2195_v7  ;;  %v2318_v23 = vmul.f32 %v3303_v53, %v2316_v52  ;;  %v412_v7 = vadd.f32 %v411_v3, %v410_v2  ;;  %v698_v51 = vmul.f32 %v694_v17, %v3625_v14  ;;  %v991_v52 = vld [vmem:[%s4396_s2 + $0x20] sm:$0xff]  ;;  %v2333_v14 = vld [vmem:[%s4393_s1 + $0x10] sm:$0xff]  ;;  %v2336_v2 = vld [vmem:[%s4393_s1 + $0x28] sm:$0xff] }
 0x82e   :  { %v3305_v63 = vpop.eup %3304  ;;  %v3350_v53 = vld [vmem:[%s4394_s4 + $0x1] ss:$0 sm:$0xff] }
 0x82f   :  { %3316 = vtanh.f32 %v2319_v15  ;;  %v2320_v21 = vadd.f32 %v2318_v23, %v2198_v18  ;;  %v2433_v35 = vadd.f32 1.0, %v3305_v63  ;;  %v2453_v18 = vadd.f32 %v3350_v53, %v4241_v59  ;;  %v696_v59 = vld [vmem:[%s4396_s2 + $0x68] sm:$0xff] }
 0x830   :  { %v3307_v44 = vpop.eup %3306  ;;  %v996_v23 = vmul.f32 %v992_v29, %v3707_v40  ;;  %v995_v40 = vmul.f32 %v991_v52, %v3701_v36 }
 0x831   :  { %3318 = vtanh.f32 %v2320_v21  ;;  %v2434_v12 = vadd.f32 1.0, %v3307_v44  ;;  %v3309_v49 = vpop.eup %3308  ;;  %v2454_v44 = vadd.f32 %v3350_v53, %v4254_v42  ;;  %v695_v42 = vld [vmem:[%s4396_s2 + $0x60] sm:$0xff] }
 0x832   :  { %3320 = vrcp.f32 %v2433_v35  ;;  %v3311_v6 = vpop.eup %3310  ;;  %v2323_v54 = vsub.f32 1.0, %v3309_v49  ;;  %v2327_v58 = vmul.f32 %v3309_v49, %v4099_v25  ;;  %v697_v35 = vmul.f32 %v693_v43, %v3619_v60 }
 0x833   :  { %3322 = vrcp.f32 %v2434_v12  ;;  %v3313_v31 = vpop.eup %3312  ;;  %v2447_v41 = vadd.f32 1.0, %v3311_v6  ;;  %v413_v49 = vrot.slane %v412_v7, 2 }
 0x834   :  { %v3315_v4 = vpop.eup %3314  ;;  %v2324_v30 = vsub.f32 1.0, %v3313_v31  ;;  %v2328_v21 = vmul.f32 %v3313_v31, %v4105_v55  ;;  %v699_v6 = vadd.f32 %v698_v51, %v697_v35  ;;  %v997_v31 = vadd.f32 %v996_v23, %v995_v40  ;;  %v1291_v23 = vld [vmem:[%s4396_s2 + $0x40] sm:$0xff] }
 0x835   :  { %v2448_v8 = vadd.f32 1.0, %v3315_v4  ;;  %3324 = vrcp.f32 %v2447_v41  ;;  %v707_v4 = vmul.f32 %v696_v59, %v3646_v34  ;;  %v4344_v51 = vadd.f32 %v406_v0, %v405_v16 }
 0x836   :  { %v998_v53 = vrot.slane %v997_v31, 4  ;;  %v2175_v40 = vmul.f32 %v4099_v25, %v695_v42 }
 0x837   :  { %3326 = vrcp.f32 %v2448_v8  ;;  %v2185_v8 = vmul.f32 %v4124_v47, %v694_v17 }
 0x839   :  { %v3317_v62 = vpop.eup %3316 }
 0x83a   :  { %v2325_v10 = vmul.f32 %v3317_v62, %v2323_v54  ;;  %v1290_v62 = vld [vmem:[%s4396_s2 + $0x38] sm:$0xff] }
 0x83b   :  { %v3319_v50 = vpop.eup %3318 }
 0x83c   :  { %v3321_v15 = vpop.eup %3320  ;;  %v2329_v28 = vadd.f32 %v2327_v58, %v2325_v10  ;;  %v2326_v63 = vmul.f32 %v3319_v50, %v2324_v30  ;;  %v706_v10 = vmul.f32 %v695_v42, %v3644_v33  ;;  %v993_v58 = vld [vmem:[%s4396_s2 + $0x50] sm:$0xff]  ;;  %v994_v30 = vld [vmem:[%s4396_s2 + $0x58] sm:$0xff]  ;;  %v1292_v50 = vld [vmem:[%s4396_s2 + $0x48] sm:$0xff]  ;;  %v4342_v33 = vadd.f32 %v413_v49, %v412_v7 }
 0x83d   :  { %v2455_v38 = vmul.f32 %v3321_v15, %v2453_v18  ;;  %v3323_v9 = vpop.eup %3322  ;;  %v1294_v18 = vmul.f32 %v1290_v62, %v3789_v46  ;;  %v1005_v7 = vmul.f32 %v994_v30, %v3728_v11  ;;  %v2184_v46 = vmul.f32 %v4122_v1, %v693_v43 }
 0x83e   :  { %v2330_v12 = vadd.f32 %v2328_v21, %v2326_v63  ;;  %v2456_v3 = vmul.f32 %v3323_v9, %v2454_v44  ;;  %v2469_v54 = vmul.f32 %v2329_v28, %v397_v26  ;;  %v700_v26 = vrot.slane %v699_v6, 4 }
 0x83f   :  { %v2457_v60 = vadd.f32 %v2455_v38, %v2333_v14  ;;  %v708_v15 = vadd.f32 %v707_v4, %v706_v10  ;;  %v1588_v28 = vmul.f32 %v3941_v48, %v1292_v50  ;;  %v1891_v63 = vmul.f32 %v4044_v37, %v992_v29  ;;  %v3325_v35 = vpop.eup %3324 }
 0x840   :  { %v2470_v36 = vmul.f32 %v2330_v12, %v4276_v45  ;;  %v2458_v41 = vadd.f32 %v2456_v3, %v2336_v2  ;;  %v1289_v45 = vld [vmem:[%s4396_s2 + $0x30] sm:$0xff]  ;;  %v1004_v21 = vmul.f32 %v993_v58, %v3726_v57  ;;  %v1597_v14 = vmul.f32 %v3962_v22, %v1290_v62 }
 0x841   :  { %3328 = vtanh.f32 %v2457_v60  ;;  %v1293_v16 = vmul.f32 %v1289_v45, %v3783_v39  ;;  %v1303_v17 = vmul.f32 %v1292_v50, %v3840_v61  ;;  %v1587_v38 = vmul.f32 %v3935_v32, %v1291_v23  ;;  %v3327_v22 = vpop.eup %3326 }
 0x842   :  { %v4334_v34 = vadd.f32 %v2470_v36, %v2469_v54  ;;  %3330 = vtanh.f32 %v2458_v41  ;;  %v1890_v44 = vmul.f32 %v4042_v13, %v991_v52  ;;  %v1882_v48 = vmul.f32 %v4023_v27, %v994_v30 }
 0x843   :  { %v2176_v37 = vmul.f32 %v4105_v55, %v696_v59  ;;  %v1596_v57 = vmul.f32 %v3960_v56, %v1289_v45  ;;  %v2186_v11 = vadd.f32 %v2185_v8, %v2184_v46  ;;  %v1302_v39 = vmul.f32 %v1291_v23, %v3838_v5 }
 0x844   :  { %v1295_v29 = vadd.f32 %v1294_v18, %v1293_v16  ;;  %v1892_v9 = vadd.f32 %v1891_v63, %v1890_v44  ;;  %v1589_v43 = vadd.f32 %v1588_v28, %v1587_v38  ;;  %v1881_v61 = vmul.f32 %v4017_v24, %v993_v58 }
 0x845   :  { %v701_v32 = vadd.f32 %v700_v26, %v699_v6  ;;  %v2461_v12 = vsub.f32 1.0, %v3325_v35  ;;  %v709_v13 = vrot.slane %v708_v15, 4  ;;  %v1598_v52 = vadd.f32 %v1597_v14, %v1596_v57 }
 0x846   :  { %v1006_v2 = vadd.f32 %v1005_v7, %v1004_v21  ;;  %v1304_v55 = vadd.f32 %v1303_v17, %v1302_v39  ;;  %v1883_v59 = vadd.f32 %v1882_v48, %v1881_v61  ;;  %v2177_v56 = vadd.f32 %v2176_v37, %v2175_v40 }
 0x847   :  { %v2187_v49 = vrot.slane %v2186_v11, 4  ;;  %v2465_v5 = vmul.f32 %v3325_v35, %v4122_v1  ;;  %v2462_v60 = vsub.f32 1.0, %v3327_v22  ;;  %v1893_v4 = vrot.slane %v1892_v9, 4 }
 0x848   :  { %v999_v54 = vadd.f32 %v998_v53, %v997_v31  ;;  %v1296_v24 = vrot.slane %v1295_v29, 4  ;;  %v1590_v36 = vrot.slane %v1589_v43, 4  ;;  %v2466_v42 = vmul.f32 %v3327_v22, %v4124_v47 }
 0x849   :  { %v1599_v62 = vrot.slane %v1598_v52, 4  ;;  %v710_v41 = vadd.f32 %v709_v13, %v708_v15  ;;  %v1305_v10 = vrot.slane %v1304_v55, 4  ;;  %v702_v58 = vrot.slane %v701_v32, 2 }
 0x84a   :  { %v1884_v30 = vrot.slane %v1883_v59, 4  ;;  %v1007_v45 = vrot.slane %v1006_v2, 4  ;;  %v2188_v50 = vadd.f32 %v2187_v49, %v2186_v11  ;;  %v2178_v18 = vrot.slane %v2177_v56, 4 }
 0x84b   :  { %v3329_v27 = vpop.eup %3328  ;;  %v1894_v1 = vadd.f32 %v1893_v4, %v1892_v9  ;;  %v1000_v8 = vrot.slane %v999_v54, 2  ;;  %v1297_v23 = vadd.f32 %v1296_v24, %v1295_v29  ;;  %v2472_v31 = vrot.slane %v4334_v34, 4 }
 0x84c   :  { %v2463_v0 = vmul.f32 %v3329_v27, %v2461_v12  ;;  %v3331_v3 = vpop.eup %3330  ;;  %v1600_v63 = vadd.f32 %v1599_v62, %v1598_v52  ;;  %v1591_v47 = vadd.f32 %v1590_v36, %v1589_v43  ;;  %v711_v21 = vrot.slane %v710_v41, 2 }
 0x84d   :  { %v2464_v6 = vmul.f32 %v3331_v3, %v2462_v60  ;;  %v1306_v15 = vadd.f32 %v1305_v10, %v1304_v55  ;;  %v703_v7 = vadd.f32 %v702_v58, %v701_v32  ;;  %v1885_v16 = vadd.f32 %v1884_v30, %v1883_v59 }
 0x84e   :  { %v2467_v25 = vadd.f32 %v2465_v5, %v2463_v0  ;;  %v1008_v46 = vadd.f32 %v1007_v45, %v1006_v2  ;;  %v2189_v17 = vrot.slane %v2188_v50, 2  ;;  %v2179_v35 = vadd.f32 %v2178_v18, %v2177_v56 }
 0x84f   :  { %v2468_v26 = vadd.f32 %v2466_v42, %v2464_v6  ;;  %v1895_v38 = vrot.slane %v1894_v1, 2  ;;  %v1001_v44 = vadd.f32 %v1000_v8, %v999_v54  ;;  %v1298_v48 = vrot.slane %v1297_v23, 2 }
 0x850   :  { %v2478_v53 = vmul.f32 %v2467_v25, %v4262_v20  ;;  %v2473_v37 = vadd.f32 %v2472_v31, %v4334_v34  ;;  %v415_v20 = vrot.slane %v4342_v33, 1  ;;  %v1601_v11 = vrot.slane %v1600_v63, 2 }
 0x851   :  { %v2479_v28 = vmul.f32 %v2468_v26, %v4252_v19  ;;  %v1592_v19 = vrot.slane %v1591_v47, 2  ;;  %v712_v39 = vadd.f32 %v711_v21, %v710_v41  ;;  %v1307_v29 = vrot.slane %v1306_v15, 2 }
 0x852   :  { %v704_v22 = vrot.slane %v703_v7, 1  ;;  %v1886_v9 = vrot.slane %v1885_v16, 2  ;;  %v1009_v43 = vrot.slane %v1008_v46, 2  ;;  %v2190_v61 = vadd.f32 %v2189_v17, %v2188_v50 }
 0x853   :  { %v2480_v14 = vadd.f32 %v2479_v28, %v2478_v53  ;;  %v2180_v32 = vrot.slane %v2179_v35, 2  ;;  %v1896_v12 = vadd.f32 %v1895_v38, %v1894_v1  ;;  %v1002_v13 = vrot.slane %v1001_v44, 1 }
 0x854   :  { %v1299_v52 = vadd.f32 %v1298_v48, %v1297_v23  ;;  %v2474_v27 = vrot.slane %v2473_v37, 2  ;;  %v1602_v2 = vadd.f32 %v1601_v11, %v1600_v63  ;;  %v1593_v34 = vadd.f32 %v1592_v19, %v1591_v47 }
 0x855   :  { %v2481_v57 = vrot.slane %v2480_v14, 4  ;;  %v713_v59 = vrot.slane %v712_v39, 1  ;;  %v1308_v56 = vadd.f32 %v1307_v29, %v1306_v15  ;;  %v705_v49 = vadd.f32 %v704_v22, %v703_v7  ;;  %v2749_v22 = vld [vmem:[%s4397_s6] ss:$0 sm:$0xff] }
 0x856   :  { %v1887_v0 = vadd.f32 %v1886_v9, %v1885_v16  ;;  %v1010_v5 = vadd.f32 %v1009_v43, %v1008_v46  ;;  %v2191_v60 = vrot.slane %v2190_v61, 1  ;;  %v2181_v4 = vadd.f32 %v2180_v32, %v2179_v35 }
 0x857   :  { %v2482_v40 = vadd.f32 %v2481_v57, %v2480_v14  ;;  %v1897_v54 = vrot.slane %v1896_v12, 1  ;;  %v1003_v24 = vadd.f32 %v1002_v13, %v1001_v44  ;;  %v1300_v36 = vrot.slane %v1299_v52, 1 }
 0x858   :  { %v2475_v25 = vadd.f32 %v2474_v27, %v2473_v37  ;;  %v1603_v6 = vrot.slane %v1602_v2, 1  ;;  %v1594_v62 = vrot.slane %v1593_v34, 1  ;;  %v714_v41 = vadd.f32 %v713_v59, %v712_v39 }
 0x859   :  { %v2483_v55 = vrot.slane %v2482_v40, 2  ;;  %v1309_v10 = vrot.slane %v1308_v56, 1  ;;  %v1888_v58 = vrot.slane %v1887_v0, 1  ;;  %v2488_v30 = vsel %vm2487_vm2, %v4344_v51, %v705_v49 }
 0x85a   :  { %v1011_v26 = vrot.slane %v1010_v5, 1  ;;  %v2192_v45 = vadd.f32 %v2191_v60, %v2190_v61  ;;  %v2182_v18 = vrot.slane %v2181_v4, 1  ;;  %v1898_v1 = vadd.f32 %v1897_v54, %v1896_v12 }
 0x85b   :  { %v2484_v3 = vadd.f32 %v2483_v55, %v2482_v40  ;;  %v1301_v8 = vadd.f32 %v1300_v36, %v1299_v52  ;;  %v2476_v23 = vrot.slane %v2475_v25, 1  ;;  %v2490_v31 = vsel %vm2489_vm3, %v2488_v30, %v1003_v24 }
 0x85c   :  { %v1604_v53 = vadd.f32 %v1603_v6, %v1602_v2  ;;  %v1595_v63 = vadd.f32 %v1594_v62, %v1593_v34  ;;  %v1310_v47 = vadd.f32 %v1309_v10, %v1308_v56  ;;  %v1889_v15 = vadd.f32 %v1888_v58, %v1887_v0 }
 0x85d   :  { %v2485_v42 = vrot.slane %v2484_v3, 1  ;;  %v1012_v51 = vadd.f32 %v1011_v26, %v1010_v5  ;;  %v2183_v16 = vadd.f32 %v2182_v18, %v2181_v4  ;;  %v2477_v46 = vadd.f32 %v2476_v23, %v2475_v25 }
 0x85e   :  { %v2492_v17 = vsel %vm2491_vm4, %v2490_v31, %v1301_v8  ;;  %v416_v35 = vadd.f32 %v415_v20, %v4342_v33 }
 0x85f   :  { %v2486_v50 = vadd.f32 %v2485_v42, %v2484_v3  ;;  %v2494_v44 = vsel %vm2493_vm5, %v2492_v17, %v1595_v63 }
 0x860   :  { %v2496_v37 = vsel %vm2495_vm6, %v2494_v44, %v1889_v15 }
 0x861   :  { %v2501_v28 = vsel %vm2487_vm2, %v2486_v50, %v2192_v45  ;;  %v2498_v11 = vsel %vm2497_vm7, %v2496_v37, %v2183_v16 }
 0x862   :  { %v2502_v21 = vsel %vm2489_vm3, %v2501_v28, %v1898_v1  ;;  %v2500_v19 = vsel %vm2499_vm8, %v2498_v11, %v2477_v46 }
 0x863   :  { %v2503_v7 = vsel %vm2491_vm4, %v2502_v21, %v1604_v53 }
 0x864   :  { %v2504_v14 = vsel %vm2493_vm5, %v2503_v7, %v1310_v47 }
 0x865   :  { %v2505_v38 = vsel %vm2495_vm6, %v2504_v14, %v1012_v51 }
 0x866   :  { %v2506_v48 = vsel %vm2497_vm7, %v2505_v38, %v714_v41 }
 0x867   :  { %v2507_v57 = vsel %vm2499_vm8, %v2506_v48, %v416_v35 }
 0x868   :  { %2611 = vmatprep.mubr.f32.mxu0 %v2507_v57 }
 0x869   :  { %2612 = vmatmul.mubr.f32.vlgmr.msra.gmra.mrb[56].mxu0 %v2500_v19 }
 0x93c   :  { %v2830_v39 = vpop.f32.mrb[56].mxu0 }
 0x93d   :  { %v2831_v29 = vpop.f32.mrb[57].mxu0 }
 0x93e   :  { %v2832_v9 = vadd.f32 %v2831_v29, %v2830_v39 }
 0x940   :  { %v2614_v43 = vadd.f32 %v2832_v9, %v2749_v22 }
 0x942   :  { %v2618_v33 = vsel %vm2617_vm9, %v2614_v43, -inf }
 0x943   :  { %2619 = vmax.xlane.f32.xlu0 %v2618_v33 }
 0x9d0   :  { %v2620_v20 = vpop.xlane.xlu0 %2619 }
 0x9d1   :  { %v2621_v61 = vsub.f32 %v2614_v43, %v2620_v20 }
 0x9d3   :  { %v2622_v40 = vmul.f32 1.442695, %v2621_v61 }
 0x9d5   :  { %3332 = vpow2.f32 %v2622_v40 }
 0x9df   :  { %v3333_v32 = vpop.eup %3332 }
 0x9e0   :  { %v2624_v12 = vsel %vm2617_vm9, %v3333_v32, 0.0 }
 0x9e1   :  { %2625 = vadd.xlane.f32.xlu0 %v2624_v12 }
 0xa6e   :  { %v2626_v13 = vpop.xlane.xlu0 %2625 }
 0xa6f   :  { %3334 = vrcp.f32 %v2626_v13 }
 0xa79   :  { %v3335_v52 = vpop.eup %3334 }
 0xa7a   :  { %v2628_v27 = vmul.f32 %v3335_v52, %v3333_v32 }
 0xa7c   :  { %2629 = vst.msk [vmem:[%s4398_s7] sm:$0xff] %vm2617_vm9, %v2628_v27 }

</bundles_post_ra>
